<compile_context>
chip_gen: v7x
topology: tpu7x:2x2x1
jax: 0.10.0
libtpu: 0.0.40
codegen_flags: <defaults>
</compile_context>

<pallas_src>
import functools

import numpy as np

import jax
import jax.numpy as jnp
from jax.experimental import pallas as pl
from jax.experimental.pallas import tpu as pltpu


_PAD_OFF = 128   # lane offset of the activation inside the padded conv scratch


# ---------------------------------------------------------------------------
# Trace-time (numpy) constants: conv border masks, pool selection matrices and
# transposed-conv scatter matrices.  Built once per trace, baked in as f32
# constants -> zero in-kernel index arithmetic.
# ---------------------------------------------------------------------------
def _border_masks(h, w):
    """(9, h*w) multiplicative masks; row k = kh*3+kw for tap (dh,dw)=(kh-1,kw-1)."""
    i = np.arange(h * w) // w
    j = np.arange(h * w) % w
    rows = []
    for dh in (-1, 0, 1):
        for dw in (-1, 0, 1):
            ok = (i + dh >= 0) & (i + dh <= h - 1) & (j + dw >= 0) & (j + dw <= w - 1)
            rows.append(ok)
    return np.stack(rows).astype(np.float32)


def _pool_selection(h, w):
    """(h*w, h*w/4) 0/1 gather matrix keeping the (even i, even j) pixels."""
    ho, wo = h // 2, w // 2
    src = np.arange(h * w)[:, None]
    dst = np.arange(ho * wo)[None, :]
    io, jo = dst // wo, dst % wo
    return (src == 2 * io * w + 2 * jo).astype(np.float32)


def _upconv_scatter(h, w):
    """(4*h*w, 4*h*w) 0/1 scatter; row block dd=2*di+dj maps src pixel -> out pixel."""
    wo = 2 * w
    src = np.arange(h * w)[:, None]
    dst = np.arange(4 * h * w)[None, :]
    oi, oj = dst // wo, dst % wo
    blocks = []
    for di in range(2):
        for dj in range(2):
            keep = (oi % 2 == di) & (oj % 2 == dj) & (src == (oi // 2) * w + (oj // 2))
            blocks.append(keep.astype(np.float32))
    return np.concatenate(blocks, axis=0)


# ---------------------------------------------------------------------------
# In-kernel building blocks (per-image; layout value[channel, i*w+j]).
# ---------------------------------------------------------------------------
def _fill_conv_pad(pad_ref, act, *, rows, halo):
    """Stage `act` at lane offset _PAD_OFF; zero only the halo lanes that are read."""
    n = act.shape[1]
    pad_ref[0:rows, _PAD_OFF - halo:_PAD_OFF] = jnp.zeros((rows, halo), jnp.float32)
    pad_ref[0:rows, _PAD_OFF + n:_PAD_OFF + n + halo] = (
        jnp.zeros((rows, halo), jnp.float32))
    pad_ref[0:rows, _PAD_OFF:_PAD_OFF + n] = act


def _conv3x3_relu(pad_ref, col_ref, w_ref, b_ref, mask_ref, *, hh, ww, cin, cout):
    """3x3 / padding-1 conv + bias + ReLU as one fused-K im2col MXU matmul.

    Weight layout: (cout, 9*cin), column k*cin + ci with k = kh*3 + kw
    (== torch Conv2d.weight[cout, ci, kh, kw]).  Border masking uses the
    precomputed (1, h*w) multiplicative masks (no in-kernel iota / where).
    """
    npix = hh * ww
    for dh in (-1, 0, 1):
        for dw in (-1, 0, 1):
            k = (dh + 1) * 3 + (dw + 1)
            d = dh * ww + dw
            win = pad_ref[0:cin, _PAD_OFF + d:_PAD_OFF + d + npix]
            if not (dh == 0 and dw == 0):
                win = win * mask_ref[k:k + 1, :]
            col_ref[k * cin:(k + 1) * cin, 0:npix] = win
    acc = jnp.dot(w_ref[...], col_ref[0:9 * cin, 0:npix],
                  preferred_element_type=jnp.float32)
    return jnp.maximum(acc + b_ref[...], 0.0)


def _maxpool2x2(pad_ref, act, sel_ref, *, hh, ww, ch):
    """2x2 / stride-2 max pool: shifted elementwise maxes + precomputed 0/1 gather."""
    npix = hh * ww
    tail = ww + 1
    pad_ref[0:ch, npix:npix + tail] = jnp.zeros((ch, tail), jnp.float32)
    pad_ref[0:ch, 0:npix] = act
    m = jnp.maximum(act, pad_ref[0:ch, 1:1 + npix])
    m = jnp.maximum(m, pad_ref[0:ch, ww:ww + npix])
    m = jnp.maximum(m, pad_ref[0:ch, ww + 1:ww + 1 + npix])
    return jnp.dot(m, sel_ref[...], preferred_element_type=jnp.float32)


def _upconv2x2(act, w_ref, b_ref, scat_ref, *, npix, ch):
    """ConvTranspose2d(ch->ch, k=2, s=2) via per-offset weight matmul + precomputed
    scatter.  Weight layout: (ch, 4*ch); block dd = 2*di+dj holds W^T, i.e.
    w[co, dd*ch + ci]  <->  torch ConvTranspose2d.weight[ci, co, di, dj]."""
    out = jnp.zeros((ch, 4 * npix), jnp.float32)
    for di in range(2):
        for dj in range(2):
            dd = 2 * di + dj
            wt = w_ref[:, dd * ch:(dd + 1) * ch]                 # (co, ci)
            z = jnp.dot(wt, act, preferred_element_type=jnp.float32)
            out = out + jnp.dot(z, scat_ref[dd * npix:(dd + 1) * npix, :],
                                preferred_element_type=jnp.float32)
    return out + b_ref[...]    # each output pixel receives the bias exactly once


# ---------------------------------------------------------------------------
# The fused per-image kernel (grid axis = batch, "parallel").
# ---------------------------------------------------------------------------
def _small_model_kernel(x_ref, w1_ref, b1_ref, w2_ref, b2_ref, w3_ref, b3_ref,
                        ws_ref, bs_ref, wu2_ref, bu2_ref, wu1_ref, bu1_ref,
                        m1_ref, m2_ref, m3_ref, sel1_ref, sel2_ref,
                        sc2_ref, sc1_ref,
                        out_ref, pad_ref, col_ref,
                        *, cch, hh, ww, num_patches):
    expanded = cch * num_patches

    # layer1: conv3x3(c->32)+ReLU, pool2, conv3x3(32->64)+ReLU, pool2
    _fill_conv_pad(pad_ref, x_ref[...], rows=cch, halo=ww + 1)
    a1 = _conv3x3_relu(pad_ref, col_ref, w1_ref, b1_ref, m1_ref,
                       hh=hh, ww=ww, cin=cch, cout=32)
    p1 = _maxpool2x2(pad_ref, a1, sel1_ref, hh=hh, ww=ww, ch=32)

    hh2, ww2 = hh // 2, ww // 2
    _fill_conv_pad(pad_ref, p1, rows=32, halo=ww2 + 1)
    a2 = _conv3x3_relu(pad_ref, col_ref, w2_ref, b2_ref, m2_ref,
                       hh=hh2, ww=ww2, cin=32, cout=64)
    p2 = _maxpool2x2(pad_ref, a2, sel2_ref, hh=hh2, ww=ww2, ch=64)

    # bottleneck: conv3x3(64->64)+ReLU
    hh4, ww4 = hh // 4, ww // 4
    _fill_conv_pad(pad_ref, p2, rows=64, halo=ww4 + 1)
    a3 = _conv3x3_relu(pad_ref, col_ref, w3_ref, b3_ref, m3_ref,
                       hh=hh4, ww=ww4, cin=64, cout=64)

    # score layer: 1x1 conv (64 -> expanded) + ReLU
    s = jnp.maximum(
        jnp.dot(ws_ref[...], a3, preferred_element_type=jnp.float32) + bs_ref[...],
        0.0)

    # up2, up1: 2x2 / stride-2 transposed convs (expanded -> expanded)
    u2 = _upconv2x2(s, wu2_ref, bu2_ref, sc2_ref, npix=hh4 * ww4, ch=expanded)
    u1 = _upconv2x2(u2, wu1_ref, bu1_ref, sc1_ref, npix=hh2 * ww2, ch=expanded)

    # softmax over the patch axis (channel e = p*cch + c of the NCHW view)
    chunks = [u1[p * cch:(p + 1) * cch, :] for p in range(num_patches)]
    mx = chunks[0]
    for c_ in chunks[1:]:
        mx = jnp.maximum(mx, c_)
    exps = [jnp.exp(c_ - mx) for c_ in chunks]
    tot = exps[0]
    for e_ in exps[1:]:
        tot = tot + e_
    # Exact reciprocal so the probabilities sum to 1 within 1e-5.
    inv = pl.reciprocal(tot, approx=False)

    # Assemble the whole (expanded, h*w) block -> one (8,128)-aligned store.
    out_ref[...] = jnp.concatenate([e_ * inv for e_ in exps], axis=0)


# ---------------------------------------------------------------------------
# Wrapper, parameters, pure-JAX reference.
# ---------------------------------------------------------------------------
def small_model_forward(x_nchw, params, *, c, h, w, num_patches):
    b = x_nchw.shape[0]
    expanded = c * num_patches
    hw = h * w
    assert w + 1 <= _PAD_OFF and h % 4 == 0 and w % 4 == 0

    x3 = x_nchw.reshape(b, c, hw)          # free reshape of contiguous NCHW

    # Shape-only 0/1 matrices & masks (numpy, trace-time constants).
    m1 = _border_masks(h, w)
    m2 = _border_masks(h // 2, w // 2)
    m3 = _border_masks(h // 4, w // 4)
    sel1 = _pool_selection(h, w)
    sel2 = _pool_selection(h // 2, w // 2)
    sc2 = _upconv_scatter(h // 4, w // 4)
    sc1 = _upconv_scatter(h // 2, w // 2)

    inputs = (x3,
              params["conv1_w"], params["conv1_b"],
              params["conv2_w"], params["conv2_b"],
              params["bn_w"], params["bn_b"],
              params["score_w"], params["score_b"],
              params["up2_w"], params["up2_b"],
              params["up1_w"], params["up1_b"],
              m1, m2, m3, sel1, sel2, sc2, sc1)

    def whole(a):   # full-array block, same for every grid step
        return pl.BlockSpec(tuple(a.shape), lambda i: (0,) * a.ndim)

    in_specs = ([pl.BlockSpec((None, c, hw), lambda i: (i, 0, 0))]
                + [whole(a) for a in inputs[1:]])

    kernel = functools.partial(_small_model_kernel, cch=c, hh=h, ww=w,
                               num_patches=num_patches)

    out3 = pl.pallas_call(
        kernel,
        out_shape=jax.ShapeDtypeStruct((b, expanded, hw), jnp.float32),
        grid=(b,),
        in_specs=in_specs,
        out_specs=pl.BlockSpec((None, expanded, hw), lambda i: (i, 0, 0)),
        scratch_shapes=[
            pltpu.VMEM((64, _PAD_OFF + hw + w + 1), jnp.float32),   # padded act
            pltpu.VMEM((9 * 64, hw), jnp.float32),                  # im2col
        ],
        compiler_params=pltpu.CompilerParams(
            dimension_semantics=("parallel",)),
    )(*inputs)

    # Free reshape: channel index p*c + cc, lane index i*w + j
    # == the torch .view(b, num_patches, c, h, w) of the NCHW tensor.
    return out3.reshape(b, num_patches, c, h, w)


def init_params(key, c, num_patches):
    """Parameters stored directly in the kernel-friendly layouts (see helpers)."""
    expanded = c * num_patches
    ks = jax.random.split(key, 12)

    def wconv(k, cout, cin):       # (cout, 9*cin), column k*cin+ci, k = kh*3+kw
        fan_in = 9 * cin
        return jax.random.normal(k, (cout, 9 * cin), jnp.float32) / jnp.sqrt(float(fan_in))

    def wup(k, ch):                # (ch, 4*ch), block dd = 2*di+dj holds W^T
        return jax.random.normal(k, (ch, 4 * ch), jnp.float32) / jnp.sqrt(float(ch))

    def bias(k, n):                # (n, 1): broadcasts over lanes in-kernel
        return 0.01 * jax.random.normal(k, (n, 1), jnp.float32)

    return {
        "conv1_w": wconv(ks[0], 32, c), "conv1_b": bias(ks[1], 32),
        "conv2_w": wconv(ks[2], 64, 32), "conv2_b": bias(ks[3], 64),
        "bn_w": wconv(ks[4], 64, 64), "bn_b": bias(ks[5], 64),
        "score_w": jax.random.normal(ks[6], (expanded, 64), jnp.float32) / jnp.sqrt(64.0),
        "score_b": bias(ks[7], expanded),
        "up2_w": wup(ks[8], expanded), "up2_b": bias(ks[9], expanded),
        "up1_w": wup(ks[10], expanded), "up1_b": bias(ks[11], expanded),
    }


def _reference_forward(x_nchw, params, *, c, h, w, num_patches):
    """Pure-JAX (non-Pallas) reference with the same parameter layout."""
    hp = jax.lax.Precision.HIGHEST

    def conv3x3(x, w2d, b):
        bsz, cin, hh, ww = x.shape
        xp = jnp.pad(x, ((0, 0), (0, 0), (1, 1), (1, 1)))
        cols = jnp.concatenate(
            [xp[:, :, kh:kh + hh, kw:kw + ww] for kh in range(3) for kw in range(3)],
            axis=1)                                            # (b, 9*cin, h, w)
        y = jnp.einsum("bkhw,ok->bohw", cols, w2d, precision=hp)
        return y + b.reshape(1, -1, 1, 1)

    def maxpool2(x):
        bsz, ch, hh, ww = x.shape
        return x.reshape(bsz, ch, hh // 2, 2, ww // 2, 2).max(axis=(3, 5))

    def upconv(x, wup, b):
        bsz, ch, hh, ww = x.shape
        wr = wup.reshape(ch, 4, ch)                            # [co, 2*di+dj, ci]
        z = jnp.einsum("bchw,odc->bodhw", x, wr, precision=hp)
        z = z.reshape(bsz, ch, 2, 2, hh, ww)
        z = jnp.transpose(z, (0, 1, 4, 2, 5, 3)).reshape(bsz, ch, 2 * hh, 2 * ww)
        return z + b.reshape(1, -1, 1, 1)

    x = jax.nn.relu(conv3x3(x_nchw, params["conv1_w"], params["conv1_b"]))
    x = maxpool2(x)
    x = jax.nn.relu(conv3x3(x, params["conv2_w"], params["conv2_b"]))
    x = maxpool2(x)
    x = jax.nn.relu(conv3x3(x, params["bn_w"], params["bn_b"]))
    x = jax.nn.relu(jnp.einsum("bchw,oc->bohw", x, params["score_w"], precision=hp)
                    + params["score_b"].reshape(1, -1, 1, 1))
    x = upconv(x, params["up2_w"], params["up2_b"])
    x = upconv(x, params["up1_w"], params["up1_b"])
    b = x.shape[0]
    return jax.nn.softmax(x.reshape(b, num_patches, c, h, w), axis=1)


if __name__ == "__main__":
    B, C, H, W = 2, 4, 16, 16
    patch_sizes = (1, 2)               # num_patches = 2, expanded = 8
    NUM_PATCHES = len(patch_sizes)

    key = jax.random.PRNGKey(0)
    kx, kp = jax.random.split(key)
    x = jax.random.normal(kx, (B, C, H, W), jnp.float32)
    params = init_params(kp, C, NUM_PATCHES)

    fwd = jax.jit(functools.partial(
        small_model_forward, c=C, h=H, w=W, num_patches=NUM_PATCHES))
    out = jax.block_until_ready(fwd(x, params))

    assert out.shape == (B, NUM_PATCHES, C, H, W), out.shape
    assert bool(jnp.all(jnp.isfinite(out)))
    # softmax over the patch dim must sum to 1
    assert bool(jnp.allclose(jnp.sum(out, axis=1), 1.0, atol=1e-5))

    # Structural correctness check against a pure-JAX reference (tolerance is
    # loose only to stay robust to MXU f32-pass vs XLA precision differences).
    ref = jax.jit(functools.partial(
        _reference_forward, c=C, h=H, w=W, num_patches=NUM_PATCHES))(x, params)
    assert bool(jnp.allclose(out, ref, atol=5e-3)), float(jnp.max(jnp.abs(out - ref)))

    print("KERNEL_OK")
</pallas_src>

<mosaic_0001>
module attributes {stable_mosaic.version = 11 : i64} {
  func.func @_small_model_kernel(%arg0: i32, %arg1: memref<1x4x256xf32, #tpu.memory_space<vmem>>, %arg2: memref<32x36xf32, #tpu.memory_space<vmem>>, %arg3: memref<32x1xf32, #tpu.memory_space<vmem>>, %arg4: memref<64x288xf32, #tpu.memory_space<vmem>>, %arg5: memref<64x1xf32, #tpu.memory_space<vmem>>, %arg6: memref<64x576xf32, #tpu.memory_space<vmem>>, %arg7: memref<64x1xf32, #tpu.memory_space<vmem>>, %arg8: memref<8x64xf32, #tpu.memory_space<vmem>>, %arg9: memref<8x1xf32, #tpu.memory_space<vmem>>, %arg10: memref<8x32xf32, #tpu.memory_space<vmem>>, %arg11: memref<8x1xf32, #tpu.memory_space<vmem>>, %arg12: memref<8x32xf32, #tpu.memory_space<vmem>>, %arg13: memref<8x1xf32, #tpu.memory_space<vmem>>, %arg14: memref<9x256xf32, #tpu.memory_space<vmem>>, %arg15: memref<9x64xf32, #tpu.memory_space<vmem>>, %arg16: memref<9x16xf32, #tpu.memory_space<vmem>>, %arg17: memref<256x64xf32, #tpu.memory_space<vmem>>, %arg18: memref<64x16xf32, #tpu.memory_space<vmem>>, %arg19: memref<64x64xf32, #tpu.memory_space<vmem>>, %arg20: memref<256x256xf32, #tpu.memory_space<vmem>>, %arg21: memref<1x8x256xf32, #tpu.memory_space<vmem>>, %arg22: memref<64x401xf32, #tpu.memory_space<vmem>>, %arg23: memref<576x256xf32, #tpu.memory_space<vmem>>) attributes {dimension_semantics = [#tpu.dimension_semantics<parallel>], iteration_bounds = array<i64: 2>, scalar_prefetch = 0 : i64, scratch_operands = 2 : i64, tpu.core_type = #tpu.core_type<tc>, window_params = [{transform_indices = @transform_0, window_bounds = array<i64: 1, 4, 256>}, {pipeline_mode = #tpu.pipeline_mode<synchronous>, transform_indices = @transform_1, window_bounds = array<i64: 32, 36>}, {pipeline_mode = #tpu.pipeline_mode<synchronous>, transform_indices = @transform_2, window_bounds = array<i64: 32, 1>}, {pipeline_mode = #tpu.pipeline_mode<synchronous>, transform_indices = @transform_3, window_bounds = array<i64: 64, 288>}, {pipeline_mode = #tpu.pipeline_mode<synchronous>, transform_indices = @transform_4, window_bounds = array<i64: 64, 1>}, {pipeline_mode = #tpu.pipeline_mode<synchronous>, transform_indices = @transform_5, window_bounds = array<i64: 64, 576>}, {pipeline_mode = #tpu.pipeline_mode<synchronous>, transform_indices = @transform_6, window_bounds = array<i64: 64, 1>}, {pipeline_mode = #tpu.pipeline_mode<synchronous>, transform_indices = @transform_7, window_bounds = array<i64: 8, 64>}, {pipeline_mode = #tpu.pipeline_mode<synchronous>, transform_indices = @transform_8, window_bounds = array<i64: 8, 1>}, {pipeline_mode = #tpu.pipeline_mode<synchronous>, transform_indices = @transform_9, window_bounds = array<i64: 8, 32>}, {pipeline_mode = #tpu.pipeline_mode<synchronous>, transform_indices = @transform_10, window_bounds = array<i64: 8, 1>}, {pipeline_mode = #tpu.pipeline_mode<synchronous>, transform_indices = @transform_11, window_bounds = array<i64: 8, 32>}, {pipeline_mode = #tpu.pipeline_mode<synchronous>, transform_indices = @transform_12, window_bounds = array<i64: 8, 1>}, {pipeline_mode = #tpu.pipeline_mode<synchronous>, transform_indices = @transform_13, window_bounds = array<i64: 9, 256>}, {pipeline_mode = #tpu.pipeline_mode<synchronous>, transform_indices = @transform_14, window_bounds = array<i64: 9, 64>}, {pipeline_mode = #tpu.pipeline_mode<synchronous>, transform_indices = @transform_15, window_bounds = array<i64: 9, 16>}, {pipeline_mode = #tpu.pipeline_mode<synchronous>, transform_indices = @transform_16, window_bounds = array<i64: 256, 64>}, {pipeline_mode = #tpu.pipeline_mode<synchronous>, transform_indices = @transform_17, window_bounds = array<i64: 64, 16>}, {pipeline_mode = #tpu.pipeline_mode<synchronous>, transform_indices = @transform_18, window_bounds = array<i64: 64, 64>}, {pipeline_mode = #tpu.pipeline_mode<synchronous>, transform_indices = @transform_19, window_bounds = array<i64: 256, 256>}, {transform_indices = @transform_20, window_bounds = array<i64: 1, 8, 256>}]} {
    %c0 = arith.constant 0 : index
    %c0_0 = arith.constant 0 : index
    %c0_1 = arith.constant 0 : index
    %0 = vector.load %arg1[%c0, %c0_0, %c0_1] : memref<1x4x256xf32, #tpu.memory_space<vmem>>, vector<1x4x256xf32>
    %1 = vector.shape_cast %0 : vector<1x4x256xf32> to vector<4x256xf32>
    %cst = arith.constant 0.000000e+00 : f32
    %2 = vector.broadcast %cst : f32 to vector<4x17xf32>
    %c0_2 = arith.constant 0 : index
    %c111 = arith.constant 111 : index
    %3 = vector.load %arg22[%c0_2, %c111] : memref<64x401xf32, #tpu.memory_space<vmem>>, vector<4x17xf32>
    tpu.vector_store %arg22[%c0_2, %c111], %2 {strides = array<i32>} : memref<64x401xf32, #tpu.memory_space<vmem>>, vector<4x17xf32>,
    %cst_3 = arith.constant 0.000000e+00 : f32
    %4 = vector.broadcast %cst_3 : f32 to vector<4x17xf32>
    %c0_4 = arith.constant 0 : index
    %c384 = arith.constant 384 : index
    %5 = vector.load %arg22[%c0_4, %c384] : memref<64x401xf32, #tpu.memory_space<vmem>>, vector<4x17xf32>
    tpu.vector_store %arg22[%c0_4, %c384], %4 {strides = array<i32>} : memref<64x401xf32, #tpu.memory_space<vmem>>, vector<4x17xf32>,
    %c0_5 = arith.constant 0 : index
    %c128 = arith.constant 128 : index
    %6 = vector.load %arg22[%c0_5, %c128] : memref<64x401xf32, #tpu.memory_space<vmem>>, vector<4x256xf32>
    tpu.vector_store %arg22[%c0_5, %c128], %1 {strides = array<i32>} : memref<64x401xf32, #tpu.memory_space<vmem>>, vector<4x256xf32>,
    %c0_6 = arith.constant 0 : index
    %c111_7 = arith.constant 111 : index
    %7 = vector.load %arg22[%c0_6, %c111_7] : memref<64x401xf32, #tpu.memory_space<vmem>>, vector<4x256xf32>
    %c0_8 = arith.constant 0 : index
    %c0_9 = arith.constant 0 : index
    %8 = vector.load %arg14[%c0_8, %c0_9] : memref<9x256xf32, #tpu.memory_space<vmem>>, vector<1x256xf32>
    %9 = vector.broadcast %8 : vector<1x256xf32> to vector<4x256xf32>
    %10 = arith.mulf %7, %9 : vector<4x256xf32>
    %c0_10 = arith.constant 0 : index
    %c0_11 = arith.constant 0 : index
    %11 = vector.load %arg23[%c0_10, %c0_11] : memref<576x256xf32, #tpu.memory_space<vmem>>, vector<4x256xf32>
    tpu.vector_store %arg23[%c0_10, %c0_11], %10 {strides = array<i32>} : memref<576x256xf32, #tpu.memory_space<vmem>>, vector<4x256xf32>,
    %c0_12 = arith.constant 0 : index
    %c112 = arith.constant 112 : index
    %12 = vector.load %arg22[%c0_12, %c112] : memref<64x401xf32, #tpu.memory_space<vmem>>, vector<4x256xf32>
    %c1 = arith.constant 1 : index
    %c0_13 = arith.constant 0 : index
    %13 = vector.load %arg14[%c1, %c0_13] : memref<9x256xf32, #tpu.memory_space<vmem>>, vector<1x256xf32>
    %14 = vector.broadcast %13 : vector<1x256xf32> to vector<4x256xf32>
    %15 = arith.mulf %12, %14 : vector<4x256xf32>
    %c4 = arith.constant 4 : index
    %c0_14 = arith.constant 0 : index
    %16 = vector.load %arg23[%c4, %c0_14] : memref<576x256xf32, #tpu.memory_space<vmem>>, vector<4x256xf32>
    tpu.vector_store %arg23[%c4, %c0_14], %15 {strides = array<i32>} : memref<576x256xf32, #tpu.memory_space<vmem>>, vector<4x256xf32>,
    %c0_15 = arith.constant 0 : index
    %c113 = arith.constant 113 : index
    %17 = vector.load %arg22[%c0_15, %c113] : memref<64x401xf32, #tpu.memory_space<vmem>>, vector<4x256xf32>
    %c2 = arith.constant 2 : index
    %c0_16 = arith.constant 0 : index
    %18 = vector.load %arg14[%c2, %c0_16] : memref<9x256xf32, #tpu.memory_space<vmem>>, vector<1x256xf32>
    %19 = vector.broadcast %18 : vector<1x256xf32> to vector<4x256xf32>
    %20 = arith.mulf %17, %19 : vector<4x256xf32>
    %c8 = arith.constant 8 : index
    %c0_17 = arith.constant 0 : index
    %21 = vector.load %arg23[%c8, %c0_17] : memref<576x256xf32, #tpu.memory_space<vmem>>, vector<4x256xf32>
    tpu.vector_store %arg23[%c8, %c0_17], %20 {strides = array<i32>} : memref<576x256xf32, #tpu.memory_space<vmem>>, vector<4x256xf32>,
    %c0_18 = arith.constant 0 : index
    %c127 = arith.constant 127 : index
    %22 = vector.load %arg22[%c0_18, %c127] : memref<64x401xf32, #tpu.memory_space<vmem>>, vector<4x256xf32>
    %c3 = arith.constant 3 : index
    %c0_19 = arith.constant 0 : index
    %23 = vector.load %arg14[%c3, %c0_19] : memref<9x256xf32, #tpu.memory_space<vmem>>, vector<1x256xf32>
    %24 = vector.broadcast %23 : vector<1x256xf32> to vector<4x256xf32>
    %25 = arith.mulf %22, %24 : vector<4x256xf32>
    %c12 = arith.constant 12 : index
    %c0_20 = arith.constant 0 : index
    %26 = vector.load %arg23[%c12, %c0_20] : memref<576x256xf32, #tpu.memory_space<vmem>>, vector<4x256xf32>
    tpu.vector_store %arg23[%c12, %c0_20], %25 {strides = array<i32>} : memref<576x256xf32, #tpu.memory_space<vmem>>, vector<4x256xf32>,
    %c0_21 = arith.constant 0 : index
    %c128_22 = arith.constant 128 : index
    %27 = vector.load %arg22[%c0_21, %c128_22] : memref<64x401xf32, #tpu.memory_space<vmem>>, vector<4x256xf32>
    %c16 = arith.constant 16 : index
    %c0_23 = arith.constant 0 : index
    %28 = vector.load %arg23[%c16, %c0_23] : memref<576x256xf32, #tpu.memory_space<vmem>>, vector<4x256xf32>
    tpu.vector_store %arg23[%c16, %c0_23], %27 {strides = array<i32>} : memref<576x256xf32, #tpu.memory_space<vmem>>, vector<4x256xf32>,
    %c0_24 = arith.constant 0 : index
    %c129 = arith.constant 129 : index
    %29 = vector.load %arg22[%c0_24, %c129] : memref<64x401xf32, #tpu.memory_space<vmem>>, vector<4x256xf32>
    %c5 = arith.constant 5 : index
    %c0_25 = arith.constant 0 : index
    %30 = vector.load %arg14[%c5, %c0_25] : memref<9x256xf32, #tpu.memory_space<vmem>>, vector<1x256xf32>
    %31 = vector.broadcast %30 : vector<1x256xf32> to vector<4x256xf32>
    %32 = arith.mulf %29, %31 : vector<4x256xf32>
    %c20 = arith.constant 20 : index
    %c0_26 = arith.constant 0 : index
    %33 = vector.load %arg23[%c20, %c0_26] : memref<576x256xf32, #tpu.memory_space<vmem>>, vector<4x256xf32>
    tpu.vector_store %arg23[%c20, %c0_26], %32 {strides = array<i32>} : memref<576x256xf32, #tpu.memory_space<vmem>>, vector<4x256xf32>,
    %c0_27 = arith.constant 0 : index
    %c143 = arith.constant 143 : index
    %34 = vector.load %arg22[%c0_27, %c143] : memref<64x401xf32, #tpu.memory_space<vmem>>, vector<4x256xf32>
    %c6 = arith.constant 6 : index
    %c0_28 = arith.constant 0 : index
    %35 = vector.load %arg14[%c6, %c0_28] : memref<9x256xf32, #tpu.memory_space<vmem>>, vector<1x256xf32>
    %36 = vector.broadcast %35 : vector<1x256xf32> to vector<4x256xf32>
    %37 = arith.mulf %34, %36 : vector<4x256xf32>
    %c24 = arith.constant 24 : index
    %c0_29 = arith.constant 0 : index
    %38 = vector.load %arg23[%c24, %c0_29] : memref<576x256xf32, #tpu.memory_space<vmem>>, vector<4x256xf32>
    tpu.vector_store %arg23[%c24, %c0_29], %37 {strides = array<i32>} : memref<576x256xf32, #tpu.memory_space<vmem>>, vector<4x256xf32>,
    %c0_30 = arith.constant 0 : index
    %c144 = arith.constant 144 : index
    %39 = vector.load %arg22[%c0_30, %c144] : memref<64x401xf32, #tpu.memory_space<vmem>>, vector<4x256xf32>
    %c7 = arith.constant 7 : index
    %c0_31 = arith.constant 0 : index
    %40 = vector.load %arg14[%c7, %c0_31] : memref<9x256xf32, #tpu.memory_space<vmem>>, vector<1x256xf32>
    %41 = vector.broadcast %40 : vector<1x256xf32> to vector<4x256xf32>
    %42 = arith.mulf %39, %41 : vector<4x256xf32>
    %c28 = arith.constant 28 : index
    %c0_32 = arith.constant 0 : index
    %43 = vector.load %arg23[%c28, %c0_32] : memref<576x256xf32, #tpu.memory_space<vmem>>, vector<4x256xf32>
    tpu.vector_store %arg23[%c28, %c0_32], %42 {strides = array<i32>} : memref<576x256xf32, #tpu.memory_space<vmem>>, vector<4x256xf32>,
    %c0_33 = arith.constant 0 : index
    %c145 = arith.constant 145 : index
    %44 = vector.load %arg22[%c0_33, %c145] : memref<64x401xf32, #tpu.memory_space<vmem>>, vector<4x256xf32>
    %c8_34 = arith.constant 8 : index
    %c0_35 = arith.constant 0 : index
    %45 = vector.load %arg14[%c8_34, %c0_35] : memref<9x256xf32, #tpu.memory_space<vmem>>, vector<1x256xf32>
    %46 = vector.broadcast %45 : vector<1x256xf32> to vector<4x256xf32>
    %47 = arith.mulf %44, %46 : vector<4x256xf32>
    %c32 = arith.constant 32 : index
    %c0_36 = arith.constant 0 : index
    %48 = vector.load %arg23[%c32, %c0_36] : memref<576x256xf32, #tpu.memory_space<vmem>>, vector<4x256xf32>
    tpu.vector_store %arg23[%c32, %c0_36], %47 {strides = array<i32>} : memref<576x256xf32, #tpu.memory_space<vmem>>, vector<4x256xf32>,
    %c0_37 = arith.constant 0 : index
    %c0_38 = arith.constant 0 : index
    %49 = vector.load %arg2[%c0_37, %c0_38] : memref<32x36xf32, #tpu.memory_space<vmem>>, vector<32x36xf32>
    %c0_39 = arith.constant 0 : index
    %c0_40 = arith.constant 0 : index
    %50 = vector.load %arg23[%c0_39, %c0_40] : memref<576x256xf32, #tpu.memory_space<vmem>>, vector<36x256xf32>
    %cst_41 = arith.constant dense<0.000000e+00> : vector<32x256xf32>
    %51 = tpu.matmul %49, %50, %cst_41 {dimension_numbers = #tpu.dot_dimension_numbers<[1], [0], [0], [1], [0, 0, 1, 1], [], []>} : vector<32x36xf32>, vector<36x256xf32>, vector<32x256xf32> -> vector<32x256xf32>
    %c0_42 = arith.constant 0 : index
    %c0_43 = arith.constant 0 : index
    %52 = vector.load %arg3[%c0_42, %c0_43] : memref<32x1xf32, #tpu.memory_space<vmem>>, vector<32x1xf32>
    %53 = vector.broadcast %52 : vector<32x1xf32> to vector<32x256xf32>
    %54 = arith.addf %51, %53 : vector<32x256xf32>
    %cst_44 = arith.constant 0.000000e+00 : f32
    %55 = vector.broadcast %cst_44 : f32 to vector<32x256xf32>
    %56 = arith.maximumf %54, %55 : vector<32x256xf32>
    %cst_45 = arith.constant 0.000000e+00 : f32
    %57 = vector.broadcast %cst_45 : f32 to vector<32x17xf32>
    %c0_46 = arith.constant 0 : index
    %c256 = arith.constant 256 : index
    %58 = vector.load %arg22[%c0_46, %c256] : memref<64x401xf32, #tpu.memory_space<vmem>>, vector<32x17xf32>
    tpu.vector_store %arg22[%c0_46, %c256], %57 {strides = array<i32>} : memref<64x401xf32, #tpu.memory_space<vmem>>, vector<32x17xf32>,
    %c0_47 = arith.constant 0 : index
    %c0_48 = arith.constant 0 : index
    %59 = vector.load %arg22[%c0_47, %c0_48] : memref<64x401xf32, #tpu.memory_space<vmem>>, vector<32x256xf32>
    tpu.vector_store %arg22[%c0_47, %c0_48], %56 {strides = array<i32>} : memref<64x401xf32, #tpu.memory_space<vmem>>, vector<32x256xf32>,
    %c0_49 = arith.constant 0 : index
    %c1_50 = arith.constant 1 : index
    %60 = vector.load %arg22[%c0_49, %c1_50] : memref<64x401xf32, #tpu.memory_space<vmem>>, vector<32x256xf32>
    %61 = arith.maximumf %56, %60 : vector<32x256xf32>
    %c0_51 = arith.constant 0 : index
    %c16_52 = arith.constant 16 : index
    %62 = vector.load %arg22[%c0_51, %c16_52] : memref<64x401xf32, #tpu.memory_space<vmem>>, vector<32x256xf32>
    %63 = arith.maximumf %61, %62 : vector<32x256xf32>
    %c0_53 = arith.constant 0 : index
    %c17 = arith.constant 17 : index
    %64 = vector.load %arg22[%c0_53, %c17] : memref<64x401xf32, #tpu.memory_space<vmem>>, vector<32x256xf32>
    %65 = arith.maximumf %63, %64 : vector<32x256xf32>
    %c0_54 = arith.constant 0 : index
    %c0_55 = arith.constant 0 : index
    %66 = vector.load %arg17[%c0_54, %c0_55] : memref<256x64xf32, #tpu.memory_space<vmem>>, vector<256x64xf32>
    %cst_56 = arith.constant dense<0.000000e+00> : vector<32x64xf32>
    %67 = tpu.matmul %65, %66, %cst_56 {dimension_numbers = #tpu.dot_dimension_numbers<[1], [0], [0], [1], [0, 0, 1, 1], [], []>} : vector<32x256xf32>, vector<256x64xf32>, vector<32x64xf32> -> vector<32x64xf32>
    %cst_57 = arith.constant 0.000000e+00 : f32
    %68 = vector.broadcast %cst_57 : f32 to vector<32x9xf32>
    %c0_58 = arith.constant 0 : index
    %c119 = arith.constant 119 : index
    %69 = vector.load %arg22[%c0_58, %c119] : memref<64x401xf32, #tpu.memory_space<vmem>>, vector<32x9xf32>
    tpu.vector_store %arg22[%c0_58, %c119], %68 {strides = array<i32>} : memref<64x401xf32, #tpu.memory_space<vmem>>, vector<32x9xf32>,
    %cst_59 = arith.constant 0.000000e+00 : f32
    %70 = vector.broadcast %cst_59 : f32 to vector<32x9xf32>
    %c0_60 = arith.constant 0 : index
    %c192 = arith.constant 192 : index
    %71 = vector.load %arg22[%c0_60, %c192] : memref<64x401xf32, #tpu.memory_space<vmem>>, vector<32x9xf32>
    tpu.vector_store %arg22[%c0_60, %c192], %70 {strides = array<i32>} : memref<64x401xf32, #tpu.memory_space<vmem>>, vector<32x9xf32>,
    %c0_61 = arith.constant 0 : index
    %c128_62 = arith.constant 128 : index
    %72 = vector.load %arg22[%c0_61, %c128_62] : memref<64x401xf32, #tpu.memory_space<vmem>>, vector<32x64xf32>
    tpu.vector_store %arg22[%c0_61, %c128_62], %67 {strides = array<i32>} : memref<64x401xf32, #tpu.memory_space<vmem>>, vector<32x64xf32>,
    %c0_63 = arith.constant 0 : index
    %c119_64 = arith.constant 119 : index
    %73 = vector.load %arg22[%c0_63, %c119_64] : memref<64x401xf32, #tpu.memory_space<vmem>>, vector<32x64xf32>
    %c0_65 = arith.constant 0 : index
    %c0_66 = arith.constant 0 : index
    %74 = vector.load %arg15[%c0_65, %c0_66] : memref<9x64xf32, #tpu.memory_space<vmem>>, vector<1x64xf32>
    %75 = vector.broadcast %74 : vector<1x64xf32> to vector<32x64xf32>
    %76 = arith.mulf %73, %75 : vector<32x64xf32>
    %c0_67 = arith.constant 0 : index
    %c0_68 = arith.constant 0 : index
    %77 = vector.load %arg23[%c0_67, %c0_68] : memref<576x256xf32, #tpu.memory_space<vmem>>, vector<32x64xf32>
    tpu.vector_store %arg23[%c0_67, %c0_68], %76 {strides = array<i32>} : memref<576x256xf32, #tpu.memory_space<vmem>>, vector<32x64xf32>,
    %c0_69 = arith.constant 0 : index
    %c120 = arith.constant 120 : index
    %78 = vector.load %arg22[%c0_69, %c120] : memref<64x401xf32, #tpu.memory_space<vmem>>, vector<32x64xf32>
    %c1_70 = arith.constant 1 : index
    %c0_71 = arith.constant 0 : index
    %79 = vector.load %arg15[%c1_70, %c0_71] : memref<9x64xf32, #tpu.memory_space<vmem>>, vector<1x64xf32>
    %80 = vector.broadcast %79 : vector<1x64xf32> to vector<32x64xf32>
    %81 = arith.mulf %78, %80 : vector<32x64xf32>
    %c32_72 = arith.constant 32 : index
    %c0_73 = arith.constant 0 : index
    %82 = vector.load %arg23[%c32_72, %c0_73] : memref<576x256xf32, #tpu.memory_space<vmem>>, vector<32x64xf32>
    tpu.vector_store %arg23[%c32_72, %c0_73], %81 {strides = array<i32>} : memref<576x256xf32, #tpu.memory_space<vmem>>, vector<32x64xf32>,
    %c0_74 = arith.constant 0 : index
    %c121 = arith.constant 121 : index
    %83 = vector.load %arg22[%c0_74, %c121] : memref<64x401xf32, #tpu.memory_space<vmem>>, vector<32x64xf32>
    %c2_75 = arith.constant 2 : index
    %c0_76 = arith.constant 0 : index
    %84 = vector.load %arg15[%c2_75, %c0_76] : memref<9x64xf32, #tpu.memory_space<vmem>>, vector<1x64xf32>
    %85 = vector.broadcast %84 : vector<1x64xf32> to vector<32x64xf32>
    %86 = arith.mulf %83, %85 : vector<32x64xf32>
    %c64 = arith.constant 64 : index
    %c0_77 = arith.constant 0 : index
    %87 = vector.load %arg23[%c64, %c0_77] : memref<576x256xf32, #tpu.memory_space<vmem>>, vector<32x64xf32>
    tpu.vector_store %arg23[%c64, %c0_77], %86 {strides = array<i32>} : memref<576x256xf32, #tpu.memory_space<vmem>>, vector<32x64xf32>,
    %c0_78 = arith.constant 0 : index
    %c127_79 = arith.constant 127 : index
    %88 = vector.load %arg22[%c0_78, %c127_79] : memref<64x401xf32, #tpu.memory_space<vmem>>, vector<32x64xf32>
    %c3_80 = arith.constant 3 : index
    %c0_81 = arith.constant 0 : index
    %89 = vector.load %arg15[%c3_80, %c0_81] : memref<9x64xf32, #tpu.memory_space<vmem>>, vector<1x64xf32>
    %90 = vector.broadcast %89 : vector<1x64xf32> to vector<32x64xf32>
    %91 = arith.mulf %88, %90 : vector<32x64xf32>
    %c96 = arith.constant 96 : index
    %c0_82 = arith.constant 0 : index
    %92 = vector.load %arg23[%c96, %c0_82] : memref<576x256xf32, #tpu.memory_space<vmem>>, vector<32x64xf32>
    tpu.vector_store %arg23[%c96, %c0_82], %91 {strides = array<i32>} : memref<576x256xf32, #tpu.memory_space<vmem>>, vector<32x64xf32>,
    %c0_83 = arith.constant 0 : index
    %c128_84 = arith.constant 128 : index
    %93 = vector.load %arg22[%c0_83, %c128_84] : memref<64x401xf32, #tpu.memory_space<vmem>>, vector<32x64xf32>
    %c128_85 = arith.constant 128 : index
    %c0_86 = arith.constant 0 : index
    %94 = vector.load %arg23[%c128_85, %c0_86] : memref<576x256xf32, #tpu.memory_space<vmem>>, vector<32x64xf32>
    tpu.vector_store %arg23[%c128_85, %c0_86], %93 {strides = array<i32>} : memref<576x256xf32, #tpu.memory_space<vmem>>, vector<32x64xf32>,
    %c0_87 = arith.constant 0 : index
    %c129_88 = arith.constant 129 : index
    %95 = vector.load %arg22[%c0_87, %c129_88] : memref<64x401xf32, #tpu.memory_space<vmem>>, vector<32x64xf32>
    %c5_89 = arith.constant 5 : index
    %c0_90 = arith.constant 0 : index
    %96 = vector.load %arg15[%c5_89, %c0_90] : memref<9x64xf32, #tpu.memory_space<vmem>>, vector<1x64xf32>
    %97 = vector.broadcast %96 : vector<1x64xf32> to vector<32x64xf32>
    %98 = arith.mulf %95, %97 : vector<32x64xf32>
    %c160 = arith.constant 160 : index
    %c0_91 = arith.constant 0 : index
    %99 = vector.load %arg23[%c160, %c0_91] : memref<576x256xf32, #tpu.memory_space<vmem>>, vector<32x64xf32>
    tpu.vector_store %arg23[%c160, %c0_91], %98 {strides = array<i32>} : memref<576x256xf32, #tpu.memory_space<vmem>>, vector<32x64xf32>,
    %c0_92 = arith.constant 0 : index
    %c135 = arith.constant 135 : index
    %100 = vector.load %arg22[%c0_92, %c135] : memref<64x401xf32, #tpu.memory_space<vmem>>, vector<32x64xf32>
    %c6_93 = arith.constant 6 : index
    %c0_94 = arith.constant 0 : index
    %101 = vector.load %arg15[%c6_93, %c0_94] : memref<9x64xf32, #tpu.memory_space<vmem>>, vector<1x64xf32>
    %102 = vector.broadcast %101 : vector<1x64xf32> to vector<32x64xf32>
    %103 = arith.mulf %100, %102 : vector<32x64xf32>
    %c192_95 = arith.constant 192 : index
    %c0_96 = arith.constant 0 : index
    %104 = vector.load %arg23[%c192_95, %c0_96] : memref<576x256xf32, #tpu.memory_space<vmem>>, vector<32x64xf32>
    tpu.vector_store %arg23[%c192_95, %c0_96], %103 {strides = array<i32>} : memref<576x256xf32, #tpu.memory_space<vmem>>, vector<32x64xf32>,
    %c0_97 = arith.constant 0 : index
    %c136 = arith.constant 136 : index
    %105 = vector.load %arg22[%c0_97, %c136] : memref<64x401xf32, #tpu.memory_space<vmem>>, vector<32x64xf32>
    %c7_98 = arith.constant 7 : index
    %c0_99 = arith.constant 0 : index
    %106 = vector.load %arg15[%c7_98, %c0_99] : memref<9x64xf32, #tpu.memory_space<vmem>>, vector<1x64xf32>
    %107 = vector.broadcast %106 : vector<1x64xf32> to vector<32x64xf32>
    %108 = arith.mulf %105, %107 : vector<32x64xf32>
    %c224 = arith.constant 224 : index
    %c0_100 = arith.constant 0 : index
    %109 = vector.load %arg23[%c224, %c0_100] : memref<576x256xf32, #tpu.memory_space<vmem>>, vector<32x64xf32>
    tpu.vector_store %arg23[%c224, %c0_100], %108 {strides = array<i32>} : memref<576x256xf32, #tpu.memory_space<vmem>>, vector<32x64xf32>,
    %c0_101 = arith.constant 0 : index
    %c137 = arith.constant 137 : index
    %110 = vector.load %arg22[%c0_101, %c137] : memref<64x401xf32, #tpu.memory_space<vmem>>, vector<32x64xf32>
    %c8_102 = arith.constant 8 : index
    %c0_103 = arith.constant 0 : index
    %111 = vector.load %arg15[%c8_102, %c0_103] : memref<9x64xf32, #tpu.memory_space<vmem>>, vector<1x64xf32>
    %112 = vector.broadcast %111 : vector<1x64xf32> to vector<32x64xf32>
    %113 = arith.mulf %110, %112 : vector<32x64xf32>
    %c256_104 = arith.constant 256 : index
    %c0_105 = arith.constant 0 : index
    %114 = vector.load %arg23[%c256_104, %c0_105] : memref<576x256xf32, #tpu.memory_space<vmem>>, vector<32x64xf32>
    tpu.vector_store %arg23[%c256_104, %c0_105], %113 {strides = array<i32>} : memref<576x256xf32, #tpu.memory_space<vmem>>, vector<32x64xf32>,
    %c0_106 = arith.constant 0 : index
    %c0_107 = arith.constant 0 : index
    %115 = vector.load %arg4[%c0_106, %c0_107] : memref<64x288xf32, #tpu.memory_space<vmem>>, vector<64x288xf32>
    %c0_108 = arith.constant 0 : index
    %c0_109 = arith.constant 0 : index
    %116 = vector.load %arg23[%c0_108, %c0_109] : memref<576x256xf32, #tpu.memory_space<vmem>>, vector<288x64xf32>
    %cst_110 = arith.constant dense<0.000000e+00> : vector<64x64xf32>
    %117 = tpu.matmul %115, %116, %cst_110 {dimension_numbers = #tpu.dot_dimension_numbers<[1], [0], [0], [1], [0, 0, 1, 1], [], []>} : vector<64x288xf32>, vector<288x64xf32>, vector<64x64xf32> -> vector<64x64xf32>
    %c0_111 = arith.constant 0 : index
    %c0_112 = arith.constant 0 : index
    %118 = vector.load %arg5[%c0_111, %c0_112] : memref<64x1xf32, #tpu.memory_space<vmem>>, vector<64x1xf32>
    %119 = vector.broadcast %118 : vector<64x1xf32> to vector<64x64xf32>
    %120 = arith.addf %117, %119 : vector<64x64xf32>
    %cst_113 = arith.constant 0.000000e+00 : f32
    %121 = vector.broadcast %cst_113 : f32 to vector<64x64xf32>
    %122 = arith.maximumf %120, %121 : vector<64x64xf32>
    %cst_114 = arith.constant 0.000000e+00 : f32
    %123 = vector.broadcast %cst_114 : f32 to vector<64x9xf32>
    %c0_115 = arith.constant 0 : index
    %c64_116 = arith.constant 64 : index
    %124 = vector.load %arg22[%c0_115, %c64_116] : memref<64x401xf32, #tpu.memory_space<vmem>>, vector<64x9xf32>
    tpu.vector_store %arg22[%c0_115, %c64_116], %123 {strides = array<i32>} : memref<64x401xf32, #tpu.memory_space<vmem>>, vector<64x9xf32>,
    %c0_117 = arith.constant 0 : index
    %c0_118 = arith.constant 0 : index
    %125 = vector.load %arg22[%c0_117, %c0_118] : memref<64x401xf32, #tpu.memory_space<vmem>>, vector<64x64xf32>
    tpu.vector_store %arg22[%c0_117, %c0_118], %122 {strides = array<i32>} : memref<64x401xf32, #tpu.memory_space<vmem>>, vector<64x64xf32>,
    %c0_119 = arith.constant 0 : index
    %c1_120 = arith.constant 1 : index
    %126 = vector.load %arg22[%c0_119, %c1_120] : memref<64x401xf32, #tpu.memory_space<vmem>>, vector<64x64xf32>
    %127 = arith.maximumf %122, %126 : vector<64x64xf32>
    %c0_121 = arith.constant 0 : index
    %c8_122 = arith.constant 8 : index
    %128 = vector.load %arg22[%c0_121, %c8_122] : memref<64x401xf32, #tpu.memory_space<vmem>>, vector<64x64xf32>
    %129 = arith.maximumf %127, %128 : vector<64x64xf32>
    %c0_123 = arith.constant 0 : index
    %c9 = arith.constant 9 : index
    %130 = vector.load %arg22[%c0_123, %c9] : memref<64x401xf32, #tpu.memory_space<vmem>>, vector<64x64xf32>
    %131 = arith.maximumf %129, %130 : vector<64x64xf32>
    %c0_124 = arith.constant 0 : index
    %c0_125 = arith.constant 0 : index
    %132 = vector.load %arg18[%c0_124, %c0_125] : memref<64x16xf32, #tpu.memory_space<vmem>>, vector<64x16xf32>
    %cst_126 = arith.constant dense<0.000000e+00> : vector<64x16xf32>
    %133 = tpu.matmul %131, %132, %cst_126 {dimension_numbers = #tpu.dot_dimension_numbers<[1], [0], [0], [1], [0, 0, 1, 1], [], []>} : vector<64x64xf32>, vector<64x16xf32>, vector<64x16xf32> -> vector<64x16xf32>
    %cst_127 = arith.constant 0.000000e+00 : f32
    %134 = vector.broadcast %cst_127 : f32 to vector<64x5xf32>
    %c0_128 = arith.constant 0 : index
    %c123 = arith.constant 123 : index
    %135 = vector.load %arg22[%c0_128, %c123] : memref<64x401xf32, #tpu.memory_space<vmem>>, vector<64x5xf32>
    tpu.vector_store %arg22[%c0_128, %c123], %134 {strides = array<i32>} : memref<64x401xf32, #tpu.memory_space<vmem>>, vector<64x5xf32>,
    %cst_129 = arith.constant 0.000000e+00 : f32
    %136 = vector.broadcast %cst_129 : f32 to vector<64x5xf32>
    %c0_130 = arith.constant 0 : index
    %c144_131 = arith.constant 144 : index
    %137 = vector.load %arg22[%c0_130, %c144_131] : memref<64x401xf32, #tpu.memory_space<vmem>>, vector<64x5xf32>
    tpu.vector_store %arg22[%c0_130, %c144_131], %136 {strides = array<i32>} : memref<64x401xf32, #tpu.memory_space<vmem>>, vector<64x5xf32>,
    %c0_132 = arith.constant 0 : index
    %c128_133 = arith.constant 128 : index
    %138 = vector.load %arg22[%c0_132, %c128_133] : memref<64x401xf32, #tpu.memory_space<vmem>>, vector<64x16xf32>
    tpu.vector_store %arg22[%c0_132, %c128_133], %133 {strides = array<i32>} : memref<64x401xf32, #tpu.memory_space<vmem>>, vector<64x16xf32>,
    %c0_134 = arith.constant 0 : index
    %c123_135 = arith.constant 123 : index
    %139 = vector.load %arg22[%c0_134, %c123_135] : memref<64x401xf32, #tpu.memory_space<vmem>>, vector<64x16xf32>
    %c0_136 = arith.constant 0 : index
    %c0_137 = arith.constant 0 : index
    %140 = vector.load %arg16[%c0_136, %c0_137] : memref<9x16xf32, #tpu.memory_space<vmem>>, vector<1x16xf32>
    %141 = vector.broadcast %140 : vector<1x16xf32> to vector<64x16xf32>
    %142 = arith.mulf %139, %141 : vector<64x16xf32>
    %c0_138 = arith.constant 0 : index
    %c0_139 = arith.constant 0 : index
    %143 = vector.load %arg23[%c0_138, %c0_139] : memref<576x256xf32, #tpu.memory_space<vmem>>, vector<64x16xf32>
    tpu.vector_store %arg23[%c0_138, %c0_139], %142 {strides = array<i32>} : memref<576x256xf32, #tpu.memory_space<vmem>>, vector<64x16xf32>,
    %c0_140 = arith.constant 0 : index
    %c124 = arith.constant 124 : index
    %144 = vector.load %arg22[%c0_140, %c124] : memref<64x401xf32, #tpu.memory_space<vmem>>, vector<64x16xf32>
    %c1_141 = arith.constant 1 : index
    %c0_142 = arith.constant 0 : index
    %145 = vector.load %arg16[%c1_141, %c0_142] : memref<9x16xf32, #tpu.memory_space<vmem>>, vector<1x16xf32>
    %146 = vector.broadcast %145 : vector<1x16xf32> to vector<64x16xf32>
    %147 = arith.mulf %144, %146 : vector<64x16xf32>
    %c64_143 = arith.constant 64 : index
    %c0_144 = arith.constant 0 : index
    %148 = vector.load %arg23[%c64_143, %c0_144] : memref<576x256xf32, #tpu.memory_space<vmem>>, vector<64x16xf32>
    tpu.vector_store %arg23[%c64_143, %c0_144], %147 {strides = array<i32>} : memref<576x256xf32, #tpu.memory_space<vmem>>, vector<64x16xf32>,
    %c0_145 = arith.constant 0 : index
    %c125 = arith.constant 125 : index
    %149 = vector.load %arg22[%c0_145, %c125] : memref<64x401xf32, #tpu.memory_space<vmem>>, vector<64x16xf32>
    %c2_146 = arith.constant 2 : index
    %c0_147 = arith.constant 0 : index
    %150 = vector.load %arg16[%c2_146, %c0_147] : memref<9x16xf32, #tpu.memory_space<vmem>>, vector<1x16xf32>
    %151 = vector.broadcast %150 : vector<1x16xf32> to vector<64x16xf32>
    %152 = arith.mulf %149, %151 : vector<64x16xf32>
    %c128_148 = arith.constant 128 : index
    %c0_149 = arith.constant 0 : index
    %153 = vector.load %arg23[%c128_148, %c0_149] : memref<576x256xf32, #tpu.memory_space<vmem>>, vector<64x16xf32>
    tpu.vector_store %arg23[%c128_148, %c0_149], %152 {strides = array<i32>} : memref<576x256xf32, #tpu.memory_space<vmem>>, vector<64x16xf32>,
    %c0_150 = arith.constant 0 : index
    %c127_151 = arith.constant 127 : index
    %154 = vector.load %arg22[%c0_150, %c127_151] : memref<64x401xf32, #tpu.memory_space<vmem>>, vector<64x16xf32>
    %c3_152 = arith.constant 3 : index
    %c0_153 = arith.constant 0 : index
    %155 = vector.load %arg16[%c3_152, %c0_153] : memref<9x16xf32, #tpu.memory_space<vmem>>, vector<1x16xf32>
    %156 = vector.broadcast %155 : vector<1x16xf32> to vector<64x16xf32>
    %157 = arith.mulf %154, %156 : vector<64x16xf32>
    %c192_154 = arith.constant 192 : index
    %c0_155 = arith.constant 0 : index
    %158 = vector.load %arg23[%c192_154, %c0_155] : memref<576x256xf32, #tpu.memory_space<vmem>>, vector<64x16xf32>
    tpu.vector_store %arg23[%c192_154, %c0_155], %157 {strides = array<i32>} : memref<576x256xf32, #tpu.memory_space<vmem>>, vector<64x16xf32>,
    %c0_156 = arith.constant 0 : index
    %c128_157 = arith.constant 128 : index
    %159 = vector.load %arg22[%c0_156, %c128_157] : memref<64x401xf32, #tpu.memory_space<vmem>>, vector<64x16xf32>
    %c256_158 = arith.constant 256 : index
    %c0_159 = arith.constant 0 : index
    %160 = vector.load %arg23[%c256_158, %c0_159] : memref<576x256xf32, #tpu.memory_space<vmem>>, vector<64x16xf32>
    tpu.vector_store %arg23[%c256_158, %c0_159], %159 {strides = array<i32>} : memref<576x256xf32, #tpu.memory_space<vmem>>, vector<64x16xf32>,
    %c0_160 = arith.constant 0 : index
    %c129_161 = arith.constant 129 : index
    %161 = vector.load %arg22[%c0_160, %c129_161] : memref<64x401xf32, #tpu.memory_space<vmem>>, vector<64x16xf32>
    %c5_162 = arith.constant 5 : index
    %c0_163 = arith.constant 0 : index
    %162 = vector.load %arg16[%c5_162, %c0_163] : memref<9x16xf32, #tpu.memory_space<vmem>>, vector<1x16xf32>
    %163 = vector.broadcast %162 : vector<1x16xf32> to vector<64x16xf32>
    %164 = arith.mulf %161, %163 : vector<64x16xf32>
    %c320 = arith.constant 320 : index
    %c0_164 = arith.constant 0 : index
    %165 = vector.load %arg23[%c320, %c0_164] : memref<576x256xf32, #tpu.memory_space<vmem>>, vector<64x16xf32>
    tpu.vector_store %arg23[%c320, %c0_164], %164 {strides = array<i32>} : memref<576x256xf32, #tpu.memory_space<vmem>>, vector<64x16xf32>,
    %c0_165 = arith.constant 0 : index
    %c131 = arith.constant 131 : index
    %166 = vector.load %arg22[%c0_165, %c131] : memref<64x401xf32, #tpu.memory_space<vmem>>, vector<64x16xf32>
    %c6_166 = arith.constant 6 : index
    %c0_167 = arith.constant 0 : index
    %167 = vector.load %arg16[%c6_166, %c0_167] : memref<9x16xf32, #tpu.memory_space<vmem>>, vector<1x16xf32>
    %168 = vector.broadcast %167 : vector<1x16xf32> to vector<64x16xf32>
    %169 = arith.mulf %166, %168 : vector<64x16xf32>
    %c384_168 = arith.constant 384 : index
    %c0_169 = arith.constant 0 : index
    %170 = vector.load %arg23[%c384_168, %c0_169] : memref<576x256xf32, #tpu.memory_space<vmem>>, vector<64x16xf32>
    tpu.vector_store %arg23[%c384_168, %c0_169], %169 {strides = array<i32>} : memref<576x256xf32, #tpu.memory_space<vmem>>, vector<64x16xf32>,
    %c0_170 = arith.constant 0 : index
    %c132 = arith.constant 132 : index
    %171 = vector.load %arg22[%c0_170, %c132] : memref<64x401xf32, #tpu.memory_space<vmem>>, vector<64x16xf32>
    %c7_171 = arith.constant 7 : index
    %c0_172 = arith.constant 0 : index
    %172 = vector.load %arg16[%c7_171, %c0_172] : memref<9x16xf32, #tpu.memory_space<vmem>>, vector<1x16xf32>
    %173 = vector.broadcast %172 : vector<1x16xf32> to vector<64x16xf32>
    %174 = arith.mulf %171, %173 : vector<64x16xf32>
    %c448 = arith.constant 448 : index
    %c0_173 = arith.constant 0 : index
    %175 = vector.load %arg23[%c448, %c0_173] : memref<576x256xf32, #tpu.memory_space<vmem>>, vector<64x16xf32>
    tpu.vector_store %arg23[%c448, %c0_173], %174 {strides = array<i32>} : memref<576x256xf32, #tpu.memory_space<vmem>>, vector<64x16xf32>,
    %c0_174 = arith.constant 0 : index
    %c133 = arith.constant 133 : index
    %176 = vector.load %arg22[%c0_174, %c133] : memref<64x401xf32, #tpu.memory_space<vmem>>, vector<64x16xf32>
    %c8_175 = arith.constant 8 : index
    %c0_176 = arith.constant 0 : index
    %177 = vector.load %arg16[%c8_175, %c0_176] : memref<9x16xf32, #tpu.memory_space<vmem>>, vector<1x16xf32>
    %178 = vector.broadcast %177 : vector<1x16xf32> to vector<64x16xf32>
    %179 = arith.mulf %176, %178 : vector<64x16xf32>
    %c512 = arith.constant 512 : index
    %c0_177 = arith.constant 0 : index
    %180 = vector.load %arg23[%c512, %c0_177] : memref<576x256xf32, #tpu.memory_space<vmem>>, vector<64x16xf32>
    tpu.vector_store %arg23[%c512, %c0_177], %179 {strides = array<i32>} : memref<576x256xf32, #tpu.memory_space<vmem>>, vector<64x16xf32>,
    %c0_178 = arith.constant 0 : index
    %c0_179 = arith.constant 0 : index
    %181 = vector.load %arg6[%c0_178, %c0_179] : memref<64x576xf32, #tpu.memory_space<vmem>>, vector<64x576xf32>
    %c0_180 = arith.constant 0 : index
    %c0_181 = arith.constant 0 : index
    %182 = vector.load %arg23[%c0_180, %c0_181] : memref<576x256xf32, #tpu.memory_space<vmem>>, vector<576x16xf32>
    %cst_182 = arith.constant dense<0.000000e+00> : vector<64x16xf32>
    %183 = tpu.matmul %181, %182, %cst_182 {dimension_numbers = #tpu.dot_dimension_numbers<[1], [0], [0], [1], [0, 0, 1, 1], [], []>} : vector<64x576xf32>, vector<576x16xf32>, vector<64x16xf32> -> vector<64x16xf32>
    %c0_183 = arith.constant 0 : index
    %c0_184 = arith.constant 0 : index
    %184 = vector.load %arg7[%c0_183, %c0_184] : memref<64x1xf32, #tpu.memory_space<vmem>>, vector<64x1xf32>
    %185 = vector.broadcast %184 : vector<64x1xf32> to vector<64x16xf32>
    %186 = arith.addf %183, %185 : vector<64x16xf32>
    %cst_185 = arith.constant 0.000000e+00 : f32
    %187 = vector.broadcast %cst_185 : f32 to vector<64x16xf32>
    %188 = arith.maximumf %186, %187 : vector<64x16xf32>
    %c0_186 = arith.constant 0 : index
    %c0_187 = arith.constant 0 : index
    %189 = vector.load %arg8[%c0_186, %c0_187] : memref<8x64xf32, #tpu.memory_space<vmem>>, vector<8x64xf32>
    %cst_188 = arith.constant dense<0.000000e+00> : vector<8x16xf32>
    %190 = tpu.matmul %189, %188, %cst_188 {dimension_numbers = #tpu.dot_dimension_numbers<[1], [0], [0], [1], [0, 0, 1, 1], [], []>} : vector<8x64xf32>, vector<64x16xf32>, vector<8x16xf32> -> vector<8x16xf32>
    %c0_189 = arith.constant 0 : index
    %c0_190 = arith.constant 0 : index
    %191 = vector.load %arg9[%c0_189, %c0_190] : memref<8x1xf32, #tpu.memory_space<vmem>>, vector<8x1xf32>
    %192 = vector.broadcast %191 : vector<8x1xf32> to vector<8x16xf32>
    %193 = arith.addf %190, %192 : vector<8x16xf32>
    %cst_191 = arith.constant 0.000000e+00 : f32
    %194 = vector.broadcast %cst_191 : f32 to vector<8x16xf32>
    %195 = arith.maximumf %193, %194 : vector<8x16xf32>
    %cst_192 = arith.constant 0.000000e+00 : f32
    %196 = vector.broadcast %cst_192 : f32 to vector<8x64xf32>
    %c0_193 = arith.constant 0 : index
    %c0_194 = arith.constant 0 : index
    %197 = vector.load %arg10[%c0_193, %c0_194] : memref<8x32xf32, #tpu.memory_space<vmem>>, vector<8x8xf32>
    %cst_195 = arith.constant dense<0.000000e+00> : vector<8x16xf32>
    %198 = tpu.matmul %197, %195, %cst_195 {dimension_numbers = #tpu.dot_dimension_numbers<[1], [0], [0], [1], [0, 0, 1, 1], [], []>} : vector<8x8xf32>, vector<8x16xf32>, vector<8x16xf32> -> vector<8x16xf32>
    %c0_196 = arith.constant 0 : index
    %c0_197 = arith.constant 0 : index
    %199 = vector.load %arg19[%c0_196, %c0_197] : memref<64x64xf32, #tpu.memory_space<vmem>>, vector<16x64xf32>
    %cst_198 = arith.constant dense<0.000000e+00> : vector<8x64xf32>
    %200 = tpu.matmul %198, %199, %cst_198 {dimension_numbers = #tpu.dot_dimension_numbers<[1], [0], [0], [1], [0, 0, 1, 1], [], []>} : vector<8x16xf32>, vector<16x64xf32>, vector<8x64xf32> -> vector<8x64xf32>
    %201 = arith.addf %196, %200 : vector<8x64xf32>
    %c0_199 = arith.constant 0 : index
    %c8_200 = arith.constant 8 : index
    %202 = vector.load %arg10[%c0_199, %c8_200] : memref<8x32xf32, #tpu.memory_space<vmem>>, vector<8x8xf32>
    %cst_201 = arith.constant dense<0.000000e+00> : vector<8x16xf32>
    %203 = tpu.matmul %202, %195, %cst_201 {dimension_numbers = #tpu.dot_dimension_numbers<[1], [0], [0], [1], [0, 0, 1, 1], [], []>} : vector<8x8xf32>, vector<8x16xf32>, vector<8x16xf32> -> vector<8x16xf32>
    %c16_202 = arith.constant 16 : index
    %c0_203 = arith.constant 0 : index
    %204 = vector.load %arg19[%c16_202, %c0_203] : memref<64x64xf32, #tpu.memory_space<vmem>>, vector<16x64xf32>
    %cst_204 = arith.constant dense<0.000000e+00> : vector<8x64xf32>
    %205 = tpu.matmul %203, %204, %cst_204 {dimension_numbers = #tpu.dot_dimension_numbers<[1], [0], [0], [1], [0, 0, 1, 1], [], []>} : vector<8x16xf32>, vector<16x64xf32>, vector<8x64xf32> -> vector<8x64xf32>
    %206 = arith.addf %201, %205 : vector<8x64xf32>
    %c0_205 = arith.constant 0 : index
    %c16_206 = arith.constant 16 : index
    %207 = vector.load %arg10[%c0_205, %c16_206] : memref<8x32xf32, #tpu.memory_space<vmem>>, vector<8x8xf32>
    %cst_207 = arith.constant dense<0.000000e+00> : vector<8x16xf32>
    %208 = tpu.matmul %207, %195, %cst_207 {dimension_numbers = #tpu.dot_dimension_numbers<[1], [0], [0], [1], [0, 0, 1, 1], [], []>} : vector<8x8xf32>, vector<8x16xf32>, vector<8x16xf32> -> vector<8x16xf32>
    %c32_208 = arith.constant 32 : index
    %c0_209 = arith.constant 0 : index
    %209 = vector.load %arg19[%c32_208, %c0_209] : memref<64x64xf32, #tpu.memory_space<vmem>>, vector<16x64xf32>
    %cst_210 = arith.constant dense<0.000000e+00> : vector<8x64xf32>
    %210 = tpu.matmul %208, %209, %cst_210 {dimension_numbers = #tpu.dot_dimension_numbers<[1], [0], [0], [1], [0, 0, 1, 1], [], []>} : vector<8x16xf32>, vector<16x64xf32>, vector<8x64xf32> -> vector<8x64xf32>
    %211 = arith.addf %206, %210 : vector<8x64xf32>
    %c0_211 = arith.constant 0 : index
    %c24_212 = arith.constant 24 : index
    %212 = vector.load %arg10[%c0_211, %c24_212] : memref<8x32xf32, #tpu.memory_space<vmem>>, vector<8x8xf32>
    %cst_213 = arith.constant dense<0.000000e+00> : vector<8x16xf32>
    %213 = tpu.matmul %212, %195, %cst_213 {dimension_numbers = #tpu.dot_dimension_numbers<[1], [0], [0], [1], [0, 0, 1, 1], [], []>} : vector<8x8xf32>, vector<8x16xf32>, vector<8x16xf32> -> vector<8x16xf32>
    %c48 = arith.constant 48 : index
    %c0_214 = arith.constant 0 : index
    %214 = vector.load %arg19[%c48, %c0_214] : memref<64x64xf32, #tpu.memory_space<vmem>>, vector<16x64xf32>
    %cst_215 = arith.constant dense<0.000000e+00> : vector<8x64xf32>
    %215 = tpu.matmul %213, %214, %cst_215 {dimension_numbers = #tpu.dot_dimension_numbers<[1], [0], [0], [1], [0, 0, 1, 1], [], []>} : vector<8x16xf32>, vector<16x64xf32>, vector<8x64xf32> -> vector<8x64xf32>
    %216 = arith.addf %211, %215 : vector<8x64xf32>
    %c0_216 = arith.constant 0 : index
    %c0_217 = arith.constant 0 : index
    %217 = vector.load %arg11[%c0_216, %c0_217] : memref<8x1xf32, #tpu.memory_space<vmem>>, vector<8x1xf32>
    %218 = vector.broadcast %217 : vector<8x1xf32> to vector<8x64xf32>
    %219 = arith.addf %216, %218 : vector<8x64xf32>
    %cst_218 = arith.constant 0.000000e+00 : f32
    %220 = vector.broadcast %cst_218 : f32 to vector<8x256xf32>
    %c0_219 = arith.constant 0 : index
    %c0_220 = arith.constant 0 : index
    %221 = vector.load %arg12[%c0_219, %c0_220] : memref<8x32xf32, #tpu.memory_space<vmem>>, vector<8x8xf32>
    %cst_221 = arith.constant dense<0.000000e+00> : vector<8x64xf32>
    %222 = tpu.matmul %221, %219, %cst_221 {dimension_numbers = #tpu.dot_dimension_numbers<[1], [0], [0], [1], [0, 0, 1, 1], [], []>} : vector<8x8xf32>, vector<8x64xf32>, vector<8x64xf32> -> vector<8x64xf32>
    %c0_222 = arith.constant 0 : index
    %c0_223 = arith.constant 0 : index
    %223 = vector.load %arg20[%c0_222, %c0_223] : memref<256x256xf32, #tpu.memory_space<vmem>>, vector<64x256xf32>
    %cst_224 = arith.constant dense<0.000000e+00> : vector<8x256xf32>
    %224 = tpu.matmul %222, %223, %cst_224 {dimension_numbers = #tpu.dot_dimension_numbers<[1], [0], [0], [1], [0, 0, 1, 1], [], []>} : vector<8x64xf32>, vector<64x256xf32>, vector<8x256xf32> -> vector<8x256xf32>
    %225 = arith.addf %220, %224 : vector<8x256xf32>
    %c0_225 = arith.constant 0 : index
    %c8_226 = arith.constant 8 : index
    %226 = vector.load %arg12[%c0_225, %c8_226] : memref<8x32xf32, #tpu.memory_space<vmem>>, vector<8x8xf32>
    %cst_227 = arith.constant dense<0.000000e+00> : vector<8x64xf32>
    %227 = tpu.matmul %226, %219, %cst_227 {dimension_numbers = #tpu.dot_dimension_numbers<[1], [0], [0], [1], [0, 0, 1, 1], [], []>} : vector<8x8xf32>, vector<8x64xf32>, vector<8x64xf32> -> vector<8x64xf32>
    %c64_228 = arith.constant 64 : index
    %c0_229 = arith.constant 0 : index
    %228 = vector.load %arg20[%c64_228, %c0_229] : memref<256x256xf32, #tpu.memory_space<vmem>>, vector<64x256xf32>
    %cst_230 = arith.constant dense<0.000000e+00> : vector<8x256xf32>
    %229 = tpu.matmul %227, %228, %cst_230 {dimension_numbers = #tpu.dot_dimension_numbers<[1], [0], [0], [1], [0, 0, 1, 1], [], []>} : vector<8x64xf32>, vector<64x256xf32>, vector<8x256xf32> -> vector<8x256xf32>
    %230 = arith.addf %225, %229 : vector<8x256xf32>
    %c0_231 = arith.constant 0 : index
    %c16_232 = arith.constant 16 : index
    %231 = vector.load %arg12[%c0_231, %c16_232] : memref<8x32xf32, #tpu.memory_space<vmem>>, vector<8x8xf32>
    %cst_233 = arith.constant dense<0.000000e+00> : vector<8x64xf32>
    %232 = tpu.matmul %231, %219, %cst_233 {dimension_numbers = #tpu.dot_dimension_numbers<[1], [0], [0], [1], [0, 0, 1, 1], [], []>} : vector<8x8xf32>, vector<8x64xf32>, vector<8x64xf32> -> vector<8x64xf32>
    %c128_234 = arith.constant 128 : index
    %c0_235 = arith.constant 0 : index
    %233 = vector.load %arg20[%c128_234, %c0_235] : memref<256x256xf32, #tpu.memory_space<vmem>>, vector<64x256xf32>
    %cst_236 = arith.constant dense<0.000000e+00> : vector<8x256xf32>
    %234 = tpu.matmul %232, %233, %cst_236 {dimension_numbers = #tpu.dot_dimension_numbers<[1], [0], [0], [1], [0, 0, 1, 1], [], []>} : vector<8x64xf32>, vector<64x256xf32>, vector<8x256xf32> -> vector<8x256xf32>
    %235 = arith.addf %230, %234 : vector<8x256xf32>
    %c0_237 = arith.constant 0 : index
    %c24_238 = arith.constant 24 : index
    %236 = vector.load %arg12[%c0_237, %c24_238] : memref<8x32xf32, #tpu.memory_space<vmem>>, vector<8x8xf32>
    %cst_239 = arith.constant dense<0.000000e+00> : vector<8x64xf32>
    %237 = tpu.matmul %236, %219, %cst_239 {dimension_numbers = #tpu.dot_dimension_numbers<[1], [0], [0], [1], [0, 0, 1, 1], [], []>} : vector<8x8xf32>, vector<8x64xf32>, vector<8x64xf32> -> vector<8x64xf32>
    %c192_240 = arith.constant 192 : index
    %c0_241 = arith.constant 0 : index
    %238 = vector.load %arg20[%c192_240, %c0_241] : memref<256x256xf32, #tpu.memory_space<vmem>>, vector<64x256xf32>
    %cst_242 = arith.constant dense<0.000000e+00> : vector<8x256xf32>
    %239 = tpu.matmul %237, %238, %cst_242 {dimension_numbers = #tpu.dot_dimension_numbers<[1], [0], [0], [1], [0, 0, 1, 1], [], []>} : vector<8x64xf32>, vector<64x256xf32>, vector<8x256xf32> -> vector<8x256xf32>
    %240 = arith.addf %235, %239 : vector<8x256xf32>
    %c0_243 = arith.constant 0 : index
    %c0_244 = arith.constant 0 : index
    %241 = vector.load %arg13[%c0_243, %c0_244] : memref<8x1xf32, #tpu.memory_space<vmem>>, vector<8x1xf32>
    %242 = vector.broadcast %241 : vector<8x1xf32> to vector<8x256xf32>
    %243 = arith.addf %240, %242 : vector<8x256xf32>
    %244 = vector.extract_strided_slice %243 {offsets = [0, 0], sizes = [4, 256], strides = [1, 1]} : vector<8x256xf32> to vector<4x256xf32>
    %245 = vector.extract_strided_slice %243 {offsets = [4, 0], sizes = [4, 256], strides = [1, 1]} : vector<8x256xf32> to vector<4x256xf32>
    %246 = arith.maximumf %244, %245 : vector<4x256xf32>
    %247 = arith.subf %244, %246 : vector<4x256xf32>
    %248 = math.exp %247 : vector<4x256xf32>
    %249 = arith.subf %245, %246 : vector<4x256xf32>
    %250 = math.exp %249 : vector<4x256xf32>
    %251 = arith.addf %248, %250 : vector<4x256xf32>
    %252 = tpu.reciprocal %251 : vector<4x256xf32> -> vector<4x256xf32>
    %253 = arith.mulf %248, %252 : vector<4x256xf32>
    %254 = arith.mulf %250, %252 : vector<4x256xf32>
    %255 = tpu.concatenate %253, %254 in 0 : vector<4x256xf32>, vector<4x256xf32> -> vector<8x256xf32>
    %c0_245 = arith.constant 0 : index
    %c0_246 = arith.constant 0 : index
    %c0_247 = arith.constant 0 : index
    %256 = vector.load %arg21[%c0_245, %c0_246, %c0_247] : memref<1x8x256xf32, #tpu.memory_space<vmem>>, vector<1x8x256xf32>
    %257 = vector.shape_cast %256 : vector<1x8x256xf32> to vector<8x256xf32>
    %258 = vector.shape_cast %255 : vector<8x256xf32> to vector<1x8x256xf32>
    tpu.vector_store %arg21[%c0_245, %c0_246, %c0_247], %258 {strides = array<i32>} : memref<1x8x256xf32, #tpu.memory_space<vmem>>, vector<1x8x256xf32>,
    return
  }
  func.func @transform_0(%arg0: i32) -> (i32, i32, i32) {
    %c0_i32 = arith.constant 0 : i32
    %c0_i32_0 = arith.constant 0 : i32
    %c0_i32_1 = arith.constant 0 : i32
    return %arg0, %c0_i32, %c0_i32_0 : i32, i32, i32
  }
  func.func @transform_1(%arg0: i32) -> (i32, i32) {
    %c0_i32 = arith.constant 0 : i32
    %c0_i32_0 = arith.constant 0 : i32
    %c0_i32_1 = arith.constant 0 : i32
    return %c0_i32, %c0_i32_0 : i32, i32
  }
  func.func @transform_2(%arg0: i32) -> (i32, i32) {
    %c0_i32 = arith.constant 0 : i32
    %c0_i32_0 = arith.constant 0 : i32
    %c0_i32_1 = arith.constant 0 : i32
    return %c0_i32, %c0_i32_0 : i32, i32
  }
  func.func @transform_3(%arg0: i32) -> (i32, i32) {
    %c0_i32 = arith.constant 0 : i32
    %c0_i32_0 = arith.constant 0 : i32
    %c0_i32_1 = arith.constant 0 : i32
    return %c0_i32, %c0_i32_0 : i32, i32
  }
  func.func @transform_4(%arg0: i32) -> (i32, i32) {
    %c0_i32 = arith.constant 0 : i32
    %c0_i32_0 = arith.constant 0 : i32
    %c0_i32_1 = arith.constant 0 : i32
    return %c0_i32, %c0_i32_0 : i32, i32
  }
  func.func @transform_5(%arg0: i32) -> (i32, i32) {
    %c0_i32 = arith.constant 0 : i32
    %c0_i32_0 = arith.constant 0 : i32
    %c0_i32_1 = arith.constant 0 : i32
    return %c0_i32, %c0_i32_0 : i32, i32
  }
  func.func @transform_6(%arg0: i32) -> (i32, i32) {
    %c0_i32 = arith.constant 0 : i32
    %c0_i32_0 = arith.constant 0 : i32
    %c0_i32_1 = arith.constant 0 : i32
    return %c0_i32, %c0_i32_0 : i32, i32
  }
  func.func @transform_7(%arg0: i32) -> (i32, i32) {
    %c0_i32 = arith.constant 0 : i32
    %c0_i32_0 = arith.constant 0 : i32
    %c0_i32_1 = arith.constant 0 : i32
    return %c0_i32, %c0_i32_0 : i32, i32
  }
  func.func @transform_8(%arg0: i32) -> (i32, i32) {
    %c0_i32 = arith.constant 0 : i32
    %c0_i32_0 = arith.constant 0 : i32
    %c0_i32_1 = arith.constant 0 : i32
    return %c0_i32, %c0_i32_0 : i32, i32
  }
  func.func @transform_9(%arg0: i32) -> (i32, i32) {
    %c0_i32 = arith.constant 0 : i32
    %c0_i32_0 = arith.constant 0 : i32
    %c0_i32_1 = arith.constant 0 : i32
    return %c0_i32, %c0_i32_0 : i32, i32
  }
  func.func @transform_10(%arg0: i32) -> (i32, i32) {
    %c0_i32 = arith.constant 0 : i32
    %c0_i32_0 = arith.constant 0 : i32
    %c0_i32_1 = arith.constant 0 : i32
    return %c0_i32, %c0_i32_0 : i32, i32
  }
  func.func @transform_11(%arg0: i32) -> (i32, i32) {
    %c0_i32 = arith.constant 0 : i32
    %c0_i32_0 = arith.constant 0 : i32
    %c0_i32_1 = arith.constant 0 : i32
    return %c0_i32, %c0_i32_0 : i32, i32
  }
  func.func @transform_12(%arg0: i32) -> (i32, i32) {
    %c0_i32 = arith.constant 0 : i32
    %c0_i32_0 = arith.constant 0 : i32
    %c0_i32_1 = arith.constant 0 : i32
    return %c0_i32, %c0_i32_0 : i32, i32
  }
  func.func @transform_13(%arg0: i32) -> (i32, i32) {
    %c0_i32 = arith.constant 0 : i32
    %c0_i32_0 = arith.constant 0 : i32
    %c0_i32_1 = arith.constant 0 : i32
    return %c0_i32, %c0_i32_0 : i32, i32
  }
  func.func @transform_14(%arg0: i32) -> (i32, i32) {
    %c0_i32 = arith.constant 0 : i32
    %c0_i32_0 = arith.constant 0 : i32
    %c0_i32_1 = arith.constant 0 : i32
    return %c0_i32, %c0_i32_0 : i32, i32
  }
  func.func @transform_15(%arg0: i32) -> (i32, i32) {
    %c0_i32 = arith.constant 0 : i32
    %c0_i32_0 = arith.constant 0 : i32
    %c0_i32_1 = arith.constant 0 : i32
    return %c0_i32, %c0_i32_0 : i32, i32
  }
  func.func @transform_16(%arg0: i32) -> (i32, i32) {
    %c0_i32 = arith.constant 0 : i32
    %c0_i32_0 = arith.constant 0 : i32
    %c0_i32_1 = arith.constant 0 : i32
    return %c0_i32, %c0_i32_0 : i32, i32
  }
  func.func @transform_17(%arg0: i32) -> (i32, i32) {
    %c0_i32 = arith.constant 0 : i32
    %c0_i32_0 = arith.constant 0 : i32
    %c0_i32_1 = arith.constant 0 : i32
    return %c0_i32, %c0_i32_0 : i32, i32
  }
  func.func @transform_18(%arg0: i32) -> (i32, i32) {
    %c0_i32 = arith.constant 0 : i32
    %c0_i32_0 = arith.constant 0 : i32
    %c0_i32_1 = arith.constant 0 : i32
    return %c0_i32, %c0_i32_0 : i32, i32
  }
  func.func @transform_19(%arg0: i32) -> (i32, i32) {
    %c0_i32 = arith.constant 0 : i32
    %c0_i32_0 = arith.constant 0 : i32
    %c0_i32_1 = arith.constant 0 : i32
    return %c0_i32, %c0_i32_0 : i32, i32
  }
  func.func @transform_20(%arg0: i32) -> (i32, i32, i32) {
    %c0_i32 = arith.constant 0 : i32
    %c0_i32_0 = arith.constant 0 : i32
    %c0_i32_1 = arith.constant 0 : i32
    return %arg0, %c0_i32, %c0_i32_0 : i32, i32, i32
  }
}

</mosaic_0001>

<bundles_post_ra>
// kernel: small_model_forward.1
= control target key start
LH: loop header
LB: loop body
LE: loop exit
PB: predicated region body
PF: predicated region fallthrough
CT: control target
= control target key end

     0   :  { %s8765_s0 = inlined_call_operand.vmem [shape: f32[2,4,256], index: 0, kind: input, shape index: {}]   ;;  %s8766_s1 = inlined_call_operand.hbm [shape: f32[32,36], index: 1, kind: input, shape index: {}]   ;;  %s8767_s2 = inlined_call_operand.vmem [shape: f32[32,1], index: 2, kind: input, shape index: {}]   ;;  %s8768_s3 = inlined_call_operand.hbm [shape: f32[64,288], index: 3, kind: input, shape index: {}]   ;;  %s8769_s4 = inlined_call_operand.vmem [shape: f32[64,1], index: 4, kind: input, shape index: {}]   ;;  %s8770_s5 = inlined_call_operand.vmem [shape: f32[64,576], index: 5, kind: input, shape index: {}]   ;;  %s8771_s6 = inlined_call_operand.vmem [shape: f32[64,1], index: 6, kind: input, shape index: {}]   ;;  %s8772_s7 = inlined_call_operand.hbm [shape: f32[8,64], index: 7, kind: input, shape index: {}]   ;;  %s8773_s8 = inlined_call_operand.vmem [shape: f32[8,1], index: 8, kind: input, shape index: {}]   ;;  %s8774_s9 = inlined_call_operand.hbm [shape: f32[8,32], index: 9, kind: input, shape index: {}]   ;;  %s8775_s10 = inlined_call_operand.vmem [shape: f32[8,1], index: 10, kind: input, shape index: {}]   ;;  %s8776_s11 = inlined_call_operand.hbm [shape: f32[8,32], index: 11, kind: input, shape index: {}]   ;;  %s8777_s12 = inlined_call_operand.vmem [shape: f32[8,1], index: 12, kind: input, shape index: {}]   ;;  %s8778_s13 = inlined_call_operand.hbm [shape: f32[9,256], index: 13, kind: input, shape index: {}]   ;;  %s8779_s14 = inlined_call_operand.hbm [shape: f32[9,64], index: 14, kind: input, shape index: {}]   ;;  %s8780_s15 = inlined_call_operand.hbm [shape: f32[9,16], index: 15, kind: input, shape index: {}]   ;;  %s8781_s16 = inlined_call_operand.hbm [shape: f32[256,64], index: 16, kind: input, shape index: {}]   ;;  %s8782_s17 = inlined_call_operand.hbm [shape: f32[64,16], index: 17, kind: input, shape index: {}]   ;;  %s8783_s18 = inlined_call_operand.vmem [shape: f32[64,64], index: 18, kind: input, shape index: {}]   ;;  %s8784_s19 = inlined_call_operand.hbm [shape: f32[256,256], index: 19, kind: input, shape index: {}]   ;;  %s8785_s20 = inlined_call_operand.vmem [shape: f32[2,8,256], index: 20, kind: output, shape index: {}]  }
   0x1   :  { %8796 = sst [smem:[#allocation28_spill]] %s8765_s0 }
   0x2   :  { %8797 = sst [smem:[#allocation29_spill]] %s8766_s1 }
   0x3   :  { %8798 = sst [smem:[#allocation30_spill]] %s8767_s2 }
   0x4   :  { %8799 = sst [smem:[#allocation31_spill]] %s8768_s3 }
   0x5   :  { %8800 = sst [smem:[#allocation32_spill]] %s8769_s4 }
   0x6   :  { %8801 = sst [smem:[#allocation33_spill]] %s8774_s9 }
   0x7   :  { %8802 = sst [smem:[#allocation34_spill]] %s8775_s10 }
   0x8   :  { %8803 = sst [smem:[#allocation35_spill]] %s8777_s12 }
   0x9   :  { %8804 = sst [smem:[#allocation36_spill]] %s8783_s18 }
   0xa   :  { %8805 = sst [smem:[#allocation37_spill]] %s8785_s20 }
   0xb   :  { %25 = vsyncpa [#allocation5], 0 }
   0xc   :  { %26 = vsyncpa [#allocation7], 0 }
   0xd   :  { %27 = vsyncpa [#allocation10], 0 }
   0xe   :  { %28 = vsyncpa [#allocation13], 0 }
   0xf   :  { %29 = vsyncpa [#allocation16], 0 }
  0x10   :  { %30 = vsyncpa [#allocation19], 0  ;;  %s7020_s1 = smov 0  }
  0x11 LB: > { %8806 = sst [smem:[#allocation27_spill]] %s6871_s1  ;;  %s6873_s22 = smov [#allocation6]   ;;  %s6871_s1 = sphi %s7020_s1, %s36_s1  }
  0x12   : > { %s520_s23 = sshll.u32 %s6873_s22, 4  ;;  %s7026_s24 = sadd.s32 4294967295, %s6871_s1   ;;  %s7031_s23 = int_to_ptr.vmem [resolvable:$true] %s520_s23 }
  0x13   : > { %p5455_p0 = scmp.ge.s32.totalorder %s6871_s1, 1  ;;  %p492_p1 = scmp.lt.s32.totalorder %s6871_s1, 3 }
  0x14   : > { %p8792_p2 = scmp.eq.s32.totalorder %s7026_s24, 0  ;;  %s6874_s25 = smov [#allocation9]  }
  0x15   : > { %p7033_p3 = pnand %p5455_p0, %p492_p1  ;;  %s557_s3 = sshll.u32 %s6874_s25, 4  ;;  %s7039_s3 = int_to_ptr.vmem [resolvable:$true] %s557_s3 }
  0x16   : > { %s6875_s27 = smov [#allocation12]   ;;  %s8809_s30 = sld [smem:[#allocation31_spill]] }
  0x17   : > { %s8807_s2 = scalar_select %p7033_p3, 1, 0 }
  0x18   : > { %p6321_p4 = pneg %p7033_p3  ;;  %s584_s28 = sshll.u32 %s6875_s27, 4  ;;  %s7047_s28 = int_to_ptr.vmem [resolvable:$true] %s584_s28 }
  0x1a   : > { %p7043_p5 = pnand %p8792_p2, %p6321_p4 }
  0x1c   : > { %s6533_s0 = scalar_lea.hbm %s8809_s30, 3072  ;;  %p7057_p7 = pneg %p7043_p5 }
  0x1d   : > { %p6534_p6 = scmp.ne.s32.totalorder %s8809_s30, %s6533_s0  ;;  %p6540_p10 = scmp.lt.u32.totalorder %s6533_s0, %s8809_s30 }
  0x1f   : > { %p6536_p8 = pnand %p7057_p7, %p6534_p6 }
  0x21   : > { %p6537_p9 = pneg %p6536_p8 }
  0x23   : > { %p6542_p11 = pnand %p6540_p10, %p6537_p9 }
  0x25   : > { %6545 = shalt.err (!%p6542_p11)
}
  0x26   : > { %s6546_s4 = scalar_lea.vmem %s7031_s23, 3072  ;;  %p6554_p1 = scmp.lt.s32.totalorder %s7031_s23, %s7031_s23 }
  0x27   : > { %p6547_p12 = scmp.ne.s32.totalorder %s7031_s23, %s6546_s4  ;;  %p6555_p4 = scmp.lt.s32.totalorder %s6546_s4, %s6546_s4 }
  0x29   : > { %p6549_p13 = pnand %p6547_p12, %p7057_p7  ;;  %p6556_p6 = por %p6555_p4, %p6554_p1 }
  0x2b   : > { %p6550_p0 = pneg %p6549_p13 }
  0x2d   : > { %p6557_p8 = pnand %p6556_p6, %p6550_p0 }
  0x2f   : > { %6560 = shalt.err (!%p6557_p8)
}
  0x30   : > { %s6876_s29 = smov 384   ;;  %s6877_s1 = smov 24  }
  0x31   : > { %6327 = dma.hbm_to_vmem [thread:$0]  (!%p7043_p5), %s8809_s30, 3072, %s7031_s23, [#allocation7], %s6876_s29, %s6876_s29, %s6877_s1  }
  0x32   : > { %s8811_s9 = sld [smem:[#allocation33_spill]] }
  0x38   : > { %s6561_s20 = scalar_lea.hbm %s8811_s9, 128 }
  0x39   : > { %p6562_p9 = scmp.ne.s32.totalorder %s8811_s9, %s6561_s20  ;;  %p6568_p12 = scmp.lt.u32.totalorder %s6561_s20, %s8811_s9 }
  0x3b   : > { %p6564_p10 = pnand %p6562_p9, %p7057_p7 }
  0x3d   : > { %p6565_p11 = pneg %p6564_p10 }
  0x3f   : > { %p6570_p13 = pnand %p6568_p12, %p6565_p11 }
  0x41   : > { %6573 = shalt.err (!%p6570_p13)
}
  0x42   : > { %s6574_s23 = scalar_lea.vmem %s7039_s3, 128  ;;  %p6582_p6 = scmp.lt.s32.totalorder %s7039_s3, %s7039_s3 }
  0x43   : > { %p6575_p0 = scmp.ne.s32.totalorder %s7039_s3, %s6574_s23  ;;  %p6583_p8 = scmp.lt.s32.totalorder %s6574_s23, %s6574_s23 }
  0x45   : > { %p6577_p1 = pnand %p6575_p0, %p7057_p7  ;;  %p6584_p9 = por %p6583_p8, %p6582_p6 }
  0x47   : > { %p6578_p4 = pneg %p6577_p1 }
  0x49   : > { %p6585_p10 = pnand %p6584_p9, %p6578_p4 }
  0x4b   : > { %6588 = shalt.err (!%p6585_p10)
}
  0x4c   : > { %6333 = dma.hbm_to_vmem [thread:$0]  (!%p7043_p5), %s8811_s9, 128, %s7039_s3, [#allocation10]  }
  0x4d   : > { %s6589_s29 = scalar_lea.hbm %s8778_s13, 512 }
  0x4e   : > { %p6590_p11 = scmp.ne.s32.totalorder %s8778_s13, %s6589_s29  ;;  %p6596_p0 = scmp.lt.u32.totalorder %s6589_s29, %s8778_s13 }
  0x50   : > { %p6592_p12 = pnand %p6590_p11, %p7057_p7 }
  0x52   : > { %p6593_p13 = pneg %p6592_p12 }
  0x54   : > { %p6598_p1 = pnand %p6596_p0, %p6593_p13 }
  0x56   : > { %6601 = shalt.err (!%p6598_p1)
}
  0x57   : > { %s6602_s3 = scalar_lea.vmem %s7047_s28, 512  ;;  %p6610_p9 = scmp.lt.s32.totalorder %s7047_s28, %s7047_s28 }
  0x58   : > { %p6603_p4 = scmp.ne.s32.totalorder %s7047_s28, %s6602_s3  ;;  %p6611_p10 = scmp.lt.s32.totalorder %s6602_s3, %s6602_s3 }
  0x5a   : > { %p6605_p6 = pnand %p6603_p4, %p7057_p7  ;;  %p6612_p11 = por %p6611_p10, %p6610_p9 }
  0x5c   : > { %p6606_p8 = pneg %p6605_p6 }
  0x5e   : > { %p6613_p12 = pnand %p6612_p11, %p6606_p8 }
  0x60   : > { %6616 = shalt.err (!%p6613_p12)
}
  0x61   : > { %s8794_s27 = smov 256   ;;  %s8795_s4 = smov 16  }
  0x62   : > { %6339 = dma.hbm_to_vmem [thread:$0]  (!%p7043_p5), %s8778_s13, 512, %s7047_s28, [#allocation13], %s8794_s27, %s8794_s27, %s8795_s4  }
  0x63   : > { %s6880_s12 = smov [#allocation15]   ;;  %s6881_s20 = smov [#allocation18]  }
  0x64   : > { %s610_s18 = sshll.u32 %s6880_s12, 4  ;;  %s636_s29 = sshll.u32 %s6881_s20, 4  ;;  %s611_s18 = int_to_ptr.vmem [resolvable:$true] %s610_s18  ;;  %s7127_s29 = int_to_ptr.vmem [resolvable:$true] %s636_s29 }
  0x65   : > { %s6617_s21 = scalar_lea.hbm %s8780_s15, 256 }
  0x66   : > { %p6618_p13 = scmp.ne.s32.totalorder %s8780_s15, %s6617_s21  ;;  %p6624_p4 = scmp.lt.u32.totalorder %s6617_s21, %s8780_s15 }
  0x68   : > { %p6620_p0 = pnand %p6618_p13, %p7057_p7 }
  0x6a   : > { %p6621_p1 = pneg %p6620_p0 }
  0x6c   : > { %p6626_p6 = pnand %p6624_p4, %p6621_p1 }
  0x6e   : > { %6629 = shalt.err (!%p6626_p6)
}
  0x6f   : > { %s6630_s10 = scalar_lea.vmem %s611_s18, 256  ;;  %p6638_p11 = scmp.lt.s32.totalorder %s611_s18, %s611_s18 }
  0x70   : > { %p6631_p8 = scmp.ne.s32.totalorder %s611_s18, %s6630_s10  ;;  %p6639_p12 = scmp.lt.s32.totalorder %s6630_s10, %s6630_s10 }
  0x72   : > { %p6633_p9 = pnand %p6631_p8, %p7057_p7  ;;  %p6640_p2 = por %p6639_p12, %p6638_p11 }
  0x74   : > { %p6634_p10 = pneg %p6633_p9 }
  0x76   : > { %p6641_p3 = pnand %p6640_p2, %p6634_p10 }
  0x78   : > { %6644 = shalt.err (!%p6641_p3)
}
  0x79   : > { %s6882_s12 = smov 128   ;;  %s6883_s20 = smov 8  }
  0x7a   : > { %6345 = dma.hbm_to_vmem [thread:$0]  (!%p7043_p5), %s8780_s15, 256, %s611_s18, [#allocation16], %s6882_s12, %s6882_s12, %s6883_s20  }
  0x7b   : > { %s6645_s3 = scalar_lea.hbm %s8782_s17, 1024 }
  0x7c   : > { %p6646_p2 = scmp.ne.s32.totalorder %s8782_s17, %s6645_s3  ;;  %p6652_p0 = scmp.lt.u32.totalorder %s6645_s3, %s8782_s17 }
  0x7e   : > { %p6648_p3 = pnand %p6646_p2, %p7057_p7 }
  0x80   : > { %p6649_p13 = pneg %p6648_p3 }
  0x82   : > { %p6654_p1 = pnand %p6652_p0, %p6649_p13 }
  0x84   : > { %6657 = shalt.err (!%p6654_p1)
}
  0x85   : > { %s6658_s18 = scalar_lea.vmem %s7127_s29, 1024  ;;  %p6666_p9 = scmp.lt.s32.totalorder %s7127_s29, %s7127_s29 }
  0x86   : > { %p6659_p4 = scmp.ne.s32.totalorder %s7127_s29, %s6658_s18  ;;  %p6667_p10 = scmp.lt.s32.totalorder %s6658_s18, %s6658_s18 }
  0x88   : > { %p6661_p6 = pnand %p6659_p4, %p7057_p7  ;;  %p6668_p11 = por %p6667_p10, %p6666_p9 }
  0x8a   : > { %p6662_p8 = pneg %p6661_p6 }
  0x8c   : > { %p6669_p12 = pnand %p6668_p11, %p6662_p8 }
  0x8e   : > { %6672 = shalt.err (!%p6669_p12)
}
  0x8f   : > { %6351 = dma.hbm_to_vmem [thread:$0]  (!%p7043_p5), %s8782_s17, 1024, %s7127_s29, [#allocation19], %s6882_s12, %s6882_s12, %s6883_s20  }
  0x90   : > { %s6884_s0 = smov [#allocation4]   ;;  %s6885_s22 = smov [#allocation8]  }
  0x91   : > { %s504_s21 = sshll.u32 %s6884_s0, 4  ;;  %s543_s3 = sshll.u32 %s6885_s22, 4  ;;  %s505_s21 = int_to_ptr.vmem [resolvable:$true] %s504_s21  ;;  %s7176_s3 = int_to_ptr.vmem [resolvable:$true] %s543_s3 }
  0x92   : > { %s8812_s10 = sld [smem:[#allocation29_spill]] }
  0x98   : > { %s6673_s18 = scalar_lea.hbm %s8812_s10, 512 }
  0x99   : > { %p6674_p2 = scmp.ne.s32.totalorder %s8812_s10, %s6673_s18  ;;  %p6680_p0 = scmp.lt.u32.totalorder %s6673_s18, %s8812_s10 }
  0x9b   : > { %p6676_p3 = pnand %p6674_p2, %p7057_p7 }
  0x9d   : > { %p6677_p13 = pneg %p6676_p3 }
  0x9f   : > { %p6682_p1 = pnand %p6680_p0, %p6677_p13 }
  0xa1   : > { %6685 = shalt.err (!%p6682_p1)
}
  0xa2   : > { %s6686_s1 = scalar_lea.vmem %s505_s21, 512  ;;  %p6694_p9 = scmp.lt.s32.totalorder %s505_s21, %s505_s21 }
  0xa3   : > { %p6687_p4 = scmp.ne.s32.totalorder %s505_s21, %s6686_s1  ;;  %p6695_p10 = scmp.lt.s32.totalorder %s6686_s1, %s6686_s1 }
  0xa5   : > { %p6689_p6 = pnand %p6687_p4, %p7057_p7  ;;  %p6696_p11 = por %p6695_p10, %p6694_p9 }
  0xa7   : > { %p6690_p8 = pneg %p6689_p6 }
  0xa9   : > { %p6697_p12 = pnand %p6696_p11, %p6690_p8 }
  0xab   : > { %6700 = shalt.err (!%p6697_p12)
}
  0xac   : > { %6324 = dma.hbm_to_vmem [thread:$0]  (!%p7043_p5), %s8812_s10, 512, %s505_s21, [#allocation5], %s6882_s12, %s6882_s12, %s6883_s20  }
  0xad   : > { %s6701_s23 = scalar_lea.hbm %s8772_s7, 128 }
  0xae   : > { %p6702_p2 = scmp.ne.s32.totalorder %s8772_s7, %s6701_s23  ;;  %p6708_p0 = scmp.lt.u32.totalorder %s6701_s23, %s8772_s7 }
  0xb0   : > { %p6704_p3 = pnand %p6702_p2, %p7057_p7 }
  0xb2   : > { %p6705_p13 = pneg %p6704_p3 }
  0xb4   : > { %p6710_p1 = pnand %p6708_p0, %p6705_p13 }
  0xb6   : > { %6713 = shalt.err (!%p6710_p1)
}
  0xb7   : > { %s6714_s21 = scalar_lea.vmem %s7176_s3, 128  ;;  %p6722_p9 = scmp.lt.s32.totalorder %s7176_s3, %s7176_s3 }
  0xb8   : > { %p6715_p4 = scmp.ne.s32.totalorder %s7176_s3, %s6714_s21  ;;  %p6723_p10 = scmp.lt.s32.totalorder %s6714_s21, %s6714_s21 }
  0xba   : > { %p6717_p6 = pnand %p6715_p4, %p7057_p7  ;;  %p6724_p11 = por %p6723_p10, %p6722_p9 }
  0xbc   : > { %p6718_p8 = pneg %p6717_p6 }
  0xbe   : > { %p6725_p12 = pnand %p6724_p11, %p6718_p8 }
  0xc0   : > { %6728 = shalt.err (!%p6725_p12)
}
  0xc1   : > { %6330 = dma.hbm_to_vmem [thread:$0]  (!%p7043_p5), %s8772_s7, 128, %s7176_s3, [#allocation7]  }
  0xc2   : > { %s6886_s4 = smov [#allocation11]   ;;  %s6887_s22 = smov [#allocation14]  }
  0xc3   : > { %s571_s0 = sshll.u32 %s6886_s4, 4  ;;  %s597_s23 = sshll.u32 %s6887_s22, 4  ;;  %s572_s0 = int_to_ptr.vmem [resolvable:$true] %s571_s0  ;;  %s7222_s23 = int_to_ptr.vmem [resolvable:$true] %s597_s23 }
  0xc4   : > { %s6729_s27 = scalar_lea.hbm %s8776_s11, 128 }
  0xc5   : > { %p6730_p2 = scmp.ne.s32.totalorder %s8776_s11, %s6729_s27  ;;  %p6736_p0 = scmp.lt.u32.totalorder %s6729_s27, %s8776_s11 }
  0xc7   : > { %p6732_p3 = pnand %p6730_p2, %p7057_p7 }
  0xc9   : > { %p6733_p13 = pneg %p6732_p3 }
  0xcb   : > { %p6738_p1 = pnand %p6736_p0, %p6733_p13 }
  0xcd   : > { %6741 = shalt.err (!%p6738_p1)
}
  0xce   : > { %s6742_s9 = scalar_lea.vmem %s572_s0, 128  ;;  %p6750_p9 = scmp.lt.s32.totalorder %s572_s0, %s572_s0 }
  0xcf   : > { %p6743_p4 = scmp.ne.s32.totalorder %s572_s0, %s6742_s9  ;;  %p6751_p10 = scmp.lt.s32.totalorder %s6742_s9, %s6742_s9 }
  0xd1   : > { %p6745_p6 = pnand %p6743_p4, %p7057_p7  ;;  %p6752_p11 = por %p6751_p10, %p6750_p9 }
  0xd3   : > { %p6746_p8 = pneg %p6745_p6 }
  0xd5   : > { %p6753_p12 = pnand %p6752_p11, %p6746_p8 }
  0xd7   : > { %6756 = shalt.err (!%p6753_p12)
}
  0xd8   : > { %6336 = dma.hbm_to_vmem [thread:$0]  (!%p7043_p5), %s8776_s11, 128, %s572_s0, [#allocation10]  }
  0xd9   : > { %s6757_s27 = scalar_lea.hbm %s8779_s14, 256 }
  0xda   : > { %p6758_p2 = scmp.ne.s32.totalorder %s8779_s14, %s6757_s27  ;;  %p6764_p0 = scmp.lt.u32.totalorder %s6757_s27, %s8779_s14 }
  0xdc   : > { %p6760_p3 = pnand %p6758_p2, %p7057_p7 }
  0xde   : > { %p6761_p13 = pneg %p6760_p3 }
  0xe0   : > { %p6766_p1 = pnand %p6764_p0, %p6761_p13 }
  0xe2   : > { %6769 = shalt.err (!%p6766_p1)
}
  0xe3   : > { %s6770_s0 = scalar_lea.vmem %s7222_s23, 256  ;;  %p6778_p9 = scmp.lt.s32.totalorder %s7222_s23, %s7222_s23 }
  0xe4   : > { %p6771_p4 = scmp.ne.s32.totalorder %s7222_s23, %s6770_s0  ;;  %p6779_p10 = scmp.lt.s32.totalorder %s6770_s0, %s6770_s0 }
  0xe6   : > { %p6773_p6 = pnand %p6771_p4, %p7057_p7  ;;  %p6780_p11 = por %p6779_p10, %p6778_p9 }
  0xe8   : > { %p6774_p8 = pneg %p6773_p6 }
  0xea   : > { %p6781_p12 = pnand %p6780_p11, %p6774_p8 }
  0xec   : > { %6784 = shalt.err (!%p6781_p12)
}
  0xed   : > { %6342 = dma.hbm_to_vmem [thread:$0]  (!%p7043_p5), %s8779_s14, 256, %s7222_s23, [#allocation13], %s6882_s12, %s6882_s12, %s6883_s20  }
  0xee   : > { %s6888_s22 = smov [#allocation17]   ;;  %s6889_s18 = smov [#allocation20]  }
  0xef   : > { %s623_s28 = sshll.u32 %s6888_s22, 4  ;;  %s652_s27 = sshll.u32 %s6889_s18, 4  ;;  %s624_s28 = int_to_ptr.vmem [resolvable:$true] %s623_s28  ;;  %s7268_s27 = int_to_ptr.vmem [resolvable:$true] %s652_s27 }
  0xf0   : > { %s6785_s1 = scalar_lea.hbm %s8781_s16, 4096 }
  0xf1   : > { %p6786_p2 = scmp.ne.s32.totalorder %s8781_s16, %s6785_s1  ;;  %p6792_p0 = scmp.lt.u32.totalorder %s6785_s1, %s8781_s16 }
  0xf3   : > { %p6788_p3 = pnand %p6786_p2, %p7057_p7 }
  0xf5   : > { %p6789_p13 = pneg %p6788_p3 }
  0xf7   : > { %p6794_p1 = pnand %p6792_p0, %p6789_p13 }
  0xf9   : > { %6797 = shalt.err (!%p6794_p1)
}
  0xfa   : > { %s6798_s4 = scalar_lea.vmem %s624_s28, 4096  ;;  %p6806_p9 = scmp.lt.s32.totalorder %s624_s28, %s624_s28 }
  0xfb   : > { %p6799_p4 = scmp.ne.s32.totalorder %s624_s28, %s6798_s4  ;;  %p6807_p10 = scmp.lt.s32.totalorder %s6798_s4, %s6798_s4 }
  0xfd   : > { %p6801_p6 = pnand %p6799_p4, %p7057_p7  ;;  %p6808_p11 = por %p6807_p10, %p6806_p9 }
  0xff   : > { %p6802_p8 = pneg %p6801_p6 }
 0x101   : > { %p6809_p12 = pnand %p6808_p11, %p6802_p8 }
 0x103   : > { %6812 = shalt.err (!%p6809_p12)
}
 0x104   : > { %6348 = dma.hbm_to_vmem [thread:$0]  (!%p7043_p5), %s8781_s16, 4096, %s624_s28, [#allocation16], %s6882_s12, %s6882_s12, %s6883_s20  }
 0x105   : > { %s6813_s1 = scalar_lea.hbm %s8784_s19, 8192 }
 0x106   : > { %p6814_p2 = scmp.ne.s32.totalorder %s8784_s19, %s6813_s1  ;;  %p6820_p0 = scmp.lt.u32.totalorder %s6813_s1, %s8784_s19 }
 0x108   : > { %p6816_p3 = pnand %p6814_p2, %p7057_p7 }
 0x10a   : > { %p6817_p13 = pneg %p6816_p3 }
 0x10c   : > { %p6822_p1 = pnand %p6820_p0, %p6817_p13 }
 0x10e   : > { %6825 = shalt.err (!%p6822_p1)
}
 0x10f   : > { %s6826_s12 = scalar_lea.vmem %s7268_s27, 8192  ;;  %p6834_p9 = scmp.lt.s32.totalorder %s7268_s27, %s7268_s27 }
 0x110   : > { %p6827_p4 = scmp.ne.s32.totalorder %s7268_s27, %s6826_s12  ;;  %p6835_p10 = scmp.lt.s32.totalorder %s6826_s12, %s6826_s12 }
 0x112   : > { %p6829_p6 = pnand %p6827_p4, %p7057_p7  ;;  %p6836_p11 = por %p6835_p10, %p6834_p9 }
 0x114   : > { %p6830_p8 = pneg %p6829_p6 }
 0x116   : > { %p6837_p12 = pnand %p6836_p11, %p6830_p8 }
 0x118   : > { %6840 = shalt.err (!%p6837_p12)
}
 0x119   : > { %s8813_s20 = smov 16   ;;  %s8814_s28 = smov 256  }
 0x11a   : > { %6354 = dma.hbm_to_vmem [thread:$0]  (!%p7043_p5), %s8784_s19, 8192, %s7268_s27, [#allocation19], %s8814_s28, %s8814_s28, %s8813_s20  }
 0x11b   : > { %p8815_p2 = scmp.ne.s32.totalorder %s8807_s2, 0 }
 0x11c   : > { %p8816_p7 = scmp.eq.s32.totalorder (!%p8815_p2), %s7026_s24, 0 }
 0x11d   : > { %676 = sbr.rel (%p8815_p2) target bundleno = 3892 (0xf34), region = 100 }
 0x124   : > { %6846 = dma.done.wait (%p8816_p7), [#allocation5], 512   ;;  %p8817_p3 = pmov %p8816_p7 }
 0x126   : > { %6848 = vsyncadd (%p8817_p3), [#allocation5], 4294966784  ;;  %p8818_p13 = pmov %p8817_p3 }
 0x127   : > { %p8819_p0 = pmov %p8817_p3 }
 0x128   : > { %6850 = dma.done.wait (%p8818_p13), [#allocation7], 3200  }
 0x129   : > { %6852 = vsyncadd (%p8819_p0), [#allocation7], 4294964096  ;;  %p8820_p1 = pmov %p8819_p0 }
 0x12a   : > { %p8821_p5 = pmov %p8819_p0 }
 0x12b   : > { %6854 = dma.done.wait (%p8820_p1), [#allocation10], 256  }
 0x12c   : > { %6856 = vsyncadd (%p8821_p5), [#allocation10], 4294967040  ;;  %p8822_p4 = pmov %p8819_p0 }
 0x12d   : > { %p8823_p6 = pmov %p8819_p0 }
 0x12e   : > { %6858 = dma.done.wait (%p8822_p4), [#allocation13], 768  }
 0x12f   : > { %6860 = vsyncadd (%p8823_p6), [#allocation13], 4294966528  ;;  %p8824_p8 = pmov %p8819_p0 }
 0x130   : > { %p8825_p9 = pmov %p8819_p0 }
 0x131   : > { %6862 = dma.done.wait (%p8824_p8), [#allocation16], 4352  }
 0x132   : > { %6864 = vsyncadd (%p8825_p9), [#allocation16], 4294962944  ;;  %p8826_p10 = pmov %p8819_p0 }
 0x133   : > { %p8827_p11 = pmov %p8819_p0 }
 0x134   : > { %6866 = dma.done.wait (%p8826_p10), [#allocation19], 9216  }
 0x135   : > { %6868 = vsyncadd (%p8827_p11), [#allocation19], 4294958080  ;;  %v799_v0 = vlaneseq  ;;  %vm785_vm0 = vcmask 1044344   ;;  %v6890_v1 = vmov 0.0   ;;  %p774_p12 = scmp.lt.s32.totalorder %s7026_s24, 1  ;;  %vm787_vm1 = vcmask 134144  }
 0x136   : > { %786 = vst.msk [vmem:[#allocation2] sm:$0xf] %vm785_vm0, %v6890_v1  ;;  %1259 = vmatprep.mubr.f32.mxu0 %v6890_v1  ;;  %v926_v5 = vld [vmem:[#allocation12 + $0x3] ss:$8 sm:$0x3]  ;;  %s6891_s2 = smov 127  }
 0x137   : > { %v800_v2 = vshrl.u32 %v799_v0, 7  ;;  %788 = vst.msk [vmem:[#allocation2 + $0x18] sm:$0xf] %vm787_vm1, %v6890_v1  ;;  %s8837_s24 = smov (!%p774_p12, %s7026_s24), 1  ;;  %s6892_s26 = smov 112   ;;  %vm828_vm2 = vcmask 138240  }
 0x138   : > { %v839_v6 = vld [vmem:[#allocation12 + $0x1] ss:$8 sm:$0x3]  ;;  %v797_v11 = vld [vmem:[#allocation12] ss:$8 sm:$0x3] }
 0x139   : > { %v801_v3 = vsub.s32 0, %v800_v2  ;;  %v805_v4 = vsub.s32 1, %v800_v2  ;;  %s5549_s25 = sshll.u32 %s8837_s24, 3  ;;  %s8828_s29 = sld [smem:[#allocation28_spill]]  ;;  %1293 = vst.msk [vmem:[#allocation2 + $0x30] sm:$0xff] %vm828_vm2, %v6890_v1  ;;  %1294 = vst.msk [vmem:[#allocation2 + $0x50] sm:$0xff] %vm828_vm2, %v6890_v1 }
 0x13a   : > { %v884_v16 = vld [vmem:[#allocation12 + $0x2] ss:$8 sm:$0x3]  ;;  %s6893_s1 = smov 111   ;;  %s6894_s3 = smov 113   ;;  %1295 = vst.msk [vmem:[#allocation2 + $0x70] sm:$0xff] %vm828_vm2, %v6890_v1 }
 0x13b   : > { %v931_v7 = vrot.slane %v926_v5, %v801_v3  ;;  %v844_v8 = vrot.slane %v839_v6, %v801_v3  ;;  %v935_v9 = vrot.slane %v926_v5, %v805_v4  ;;  %v848_v10 = vrot.slane %v839_v6, %v805_v4  ;;  %v975_v19 = vld [vmem:[#allocation12 + $0x5] ss:$8 sm:$0x3]  ;;  %v1058_v22 = vld [vmem:[#allocation12 + $0x7] ss:$8 sm:$0x3] }
 0x13c   : > { %v806_v13 = vrot.slane %v797_v11, %v805_v4  ;;  %v802_v14 = vrot.slane %v797_v11, %v801_v3  ;;  %v893_v17 = vrot.slane %v884_v16, %v805_v4  ;;  %v889_v18 = vrot.slane %v884_v16, %v801_v3  ;;  %s6895_s0 = smov 1   ;;  %v1018_v25 = vld [vmem:[#allocation12 + $0x6] ss:$8 sm:$0x3]  ;;  %s6896_s9 = smov 16  }
 0x13d   : > { %936 = vrot.lane.b32.xlu1 %v931_v7, %s6891_s2  ;;  %849 = vrot.lane.b32.xlu0 %v844_v8, %s6892_s26  ;;  %v984_v20 = vrot.slane %v975_v19, %v805_v4  ;;  %v980_v21 = vrot.slane %v975_v19, %v801_v3  ;;  %v1067_v23 = vrot.slane %v1058_v22, %v805_v4  ;;  %v1101_v28 = vld [vmem:[#allocation12 + $0x10] ss:$8 sm:$0x3]  ;;  %s6897_s23 = smov 15   ;;  %s6898_s12 = smov 17   ;;  %vm811_vm3 = vcmask 908288  }
 0x13e   : > { %v1063_v24 = vrot.slane %v1058_v22, %v801_v3  ;;  %v1027_v26 = vrot.slane %v1018_v25, %v805_v4  ;;  %v1023_v27 = vrot.slane %v1018_v25, %v801_v3  ;;  %v1110_v29 = vrot.slane %v1101_v28, %v805_v4  ;;  %v794_v36 = vld [vmem:[#allocation2] sm:$0xf]  ;;  %v1016_v57 = vld [vmem:[#allocation2 + $0x18] sm:$0xf]  ;;  %s8829_s4 = sld [smem:[#allocation30_spill]]  ;;  %s6905_s20 = smov 8  }
 0x13f   : > { %s778_s21 = scalar_lea.vmem %s8828_s29, %s5549_s25  ;;  %v1106_v30 = vrot.slane %v1101_v28, %v801_v3  ;;  %v880_v42 = vld [vmem:[#allocation2] sm:$0xf]  ;;  %vm898_vm4 = vcmask 924672   ;;  %vm915_vm5 = vcmask 121856   ;;  %vm853_vm6 = vcmask 916480   ;;  %s8830_s25 = sld [smem:[#allocation32_spill]] }
 0x140   : > { %v784_v12 = vld [vmem:[%s778_s21] sm:$0xff]  ;;  %vm940_vm7 = vcmask 1039360   ;;  %vm960_vm8 = vcmask 7168   ;;  %vm873_vm9 = vcmask 130048   ;;  %vm1188_vm10 = vcmask 1043456   ;;  %s6906_s28 = smov 125  }
 0x141   : > { %938 = vrot.lane.b32.xlu1 %v935_v9, %s6891_s2  ;;  %851 = vrot.lane.b32.xlu0 %v848_v10, %s6892_s26  ;;  %v790_v15 = vcombine.high %v784_v12, %v784_v12  ;;  %792 = vst [vmem:[#allocation2 + $0x8] sm:$0xf] %v784_v12  ;;  %v922_v22 = vld [vmem:[#allocation2] sm:$0xf]  ;;  %vm1175_vm11 = vcmask 293888   ;;  %vm1589_vm12 = vcmask 1048504  }
 0x142   : > { %vm1594_vm13 = vcmask 597504   ;;  %vm1599_vm14 = vcmask 523264   ;;  %vm2115_vm15 = vcmask 261120   ;;  %vm1653_vm0 = vcmask 72704   ;;  %s6907_s22 = smov 123  }
 0x143   : > { %793 = vst [vmem:[#allocation2 + $0x10] sm:$0xf] %v790_v15  ;;  %2362 = vst.msk [vmem:[#allocation2 + $0x80] sm:$0xff] %vm1594_vm13, %v6890_v1  ;;  %vm1715_vm1 = vcmask 64512  }
 0x144   : > { %2363 = vst.msk [vmem:[#allocation2 + $0xa0] sm:$0xff] %vm1594_vm13, %v6890_v1  ;;  %2364 = vst.msk [vmem:[#allocation2 + $0xc0] sm:$0xff] %vm1594_vm13, %v6890_v1 }
 0x145   : > { %809 = vrot.lane.b32.xlu1 %v806_v13, %s6893_s1  ;;  %807 = vrot.lane.b32.xlu0 %v802_v14, %s6893_s1  ;;  %2365 = vst.msk [vmem:[#allocation2 + $0xe0] sm:$0xff] %vm1594_vm13, %v6890_v1 }
 0x148   : > { %v795_v48 = vld [vmem:[#allocation2 + $0x8] sm:$0xf] }
 0x149   : > { %896 = vrot.lane.b32.xlu1 %v893_v17, %s6894_s3  ;;  %894 = vrot.lane.b32.xlu0 %v889_v18, %s6894_s3  ;;  %v881_v53 = vld [vmem:[#allocation2 + $0x8] sm:$0xf]  ;;  %v835_v17 = vld [vmem:[#allocation2] sm:$0xf] }
 0x14a   : > { %v796_v35 = vld [vmem:[#allocation2 + $0x10] sm:$0xf]  ;;  %v971_v58 = vld [vmem:[#allocation2 + $0x8] sm:$0xf] }
 0x14b   : > { %v882_v41 = vld [vmem:[#allocation2 + $0x10] sm:$0xf]  ;;  %v1014_v62 = vld [vmem:[#allocation2 + $0x8] sm:$0xf] }
 0x14c   : > { %v1015_v59 = vld [vmem:[#allocation2 + $0x10] sm:$0xf]  ;;  %v836_v7 = vld [vmem:[#allocation2 + $0x8] sm:$0xf] }
 0x14d   : > { %987 = vrot.lane.b32.xlu1 %v984_v20, %s6895_s0  ;;  %985 = vrot.lane.b32.xlu0 %v980_v21, %s6895_s0  ;;  %v837_v2 = vld [vmem:[#allocation2 + $0x10] sm:$0xf]  ;;  %v923_v13 = vld [vmem:[#allocation2 + $0x8] sm:$0xf] }
 0x14e   : > { %v924_v9 = vld [vmem:[#allocation2 + $0x10] sm:$0xf]  ;;  %v967_v14 = vld [vmem:[#allocation2 + $0x8] sm:$0xf] }
 0x14f   : > { %969 = vst [vmem:[#allocation3 + $0x20] sm:$0xf] %v967_v14  ;;  %v972_v21 = vld [vmem:[#allocation2 + $0x10] sm:$0xf] }
 0x150   : > { %v1055_v25 = vld [vmem:[#allocation2 + $0x10] sm:$0xf] }
 0x151   : > { %1070 = vrot.lane.b32.xlu1 %v1067_v23, %s6896_s9  ;;  %1068 = vrot.lane.b32.xlu0 %v1063_v24, %s6896_s9  ;;  %v1098_v28 = vld [vmem:[#allocation2 + $0x10] sm:$0xf] }
 0x155   : > { %1030 = vrot.lane.b32.xlu1 %v1027_v26, %s6897_s23  ;;  %1028 = vrot.lane.b32.xlu0 %v1023_v27, %s6897_s23 }
 0x159   : > { %1113 = vrot.lane.b32.xlu1 %v1110_v29, %s6898_s12  ;;  %1111 = vrot.lane.b32.xlu0 %v1106_v30, %s6898_s12  ;;  %v968_v29 = vld [vmem:[#allocation2 + $0x10] sm:$0xf] }
 0x15a   : > { %970 = vst [vmem:[#allocation3 + $0x28] sm:$0xf] %v968_v29  ;;  %1292 = vst.msk [vmem:[#allocation2 + $0x10] sm:$0xff] %vm828_vm2, %v6890_v1 }
 0x1af   : > { %v7376_v31 = vpop.permute.xlu1 %936  ;;  %v7378_v32 = vpop.permute.xlu0 %849 }
 0x1b0   : > { %v858_v23 = vmul.f32 %v7378_v32, %v835_v17 }
 0x1b3   : > { %v939_v33 = vpop.permute.xlu1 %938  ;;  %v852_v34 = vpop.permute.xlu0 %851 }
 0x1b4   : > { %v854_v5 = vsel %vm853_vm6, %v7378_v32, %v852_v34  ;;  %v860_v8 = vmul.f32 %v852_v34, %v837_v2  ;;  %v941_v12 = vsel %vm940_vm7, %v7376_v31, %v939_v33  ;;  %v947_v15 = vmul.f32 %v939_v33, %v924_v9  ;;  %v973_v34 = vld [vmem:[#allocation2 + $0x18] sm:$0xf] }
 0x1b5   : > { %v859_v11 = vmul.f32 %v854_v5, %v836_v7  ;;  %v946_v19 = vmul.f32 %v941_v12, %v923_v13  ;;  %v945_v32 = vmul.f32 %v7376_v31, %v922_v22  ;;  %v864_v33 = vrot.slane %v858_v23, 4 }
 0x1b6   : > { %v866_v16 = vrot.slane %v860_v8, 4  ;;  %v953_v24 = vrot.slane %v947_v15, 4 }
 0x1b7   : > { %v810_v37 = vpop.permute.xlu1 %809  ;;  %v808_v38 = vpop.permute.xlu0 %807  ;;  %v865_v18 = vrot.slane %v859_v11, 4  ;;  %v952_v26 = vrot.slane %v946_v19, 4 }
 0x1b8   : > { %v818_v39 = vmul.f32 %v810_v37, %v796_v35  ;;  %v816_v40 = vmul.f32 %v808_v38, %v794_v36  ;;  %v812_v47 = vsel %vm811_vm3, %v808_v38, %v810_v37  ;;  %v1054_v37 = vld [vmem:[#allocation2 + $0x8] sm:$0xf] }
 0x1b9   : > { %v817_v51 = vmul.f32 %v812_v47, %v795_v48 }
 0x1ba   : > { %822 = vrot.lane.b32.xlu0 %v816_v40, %s6898_s12  ;;  %826 = vrot.lane.b32.xlu1 %v818_v39, %s6898_s12  ;;  %v951_v39 = vrot.slane %v945_v32, 4  ;;  %v1056_v40 = vld [vmem:[#allocation2 + $0x18] sm:$0xf] }
 0x1bb   : > { %v897_v43 = vpop.permute.xlu1 %896  ;;  %v895_v44 = vpop.permute.xlu0 %894 }
 0x1bc   : > { %v905_v45 = vmul.f32 %v897_v43, %v882_v41  ;;  %v903_v46 = vmul.f32 %v895_v44, %v880_v42  ;;  %v899_v52 = vsel %vm898_vm4, %v895_v44, %v897_v43 }
 0x1bd   : > { %v904_v56 = vmul.f32 %v899_v52, %v881_v53  ;;  %v1097_v52 = vld [vmem:[#allocation2 + $0x8] sm:$0xf] }
 0x1be   : > { %909 = vrot.lane.b32.xlu0 %v903_v46, %s6897_s23  ;;  %913 = vrot.lane.b32.xlu1 %v905_v45, %s6897_s23  ;;  %v1099_v45 = vld [vmem:[#allocation2 + $0x18] sm:$0xf] }
 0x1bf   : > { %v7385_v49 = vpop.permute.xlu1 %987  ;;  %v986_v50 = vpop.permute.xlu0 %985 }
 0x1c0   : > { %v993_v3 = vmul.f32 %v986_v50, %v971_v58  ;;  %v989_v20 = vsel %vm960_vm8, %v986_v50, %v7385_v49  ;;  %v995_v38 = vmul.f32 %v7385_v49, %v973_v34  ;;  %v1153_v58 = vld [vmem:[%s8829_s4 + $0x10] sm:$0xff] }
 0x1c1   : > { %v994_v27 = vmul.f32 %v989_v20, %v972_v21 }
 0x1c2   : > { %824 = vrot.lane.b32.xlu0 %v817_v51, %s6898_s12  ;;  %v999_v10 = vrot.slane %v993_v3, 4  ;;  %v1001_v43 = vrot.slane %v995_v38, 4  ;;  %s6904_s12 = smov 9  }
 0x1c3   : > { %v7389_v54 = vpop.permute.xlu1 %1070  ;;  %v7391_v55 = vpop.permute.xlu0 %1068  ;;  %v1000_v35 = vrot.slane %v994_v27, 4 }
 0x1c4   : > { %v1072_v30 = vsel %vm873_vm9, %v7391_v55, %v7389_v54  ;;  %v1076_v41 = vmul.f32 %v7391_v55, %v1054_v37  ;;  %v1078_v31 = vmul.f32 %v7389_v54, %v1056_v40  ;;  %v1151_v54 = vld [vmem:[%s8829_s4] sm:$0xff]  ;;  %v1152_v55 = vld [vmem:[%s8829_s4 + $0x8] sm:$0xff] }
 0x1c5   : > { %v1077_v36 = vmul.f32 %v1072_v30, %v1055_v25 }
 0x1c6   : > { %911 = vrot.lane.b32.xlu0 %v904_v56, %s6897_s23  ;;  %v1082_v47 = vrot.slane %v1076_v41, 4  ;;  %v1084_v50 = vrot.slane %v1078_v31, 4  ;;  %v6899_v56 = vmov 0   ;;  %s6902_s23 = smov 121  }
 0x1c7   : > { %v1031_v60 = vpop.permute.xlu1 %1030  ;;  %v1029_v61 = vpop.permute.xlu0 %1028  ;;  %v1083_v42 = vrot.slane %v1077_v36, 4  ;;  %6427 = vset.pattern.permute.xlu0 %v6899_v56  ;;  %6428 = vset.pattern.permute.xlu1 %v6899_v56  ;;  %v1472_v56 = vld [vmem:[#allocation17] sm:$0xff] }
 0x1c8   : > { %v1038_v63 = vmul.f32 %v1031_v60, %v1016_v57  ;;  %v1032_v0 = vsel %vm915_vm5, %v1029_v61, %v1031_v60  ;;  %v1036_v6 = vmul.f32 %v1029_v61, %v1014_v62  ;;  %v1154_v57 = vld [vmem:[%s8829_s4 + $0x18] sm:$0xff] }
 0x1c9   : > { %v1037_v4 = vmul.f32 %v1032_v0, %v1015_v59 }
 0x1ca   : > { %1046 = vrot.lane.b32.xlu1 %v1038_v63, %s6894_s3 }
 0x1cb   : > { %1044 = vrot.lane.b32.xlu0 %v1037_v4, %s6894_s3  ;;  %v1114_v44 = vpop.permute.xlu1 %1113  ;;  %v1112_v46 = vpop.permute.xlu0 %1111 }
 0x1cc   : > { %v1121_v48 = vmul.f32 %v1114_v44, %v1099_v45  ;;  %v1115_v49 = vsel %vm828_vm2, %v1112_v46, %v1114_v44  ;;  %v1119_v53 = vmul.f32 %v1112_v46, %v1097_v52  ;;  %v1139_v52 = vld [vmem:[#allocation4 + $0x10] sm:$0xff] }
 0x1cd   : > { %v1120_v51 = vmul.f32 %v1115_v49, %v1098_v28  ;;  %v1137_v49 = vld [vmem:[#allocation4] sm:$0xff] }
 0x1ce   : > { %1042 = vrot.lane.b32.xlu1 %v1036_v6, %s6894_s3  ;;  %s6900_s3 = smov 119  }
 0x1cf   : > { %1002 = vrot.lane.b32.xlu0 %v999_v10, %s6891_s2 }
 0x1d2   : > { %871 = vrot.lane.b32.xlu1 %v866_v16, %s6896_s9 }
 0x1d3   : > { %869 = vrot.lane.b32.xlu0 %v865_v18, %s6896_s9 }
 0x1d6   : > { %958 = vrot.lane.b32.xlu1 %v953_v24, %s6895_s0 }
 0x1d7   : > { %956 = vrot.lane.b32.xlu0 %v952_v26, %s6895_s0 }
 0x1da   : > { %867 = vrot.lane.b32.xlu1 %v864_v33, %s6896_s9  ;;  %s6901_s9 = smov 120  }
 0x1db   : > { %1004 = vrot.lane.b32.xlu0 %v1000_v35, %s6891_s2 }
 0x1de   : > { %954 = vrot.lane.b32.xlu1 %v951_v39, %s6895_s0 }
 0x1df   : > { %1087 = vrot.lane.b32.xlu0 %v1083_v42, %s6892_s26 }
 0x1e2   : > { %1006 = vrot.lane.b32.xlu1 %v1001_v43, %s6891_s2 }
 0x1e3   : > { %1085 = vrot.lane.b32.xlu0 %v1082_v47, %s6892_s26 }
 0x1e6   : > { %1089 = vrot.lane.b32.xlu1 %v1084_v50, %s6892_s26 }
 0x1e7   : > { %1129 = vrot.lane.b32.xlu0 %v1121_v48, %s6893_s1 }
 0x1ea   : > { %1127 = vrot.lane.b32.xlu1 %v1120_v51, %s6893_s1  ;;  %v1138_v51 = vld [vmem:[#allocation4 + $0x8] sm:$0xff] }
 0x1eb   : > { %1157 = vperm.xlu0 %6427, %v1151_v54   ;;  %v1488_v54 = vld [vmem:[#allocation17 + $0x80] sm:$0xff] }
 0x1ee   : > { %1125 = vrot.lane.b32.xlu1 %v1119_v53, %s6893_s1  ;;  %v1140_v53 = vld [vmem:[#allocation4 + $0x18] sm:$0xff] }
 0x1ef   : > { %1172 = vperm.xlu0 %6427, %v1154_v57  }
 0x1f2   : > { %1162 = vperm.xlu1 %6428, %v1152_v55   ;;  %v1489_v55 = vld [vmem:[#allocation17 + $0x88] sm:$0xff] }
 0x1f3   : > { %v6015_v57 = vpack.c.bf16 %v1489_v55, %v1488_v54 }
 0x1f5   : > { %6016 = vmatprep.subr.bf16.mxu1 %v6015_v57  ;;  %v1502_v57 = vld [vmem:[#allocation17 + $0xf0] sm:$0xff] }
 0x1f6   : > { %1167 = vperm.xlu1 %6428, %v1153_v58   ;;  %v1473_v58 = vld [vmem:[#allocation17 + $0x8] sm:$0xff] }
 0x22c   : > { %v823_v59 = vpop.permute.xlu0 %822  ;;  %v827_v61 = vpop.permute.xlu1 %826 }
 0x230   : > { %v910_v60 = vpop.permute.xlu0 %909  ;;  %v914_v2 = vpop.permute.xlu1 %913 }
 0x234   : > { %v825_v62 = vpop.permute.xlu0 %824 }
 0x235   : > { %v829_v63 = vsel %vm828_vm2, %v823_v59, %v825_v62  ;;  %v830_v0 = vsel %vm828_vm2, %v825_v62, %v827_v61  ;;  %v1490_v59 = vld [vmem:[#allocation17 + $0x90] sm:$0xff]  ;;  %v6017_v61 = vpack.c.bf16 %v1473_v58, %v1472_v56  ;;  %v1503_v58 = vld [vmem:[#allocation17 + $0xf8] sm:$0xff]  ;;  %vm1777_vm2 = vcmask 56320  }
 0x236   : > { %833 = vst [vmem:[#allocation3] sm:$0xf] %v829_v63  ;;  %834 = vst [vmem:[#allocation3 + $0x8] sm:$0xf] %v830_v0  ;;  %v1474_v63 = vld [vmem:[#allocation17 + $0x10] sm:$0xff]  ;;  %v1475_v0 = vld [vmem:[#allocation17 + $0x18] sm:$0xff] }
 0x237   : > { %6018 = vmatpush3.bf16.msra.mxu1 %v6017_v61 }
 0x238   : > { %v912_v3 = vpop.permute.xlu0 %911 }
 0x239   : > { %v916_v4 = vsel %vm915_vm5, %v910_v60, %v912_v3  ;;  %v917_v5 = vsel %vm915_vm5, %v912_v3, %v914_v2  ;;  %v1491_v60 = vld [vmem:[#allocation17 + $0x98] sm:$0xff]  ;;  %v1492_v2 = vld [vmem:[#allocation17 + $0xa0] sm:$0xff]  ;;  %v1493_v3 = vld [vmem:[#allocation17 + $0xa8] sm:$0xff]  ;;  %vm2966_vm5 = vcmask 23552  }
 0x23a   : > { %920 = vst [vmem:[#allocation3 + $0x10] sm:$0xf] %v916_v4  ;;  %921 = vst [vmem:[#allocation3 + $0x18] sm:$0xf] %v917_v5  ;;  %v6019_v62 = vpack.c.bf16 %v1491_v60, %v1490_v59  ;;  %v6021_v4 = vpack.c.bf16 %v1475_v0, %v1474_v63  ;;  %v6023_v5 = vpack.c.bf16 %v1493_v3, %v1492_v2  ;;  %v1486_v63 = vld [vmem:[#allocation17 + $0x70] sm:$0xff]  ;;  %v1487_v0 = vld [vmem:[#allocation17 + $0x78] sm:$0xff] }
 0x23c   : > { %v1047_v6 = vpop.permute.xlu1 %1046  ;;  %6020 = vmatprep.subr.bf16.mxu1 %v6019_v62  ;;  %v6043_v62 = vpack.c.bf16 %v1503_v58, %v1502_v57 }
 0x23d   : > { %v1045_v7 = vpop.permute.xlu0 %1044  ;;  %6022 = vmatpush3.bf16.msra.mxu1 %v6021_v4  ;;  %v6045_v4 = vpack.c.bf16 %v1487_v0, %v1486_v63 }
 0x23e   : > { %v1049_v8 = vsel %vm898_vm4, %v1045_v7, %v1047_v6  ;;  %6024 = vmatprep.subr.bf16.mxu1 %v6023_v5  ;;  %v1476_v6 = vld [vmem:[#allocation17 + $0x20] sm:$0xff] }
 0x23f   : > { %1053 = vst [vmem:[#allocation3 + $0x38] sm:$0xf] %v1049_v8 }
 0x240   : > { %v1043_v9 = vpop.permute.xlu1 %1042 }
 0x241   : > { %v1048_v10 = vsel %vm898_vm4, %v1043_v9, %v1045_v7  ;;  %v1003_v11 = vpop.permute.xlu0 %1002  ;;  %v1477_v7 = vld [vmem:[#allocation17 + $0x28] sm:$0xff]  ;;  %v1494_v9 = vld [vmem:[#allocation17 + $0xb0] sm:$0xff]  ;;  %vm2632_vm4 = vcmask 171136  }
 0x242   : > { %1052 = vst [vmem:[#allocation3 + $0x30] sm:$0xf] %v1048_v10  ;;  %v6025_v8 = vpack.c.bf16 %v1477_v7, %v1476_v6  ;;  %v1495_v10 = vld [vmem:[#allocation17 + $0xb8] sm:$0xff]  ;;  %2637 = vst.msk [vmem:[#allocation2 + $0x88] sm:$0xff] %vm2632_vm4, %v6890_v1 }
 0x243   : > { %2638 = vst.msk [vmem:[#allocation2 + $0xa8] sm:$0xff] %vm2632_vm4, %v6890_v1  ;;  %2639 = vst.msk [vmem:[#allocation2 + $0xc8] sm:$0xff] %vm2632_vm4, %v6890_v1 }
 0x244   : > { %v872_v12 = vpop.permute.xlu1 %871  ;;  %6026 = vmatpush3.bf16.msra.mxu1 %v6025_v8  ;;  %2640 = vst.msk [vmem:[#allocation2 + $0xe8] sm:$0xff] %vm2632_vm4, %v6890_v1 }
 0x245   : > { %v870_v13 = vpop.permute.xlu0 %869 }
 0x246   : > { %v875_v14 = vsel %vm873_vm9, %v870_v13, %v872_v12  ;;  %v1478_v12 = vld [vmem:[#allocation17 + $0x30] sm:$0xff] }
 0x247   : > { %879 = vst [vmem:[#allocation3 + $0x8] sm:$0xf0] %v875_v14 }
 0x248   : > { %v959_v15 = vpop.permute.xlu1 %958 }
 0x249   : > { %v957_v16 = vpop.permute.xlu0 %956 }
 0x24a   : > { %v962_v17 = vsel %vm960_vm8, %v957_v16, %v959_v15  ;;  %v1496_v15 = vld [vmem:[#allocation17 + $0xc0] sm:$0xff] }
 0x24b   : > { %966 = vst [vmem:[#allocation3 + $0x18] sm:$0xf0] %v962_v17 }
 0x24c   : > { %v868_v18 = vpop.permute.xlu1 %867 }
 0x24d   : > { %v874_v19 = vsel %vm873_vm9, %v868_v18, %v870_v13  ;;  %v1005_v20 = vpop.permute.xlu0 %1004  ;;  %v1479_v13 = vld [vmem:[#allocation17 + $0x38] sm:$0xff] }
 0x24e   : > { %878 = vst [vmem:[#allocation3] sm:$0xf0] %v874_v19  ;;  %v1008_v21 = vsel %vm940_vm7, %v1003_v11, %v1005_v20  ;;  %v1142_v25 = vld [vmem:[#allocation3 + $0x8] sm:$0xff]  ;;  %v6027_v11 = vpack.c.bf16 %v1495_v10, %v1494_v9  ;;  %v6029_v14 = vpack.c.bf16 %v1479_v13, %v1478_v12  ;;  %v1312_v9 = vld [vmem:[#allocation2 + $0x50] sm:$0xff] }
 0x24f   : > { %1012 = vst [vmem:[#allocation3 + $0x20] sm:$0xf0] %v1008_v21  ;;  %v1481_v21 = vld [vmem:[#allocation17 + $0x48] sm:$0xff] }
 0x250   : > { %v955_v22 = vpop.permute.xlu1 %954  ;;  %6028 = vmatprep.subr.bf16.mxu1 %v6027_v11  ;;  %v1315_v11 = vld [vmem:[#allocation2 + $0x70] sm:$0xff] }
 0x251   : > { %v961_v23 = vsel %vm960_vm8, %v955_v22, %v957_v16  ;;  %v1088_v24 = vpop.permute.xlu0 %1087  ;;  %6030 = vmatpush3.bf16.msra.mxu1 %v6029_v14  ;;  %v1497_v16 = vld [vmem:[#allocation17 + $0xc8] sm:$0xff]  ;;  %v5490_v14 = vld [vmem:[#allocation14] ss:$0 sm:$0xff] }
 0x252   : > { %965 = vst [vmem:[#allocation3 + $0x10] sm:$0xf0] %v961_v23  ;;  %v1144_v26 = vld [vmem:[#allocation3 + $0x18] sm:$0xff]  ;;  %v6031_v19 = vpack.c.bf16 %v1497_v16, %v1496_v15 }
 0x253   : > { %v6007_v27 = vpack.c.bf16 %v1144_v26, %v1142_v25  ;;  %v5491_v15 = vld [vmem:[#allocation14 + $0x1] ss:$0 sm:$0xff]  ;;  %v5492_v16 = vld [vmem:[#allocation14 + $0x2] ss:$0 sm:$0xff] }
 0x254   : > { %v1007_v28 = vpop.permute.xlu1 %1006  ;;  %6032 = vmatprep.subr.bf16.mxu1 %v6031_v19  ;;  %v5495_v19 = vld [vmem:[#allocation14 + $0x6] ss:$0 sm:$0xff] }
 0x255   : > { %v1009_v29 = vsel %vm940_vm7, %v1005_v20, %v1007_v28  ;;  %v1086_v30 = vpop.permute.xlu0 %1085  ;;  %6008 = vmatprep.subr.bf16.mxu0 %v6007_v27  ;;  %v1141_v35 = vld [vmem:[#allocation3] sm:$0xff]  ;;  %v1480_v20 = vld [vmem:[#allocation17 + $0x40] sm:$0xff]  ;;  %v1306_v28 = vld [vmem:[#allocation2 + $0x10] sm:$0xff] }
 0x256   : > { %1013 = vst [vmem:[#allocation3 + $0x28] sm:$0xf0] %v1009_v29  ;;  %v1091_v32 = vsel %vm853_vm6, %v1086_v30, %v1088_v24  ;;  %v1145_v46 = vld [vmem:[#allocation3 + $0x20] sm:$0xff]  ;;  %v1498_v29 = vld [vmem:[#allocation17 + $0xd0] sm:$0xff]  ;;  %v1499_v30 = vld [vmem:[#allocation17 + $0xd8] sm:$0xff] }
 0x257   : > { %1095 = vst [vmem:[#allocation3 + $0x30] sm:$0xf0] %v1091_v32 }
 0x258   : > { %v1090_v33 = vpop.permute.xlu1 %1089 }
 0x259   : > { %v1092_v34 = vsel %vm853_vm6, %v1088_v24, %v1090_v33  ;;  %v1143_v36 = vld [vmem:[#allocation3 + $0x10] sm:$0xff]  ;;  %v1130_v37 = vpop.permute.xlu0 %1129  ;;  %v6033_v24 = vpack.c.bf16 %v1481_v21, %v1480_v20  ;;  %v5497_v20 = vld [vmem:[#allocation14 + $0x8] ss:$0 sm:$0xff]  ;;  %v5496_v21 = vld [vmem:[#allocation14 + $0x7] ss:$0 sm:$0xff] }
 0x25a   : > { %1096 = vst [vmem:[#allocation3 + $0x38] sm:$0xf0] %v1092_v34  ;;  %v6009_v38 = vpack.c.bf16 %v1143_v36, %v1141_v35  ;;  %v6035_v34 = vpack.c.bf16 %v1499_v30, %v1498_v29  ;;  %v1482_v35 = vld [vmem:[#allocation17 + $0x50] sm:$0xff]  ;;  %v1483_v36 = vld [vmem:[#allocation17 + $0x58] sm:$0xff] }
 0x25b   : > { %6034 = vmatpush3.bf16.msra.mxu1 %v6033_v24 }
 0x25c   : > { %6010 = vmatpush1.bf16.msra.mxu0 %v6009_v38  ;;  %v1128_v39 = vpop.permute.xlu1 %1127  ;;  %6036 = vmatprep.subr.bf16.mxu1 %v6035_v34 }
 0x25d   : > { %v1132_v40 = vsel %vm811_vm3, %v1128_v39, %v1130_v37  ;;  %v1146_v43 = vld [vmem:[#allocation3 + $0x28] sm:$0xff] }
 0x25e   : > { %1136 = vst [vmem:[#allocation3 + $0x48] sm:$0xf] %v1132_v40  ;;  %v1147_v42 = vld [vmem:[#allocation3 + $0x30] sm:$0xff] }
 0x25f   : > { %v6013_v47 = vpack.c.bf16 %v1147_v42, %v1145_v46  ;;  %v1309_v42 = vld [vmem:[#allocation2 + $0x30] sm:$0xff] }
 0x260   : > { %v1126_v41 = vpop.permute.xlu1 %1125 }
 0x261   : > { %v1131_v31 = vsel %vm811_vm3, %v1126_v41, %v1128_v39  ;;  %v1148_v44 = vld [vmem:[#allocation3 + $0x38] sm:$0xff]  ;;  %v6037_v39 = vpack.c.bf16 %v1483_v36, %v1482_v35 }
 0x262   : > { %1135 = vst [vmem:[#allocation3 + $0x40] sm:$0xf] %v1131_v31  ;;  %v6011_v45 = vpack.c.bf16 %v1148_v44, %v1146_v43  ;;  %v1500_v43 = vld [vmem:[#allocation17 + $0xe0] sm:$0xff]  ;;  %v1501_v44 = vld [vmem:[#allocation17 + $0xe8] sm:$0xff] }
 0x263   : > { %6038 = vmatpush3.bf16.msra.mxu1 %v6037_v39 }
 0x264   : > { %6012 = vmatprep.subr.bf16.mxu0 %v6011_v45 }
 0x265   : > { %6014 = vmatpush1.bf16.msra.mxu0 %v6013_v47  ;;  %v1150_v48 = vld [vmem:[#allocation3 + $0x48] sm:$0xf] }
 0x266   : > { %5484 = vmatprep.subr.msk.mxu0 %vm1188_vm10, %v1150_v48  ;;  %v6039_v48 = vpack.c.bf16 %v1501_v44, %v1500_v43 }
 0x268   : > { %6040 = vmatprep.subr.bf16.mxu1 %v6039_v48 }
 0x269   : > { %v1149_v50 = vld [vmem:[#allocation3 + $0x40] sm:$0xf] }
 0x26a   : > { %5485 = vmatpush1.msk.msra.mxu0 %vm1188_vm10, %v1149_v50  ;;  %v1158_v17 = vpop.permute.xlu0 %1157  ;;  %v1485_v50 = vld [vmem:[#allocation17 + $0x68] sm:$0xff] }
 0x26b   : > { %5486 = vmatmul.mubr.msk.f32.vlgmr.msra.gmra.mrb[0].mxu0 %vm1175_vm11, %v1137_v49  ;;  %v1484_v49 = vld [vmem:[#allocation17 + $0x60] sm:$0xff] }
 0x26c   : > { %1265 = vmatprep.mubr.f32.mxu0 %v6890_v1  ;;  %v6041_v54 = vpack.c.bf16 %v1485_v50, %v1484_v49 }
 0x26e   : > { %6042 = vmatpush3.bf16.msra.mxu1 %v6041_v54  ;;  %v1173_v59 = vpop.permute.xlu0 %1172 }
 0x26f   : > { %5487 = vmatmul.mubr.msk.f32.gmra.mrb[2].mxu0 %vm1175_vm11, %v1138_v51  ;;  %6044 = vmatprep.subr.bf16.mxu1 %v6043_v62 }
 0x270   : > { %1271 = vmatprep.mubr.f32.mxu0 %v6890_v1 }
 0x271   : > { %v1163_v26 = vpop.permute.xlu1 %1162 }
 0x272   : > { %6046 = vmatpush3.bf16.msra.mxu1 %v6045_v4 }
 0x273   : > { %5488 = vmatmul.mubr.msk.f32.gmra.mrb[4].mxu0 %vm1175_vm11, %v1139_v52 }
 0x274   : > { %1277 = vmatprep.mubr.f32.mxu0 %v6890_v1 }
 0x275   : > { %v1168_v46 = vpop.permute.xlu1 %1167 }
 0x277   : > { %5489 = vmatmul.mubr.msk.f32.gmra.mrb[6].mxu0 %vm1175_vm11, %v1140_v53 }
 0x33e   : > { %v1261_v18 = vpop.f32.mrb[0].mxu0 }
 0x33f   : > { %v1262_v22 = vadd.f32 %v1261_v18, %v1158_v17  ;;  %v1263_v23 = vpop.f32.mrb[1].mxu0  ;;  %v5493_v18 = vld [vmem:[#allocation14 + $0x3] ss:$0 sm:$0xff] }
 0x340   : > { %v1264_v25 = vadd.f32 %v1263_v23, %v1158_v17  ;;  %v5494_v17 = vld [vmem:[#allocation14 + $0x5] ss:$0 sm:$0xff] }
 0x341   : > { %v7463_v27 = vmax.f32 %v1262_v22, 0.0 }
 0x342   : > { %v7465_v32 = vmax.f32 %v1264_v25, 0.0  ;;  %v1267_v33 = vpop.f32.mrb[2].mxu0 }
 0x343   : > { %1296 = vst [vmem:[#allocation2] sm:$0xff] %v7463_v27  ;;  %v1268_v37 = vadd.f32 %v1267_v33, %v1163_v26  ;;  %v1269_v38 = vpop.f32.mrb[3].mxu0 }
 0x344   : > { %1297 = vst [vmem:[#allocation2 + $0x8] sm:$0xff] %v7465_v32  ;;  %v1270_v40 = vadd.f32 %v1269_v38, %v1163_v26  ;;  %v6439_v41 = vpack.i.bf16 %v1306_v28, %v7465_v32  ;;  %1590 = vst.msk [vmem:[#allocation2] sm:$0xff] %vm1589_vm12, %v6890_v1 }
 0x345   : > { %v7472_v31 = vmax.f32 %v1268_v37, 0.0  ;;  %1595 = vst.msk [vmem:[#allocation2 + $0x8] sm:$0xff] %vm1594_vm13, %v6890_v1 }
 0x346   : > { %v7474_v45 = vmax.f32 %v1270_v40, 0.0  ;;  %v1273_v47 = vpop.f32.mrb[4].mxu0  ;;  %6440 = vrot.lane.b32.xlu0 %v6439_v41, %s6893_s1  ;;  %6430 = vrot.lane.b32.xlu1 %v6439_v41, %s6891_s2 }
 0x347   : > { %1298 = vst [vmem:[#allocation2 + $0x20] sm:$0xff] %v7472_v31  ;;  %v1274_v51 = vadd.f32 %v1273_v47, %v1168_v46  ;;  %v1275_v52 = vpop.f32.mrb[5].mxu0  ;;  %v6449_v53 = vpack.i.bf16 %v7472_v31, %v1309_v42 }
 0x348   : > { %1299 = vst [vmem:[#allocation2 + $0x28] sm:$0xff] %v7474_v45  ;;  %v1276_v55 = vadd.f32 %v1275_v52, %v1168_v46  ;;  %1591 = vst.msk [vmem:[#allocation2 + $0x20] sm:$0xff] %vm1589_vm12, %v6890_v1  ;;  %v6459_v8 = vpack.i.bf16 %v7474_v45, %v7463_v27 }
 0x349   : > { %v7483_v56 = vmax.f32 %v1274_v51, 0.0  ;;  %1596 = vst.msk [vmem:[#allocation2 + $0x28] sm:$0xff] %vm1594_vm13, %v6890_v1 }
 0x34a   : > { %v7485_v60 = vmax.f32 %v1276_v55, 0.0  ;;  %v1279_v61 = vpop.f32.mrb[6].mxu0  ;;  %6435 = vrot.lane.b32.xlu1 %v6439_v41, %s6892_s26  ;;  %6450 = vrot.lane.b32.xlu0 %v6449_v53, %s6892_s26 }
 0x34b   : > { %1300 = vst [vmem:[#allocation2 + $0x40] sm:$0xff] %v7483_v56  ;;  %v1280_v2 = vadd.f32 %v1279_v61, %v1173_v59  ;;  %v1281_v3 = vpop.f32.mrb[7].mxu0 }
 0x34c   : > { %1301 = vst [vmem:[#allocation2 + $0x48] sm:$0xff] %v7485_v60  ;;  %v1282_v5 = vadd.f32 %v1281_v3, %v1173_v59  ;;  %1592 = vst.msk [vmem:[#allocation2 + $0x40] sm:$0xff] %vm1589_vm12, %v6890_v1  ;;  %v6474_v10 = vpack.i.bf16 %v1312_v9, %v7485_v60 }
 0x34d   : > { %v7493_v6 = vmax.f32 %v1280_v2, 0.0  ;;  %1597 = vst.msk [vmem:[#allocation2 + $0x48] sm:$0xff] %vm1594_vm13, %v6890_v1 }
 0x34e   : > { %v7495_v7 = vmax.f32 %v1282_v5, 0.0  ;;  %6455 = vrot.lane.b32.xlu0 %v6449_v53, %s6893_s1  ;;  %6445 = vrot.lane.b32.xlu1 %v6449_v53, %s6891_s2 }
 0x34f   : > { %1302 = vst [vmem:[#allocation2 + $0x60] sm:$0xff] %v7493_v6  ;;  %v6489_v12 = vpack.i.bf16 %v7493_v6, %v1315_v11 }
 0x350   : > { %1303 = vst [vmem:[#allocation2 + $0x68] sm:$0xff] %v7495_v7  ;;  %1593 = vst.msk [vmem:[#allocation2 + $0x60] sm:$0xff] %vm1589_vm12, %v6890_v1  ;;  %v6494_v13 = vpack.i.bf16 %v7495_v7, %v7483_v56 }
 0x351   : > { %1598 = vst.msk [vmem:[#allocation2 + $0x68] sm:$0xff] %vm1594_vm13, %v6890_v1 }
 0x352   : > { %6460 = vrot.lane.b32.xlu0 %v6459_v8, %s6891_s2  ;;  %6470 = vrot.lane.b32.xlu1 %v6459_v8, %s6893_s1 }
 0x356   : > { %6465 = vrot.lane.b32.xlu0 %v6459_v8, %s6892_s26  ;;  %6475 = vrot.lane.b32.xlu1 %v6474_v10, %s6891_s2 }
 0x35a   : > { %6480 = vrot.lane.b32.xlu0 %v6474_v10, %s6892_s26  ;;  %6485 = vrot.lane.b32.xlu1 %v6474_v10, %s6893_s1 }
 0x35e   : > { %6490 = vrot.lane.b32.xlu0 %v6489_v12, %s6891_s2  ;;  %6495 = vrot.lane.b32.xlu1 %v6494_v13, %s6891_s2 }
 0x362   : > { %6510 = vrot.lane.b32.xlu0 %v6494_v13, %s6893_s1  ;;  %6500 = vrot.lane.b32.xlu1 %v6494_v13, %s6892_s26 }
 0x366   : > { %6515 = vrot.lane.b32.xlu0 %v6489_v12, %s6893_s1  ;;  %6505 = vrot.lane.b32.xlu1 %v6489_v12, %s6892_s26  ;;  %s6903_s1 = smov 7  }
 0x36a   : > { %1618 = vrot.lane.b32.xlu1 %v5490_v14, %s6900_s3  ;;  %1680 = vrot.lane.b32.xlu0 %v5491_v15, %s6901_s9 }
 0x36e   : > { %1742 = vrot.lane.b32.xlu0 %v5492_v16, %s6902_s23  ;;  %1869 = vrot.lane.b32.xlu1 %v5494_v17, %s6895_s0 }
 0x372   : > { %1804 = vrot.lane.b32.xlu0 %v5493_v18, %s6891_s2  ;;  %1906 = vrot.lane.b32.xlu1 %v5495_v19, %s6903_s1 }
 0x376   : > { %1980 = vrot.lane.b32.xlu0 %v5497_v20, %s6904_s12  ;;  %1943 = vrot.lane.b32.xlu1 %v5496_v21, %s6905_s20 }
 0x3b8   : > { %v6441_v22 = vpop.permute.xlu0 %6440  ;;  %v6431_v23 = vpop.permute.xlu1 %6430 }
 0x3b9   : > { %v6433_v24 = vunpack.i.h.bf16 %v6431_v23  ;;  %v6432_v25 = vunpack.i.l.bf16 %v6431_v23  ;;  %v6443_v30 = vunpack.i.h.bf16 %v6441_v22  ;;  %v6442_v33 = vunpack.i.l.bf16 %v6441_v22 }
 0x3bb   : > { %v1353_v26 = vsel %vm940_vm7, %v6432_v25, %v6433_v24  ;;  %v1449_v41 = vsel %vm811_vm3, %v6442_v33, %v6443_v30 }
 0x3bc   : > { %v6451_v28 = vpop.permute.xlu0 %6450  ;;  %v6436_v29 = vpop.permute.xlu1 %6435  ;;  %v1369_v36 = vmax.f32 %v7465_v32, %v1353_v26 }
 0x3bd   : > { %v6438_v34 = vunpack.i.h.bf16 %v6436_v29  ;;  %v6437_v35 = vunpack.i.l.bf16 %v6436_v29  ;;  %v6453_v52 = vunpack.i.h.bf16 %v6451_v28  ;;  %v6452_v53 = vunpack.i.l.bf16 %v6451_v28 }
 0x3bf   : > { %v1401_v37 = vsel %vm853_vm6, %v6437_v35, %v6438_v34 }
 0x3c0   : > { %v6456_v38 = vpop.permute.xlu0 %6455  ;;  %v6446_v39 = vpop.permute.xlu1 %6445  ;;  %v1417_v40 = vmax.f32 %v1369_v36, %v1401_v37 }
 0x3c1   : > { %v6447_v46 = vunpack.i.l.bf16 %v6446_v39  ;;  %v6448_v49 = vunpack.i.h.bf16 %v6446_v39  ;;  %v6457_v0 = vunpack.i.l.bf16 %v6456_v38  ;;  %v6458_v23 = vunpack.i.h.bf16 %v6456_v38 }
 0x3c2   : > { %v1465_v42 = vmax.f32 %v1417_v40, %v1449_v41 }
 0x3c4   : > { %v6461_v43 = vpop.permute.xlu0 %6460  ;;  %v6471_v44 = vpop.permute.xlu1 %6470  ;;  %1568 = vmatprep.mubr.f32.mxu1 %v1465_v42 }
 0x3c5   : > { %v6463_v47 = vunpack.i.h.bf16 %v6461_v43  ;;  %v6462_v48 = vunpack.i.l.bf16 %v6461_v43  ;;  %v6472_v50 = vunpack.i.l.bf16 %v6471_v44  ;;  %v6473_v55 = vunpack.i.h.bf16 %v6471_v44 }
 0x3c7   : > { %v1352_v51 = vsel %vm940_vm7, %v6462_v48, %v6432_v25  ;;  %v1355_v32 = vsel %vm940_vm7, %v6463_v47, %v6447_v46  ;;  %v1354_v54 = vsel %vm940_vm7, %v6448_v49, %v6463_v47  ;;  %v1448_v3 = vsel %vm811_vm3, %v6472_v50, %v6442_v33 }
 0x3c8   : > { %v6466_v57 = vpop.permute.xlu0 %6465  ;;  %v6476_v58 = vpop.permute.xlu1 %6475  ;;  %v1368_v2 = vmax.f32 %v7463_v27, %v1352_v51  ;;  %v1371_v4 = vmax.f32 %v7474_v45, %v1355_v32  ;;  %v1451_v15 = vsel %vm811_vm3, %v6473_v55, %v6457_v0  ;;  %v1370_v27 = vmax.f32 %v7472_v31, %v1354_v54 }
 0x3c9   : > { %v6468_v59 = vunpack.i.h.bf16 %v6466_v57  ;;  %v6467_v61 = vunpack.i.l.bf16 %v6466_v57  ;;  %v6478_v62 = vunpack.i.h.bf16 %v6476_v58  ;;  %v6477_v63 = vunpack.i.l.bf16 %v6476_v58  ;;  %v1604_v58 = vld [vmem:[#allocation2] sm:$0xff] }
 0x3ca   : > { %v1450_v31 = vsel %vm811_vm3, %v6458_v23, %v6473_v55  ;;  %2358 = vst.msk [vmem:[#allocation2] sm:$0xff] %vm1594_vm13, %v6890_v1 }
 0x3cb   : > { %v1357_v5 = vsel %vm940_vm7, %v6477_v63, %v6478_v62  ;;  %v1400_v8 = vsel %vm853_vm6, %v6467_v61, %v6437_v35  ;;  %v1403_v9 = vsel %vm853_vm6, %v6468_v59, %v6452_v53  ;;  %v1402_v10 = vsel %vm853_vm6, %v6453_v52, %v6468_v59 }
 0x3cc   : > { %v6481_v11 = vpop.permute.xlu0 %6480  ;;  %v6486_v12 = vpop.permute.xlu1 %6485  ;;  %v1416_v13 = vmax.f32 %v1368_v2, %v1400_v8  ;;  %v1419_v14 = vmax.f32 %v1371_v4, %v1403_v9  ;;  %v1418_v21 = vmax.f32 %v1370_v27, %v1402_v10  ;;  %v1373_v22 = vmax.f32 %v7485_v60, %v1357_v5 }
 0x3cd   : > { %v6483_v16 = vunpack.i.h.bf16 %v6481_v11  ;;  %v6482_v17 = vunpack.i.l.bf16 %v6481_v11  ;;  %v6488_v18 = vunpack.i.h.bf16 %v6486_v12  ;;  %v6487_v45 = vunpack.i.l.bf16 %v6486_v12 }
 0x3ce   : > { %v1464_v19 = vmax.f32 %v1416_v13, %v1448_v3  ;;  %v1467_v20 = vmax.f32 %v1419_v14, %v1451_v15  ;;  %v1466_v33 = vmax.f32 %v1418_v21, %v1450_v31  ;;  %v1606_v14 = vld [vmem:[#allocation2 + $0x20] sm:$0xff] }
 0x3cf   : > { %v1405_v24 = vsel %vm853_vm6, %v6482_v17, %v6483_v16  ;;  %v1453_v30 = vsel %vm811_vm3, %v6487_v45, %v6488_v18  ;;  %v7584_v18 = vld [vmem:[#allocation2 + $0x40] sm:$0xff]  ;;  %2359 = vst.msk [vmem:[#allocation2 + $0x20] sm:$0xff] %vm1594_vm13, %v6890_v1 }
 0x3d0   : > { %v6491_v25 = vpop.permute.xlu0 %6490  ;;  %v6496_v26 = vpop.permute.xlu1 %6495  ;;  %1569 = vmatmul.mubr.f32.vlgmr.msra.gmra.mrb[0].mxu1 %v1464_v19  ;;  %v1421_v28 = vmax.f32 %v1373_v22, %v1405_v24  ;;  %v7596_v21 = vld [vmem:[#allocation2 + $0x60] sm:$0xff]  ;;  %2360 = vst.msk [vmem:[#allocation2 + $0x40] sm:$0xff] %vm1594_vm13, %v6890_v1 }
 0x3d1   : > { %v6497_v29 = vunpack.i.l.bf16 %v6496_v26  ;;  %1573 = vmatprep.mubr.f32.mxu1 %v1467_v20  ;;  %v6493_v35 = vunpack.i.h.bf16 %v6491_v25  ;;  %v6492_v36 = vunpack.i.l.bf16 %v6491_v25  ;;  %v6498_v37 = vunpack.i.h.bf16 %v6496_v26  ;;  %2361 = vst.msk [vmem:[#allocation2 + $0x60] sm:$0xff] %vm1594_vm13, %v6890_v1 }
 0x3d2   : > { %v1469_v34 = vmax.f32 %v1421_v28, %v1453_v30 }
 0x3d3   : > { %v1356_v60 = vsel %vm940_vm7, %v6497_v29, %v6477_v63  ;;  %v1358_v43 = vsel %vm940_vm7, %v6493_v35, %v6498_v37  ;;  %v1359_v44 = vsel %vm940_vm7, %v6498_v37, %v6492_v36  ;;  %vm2852_vm7 = vcmask 31744  }
 0x3d4   : > { %v6511_v38 = vpop.permute.xlu0 %6510  ;;  %v6501_v39 = vpop.permute.xlu1 %6500  ;;  %1574 = vmatmul.mubr.f32.gmra.mrb[2].mxu1 %v1466_v33  ;;  %v1372_v42 = vmax.f32 %v7483_v56, %v1356_v60  ;;  %v1375_v57 = vmax.f32 %v7495_v7, %v1359_v44  ;;  %v1374_v56 = vmax.f32 %v7493_v6, %v1358_v43 }
 0x3d5   : > { %v6512_v40 = vunpack.i.l.bf16 %v6511_v38  ;;  %v6502_v41 = vunpack.i.l.bf16 %v6501_v39  ;;  %1578 = vmatprep.mubr.f32.mxu1 %v1469_v34  ;;  %v6503_v47 = vunpack.i.h.bf16 %v6501_v39  ;;  %v6513_v59 = vunpack.i.h.bf16 %v6511_v38 }
 0x3d7   : > { %v1404_v46 = vsel %vm853_vm6, %v6502_v41, %v6482_v17  ;;  %v1452_v51 = vsel %vm811_vm3, %v6512_v40, %v6487_v45 }
 0x3d8   : > { %v6516_v48 = vpop.permute.xlu0 %6515  ;;  %v6506_v49 = vpop.permute.xlu1 %6505  ;;  %v1420_v50 = vmax.f32 %v1372_v42, %v1404_v46 }
 0x3d9   : > { %v6518_v32 = vunpack.i.h.bf16 %v6516_v48  ;;  %v6517_v52 = vunpack.i.l.bf16 %v6516_v48  ;;  %v6508_v53 = vunpack.i.h.bf16 %v6506_v49  ;;  %v6507_v54 = vunpack.i.l.bf16 %v6506_v49 }
 0x3da   : > { %v1468_v55 = vmax.f32 %v1420_v50, %v1452_v51 }
 0x3db   : > { %v1407_v61 = vsel %vm853_vm6, %v6503_v47, %v6507_v54  ;;  %v1406_v62 = vsel %vm853_vm6, %v6508_v53, %v6503_v47  ;;  %v1455_v4 = vsel %vm811_vm3, %v6513_v59, %v6517_v52  ;;  %v1454_v5 = vsel %vm811_vm3, %v6518_v32, %v6513_v59 }
 0x3dc   : > { %1579 = vmatmul.mubr.f32.gmra.mrb[4].mxu1 %v1468_v55  ;;  %v1423_v63 = vmax.f32 %v1375_v57, %v1407_v61  ;;  %v1422_v0 = vmax.f32 %v1374_v56, %v1406_v62  ;;  %v7559_v2 = vpop.permute.xlu1 %1618  ;;  %v7561_v3 = vpop.permute.xlu0 %1680  ;;  %vm2623_vm3 = vcmask 1048536   ;;  %vm2738_vm6 = vcmask 39936  }
 0x3dd   : > { %v1621_v7 = vmul.f32 %v7559_v2, %v1604_v58  ;;  %v1683_v9 = vmul.f32 %v7561_v3, %v1604_v58  ;;  %v1623_v15 = vmul.f32 %v7559_v2, %v1606_v14  ;;  %v1685_v27 = vmul.f32 %v7561_v3, %v1606_v14 }
 0x3de   : > { %v1471_v6 = vmax.f32 %v1423_v63, %v1455_v4  ;;  %v1470_v8 = vmax.f32 %v1422_v0, %v1454_v5  ;;  %v1625_v45 = vmul.f32 %v7559_v2, %v7584_v18  ;;  %v1687_v19 = vmul.f32 %v7561_v3, %v7584_v18 }
 0x3df   : > { %1637 = vrot.lane.b32.xlu1 %v1621_v7, %s6904_s12  ;;  %v1627_v22 = vmul.f32 %v7559_v2, %v7596_v21  ;;  %v1689_v23 = vmul.f32 %v7561_v3, %v7596_v21 }
 0x3e0   : > { %1583 = vmatprep.mubr.f32.mxu1 %v1471_v6  ;;  %v7568_v10 = vpop.permute.xlu0 %1742  ;;  %v7620_v31 = vpop.permute.xlu1 %1869 }
 0x3e1   : > { %1584 = vmatmul.mubr.f32.gmra.mrb[6].mxu1 %v1470_v8  ;;  %v1745_v11 = vmul.f32 %v7568_v10, %v1604_v58  ;;  %v1747_v16 = vmul.f32 %v7568_v10, %v1606_v14  ;;  %v1749_v20 = vmul.f32 %v7568_v10, %v7584_v18  ;;  %v1751_v24 = vmul.f32 %v7568_v10, %v7596_v21 }
 0x3e3   : > { %1699 = vrot.lane.b32.xlu1 %v1683_v9, %s6905_s20 }
 0x3e4   : > { %v7572_v12 = vpop.permute.xlu0 %1804  ;;  %v7623_v34 = vpop.permute.xlu1 %1906 }
 0x3e5   : > { %v1807_v13 = vmul.f32 %v7572_v12, %v1604_v58  ;;  %v1809_v17 = vmul.f32 %v7572_v12, %v1606_v14  ;;  %v1811_v55 = vmul.f32 %v7572_v12, %v7584_v18  ;;  %v1813_v61 = vmul.f32 %v7572_v12, %v7596_v21 }
 0x3e7   : > { %1761 = vrot.lane.b32.xlu1 %v1745_v11, %s6903_s1 }
 0x3e8   : > { %v7637_v43 = vpop.permute.xlu1 %1943  ;;  %v1981_v0 = vpop.permute.xlu0 %1980 }
 0x3eb   : > { %1823 = vrot.lane.b32.xlu1 %v1807_v13, %s6895_s0  ;;  %v2067_v13 = vld [vmem:[%s8830_s25] sm:$0xff] }
 0x3ef   : > { %1641 = vrot.lane.b32.xlu1 %v1623_v15, %s6904_s12  ;;  %v2069_v15 = vld [vmem:[%s8830_s25 + $0x10] sm:$0xff] }
 0x3f3   : > { %1703 = vrot.lane.b32.xlu1 %v1685_v27, %s6905_s20 }
 0x3f7   : > { %1765 = vrot.lane.b32.xlu1 %v1747_v16, %s6903_s1 }
 0x3fb   : > { %1827 = vrot.lane.b32.xlu1 %v1809_v17, %s6895_s0  ;;  %v2071_v17 = vld [vmem:[%s8830_s25 + $0x20] sm:$0xff] }
 0x3ff   : > { %1645 = vrot.lane.b32.xlu1 %v1625_v45, %s6904_s12 }
 0x403   : > { %1707 = vrot.lane.b32.xlu1 %v1687_v19, %s6905_s20  ;;  %v2073_v19 = vld [vmem:[%s8830_s25 + $0x30] sm:$0xff] }
 0x407   : > { %1769 = vrot.lane.b32.xlu1 %v1749_v20, %s6903_s1 }
 0x40b   : > { %1649 = vrot.lane.b32.xlu1 %v1627_v22, %s6904_s12 }
 0x40f   : > { %1711 = vrot.lane.b32.xlu1 %v1689_v23, %s6905_s20 }
 0x413   : > { %1773 = vrot.lane.b32.xlu1 %v1751_v24, %s6903_s1 }
 0x451   : > { %v7677_v7 = vpop.permute.xlu1 %1637 }
 0x455   : > { %v7686_v11 = vpop.permute.xlu1 %1699 }
 0x459   : > { %v7698_v27 = vpop.permute.xlu1 %1761 }
 0x45d   : > { %v7706_v45 = vpop.permute.xlu1 %1823 }
 0x461   : > { %v7714_v21 = vpop.permute.xlu1 %1641 }
 0x465   : > { %v7720_v24 = vpop.permute.xlu1 %1703 }
 0x4a3   : > { %v5583_v25 = vpop.f32.mrb[0].mxu1 }
 0x4a4   : > { %v5584_v26 = vpop.f32.mrb[1].mxu1 }
 0x4a5   : > { %v5585_v28 = vadd.f32 %v5584_v26, %v5583_v25  ;;  %v7726_v26 = vpop.permute.xlu1 %1765 }
 0x4a7   : > { %1600 = vst.msk [vmem:[#allocation2 + $0x8] sm:$0xff] %vm1599_vm14, %v5585_v28  ;;  %v5586_v29 = vpop.f32.mrb[2].mxu1 }
 0x4a8   : > { %v5587_v30 = vpop.f32.mrb[3].mxu1 }
 0x4a9   : > { %v5588_v33 = vadd.f32 %v5587_v30, %v5586_v29 }
 0x4ab   : > { %1601 = vst.msk [vmem:[#allocation2 + $0x28] sm:$0xff] %vm1599_vm14, %v5588_v33 }
 0x4ae   : > { %v1859_v35 = vld [vmem:[#allocation2 + $0x8] sm:$0xff] }
 0x4af   : > { %v5589_v36 = vpop.f32.mrb[4].mxu1  ;;  %v1872_v37 = vmul.f32 %v7620_v31, %v1859_v35  ;;  %v1622_v60 = vmul.f32 %v1859_v35, %v7559_v2  ;;  %1855 = vst.msk [vmem:[#allocation3 + $0x100] sm:$0xff] %vm1599_vm14, %v1859_v35  ;;  %v1909_v41 = vmul.f32 %v7623_v34, %v1859_v35  ;;  %v1684_v42 = vmul.f32 %v1859_v35, %v7561_v3 }
 0x4b0   : > { %v5590_v38 = vpop.f32.mrb[5].mxu1  ;;  %v1946_v48 = vmul.f32 %v7637_v43, %v1859_v35  ;;  %v1746_v49 = vmul.f32 %v1859_v35, %v7568_v10  ;;  %v1808_v54 = vmul.f32 %v1859_v35, %v7572_v12  ;;  %v1983_v5 = vmul.f32 %v1981_v0, %v1859_v35  ;;  %2633 = vst.msk [vmem:[#allocation2 + $0x8] sm:$0xff] %vm2632_vm4, %v6890_v1 }
 0x4b1   : > { %v5591_v39 = vadd.f32 %v5590_v38, %v5589_v36  ;;  %1880 = vrot.lane.b32.xlu1 %v1872_v37, %s6891_s2  ;;  %1639 = vrot.lane.b32.xlu0 %v1622_v60, %s6904_s12  ;;  %v2068_v60 = vld [vmem:[%s8830_s25 + $0x8] sm:$0xff] }
 0x4b2   : > { %v7630_v40 = vld [vmem:[#allocation2 + $0x28] sm:$0xff] }
 0x4b3   : > { %1602 = vst.msk [vmem:[#allocation2 + $0x48] sm:$0xff] %vm1599_vm14, %v5591_v39  ;;  %1856 = vst.msk [vmem:[#allocation3 + $0x110] sm:$0xff] %vm1599_vm14, %v7630_v40  ;;  %v1624_v56 = vmul.f32 %v7630_v40, %v7559_v2  ;;  %v1686_v59 = vmul.f32 %v7630_v40, %v7561_v3  ;;  %v1873_v62 = vmul.f32 %v7620_v31, %v7630_v40  ;;  %v2070_v39 = vld [vmem:[%s8830_s25 + $0x18] sm:$0xff] }
 0x4b4   : > { %v5592_v44 = vpop.f32.mrb[6].mxu1  ;;  %v1748_v4 = vmul.f32 %v7630_v40, %v7568_v10  ;;  %v1910_v6 = vmul.f32 %v7623_v34, %v7630_v40  ;;  %v1810_v9 = vmul.f32 %v7630_v40, %v7572_v12  ;;  %v1947_v14 = vmul.f32 %v7637_v43, %v7630_v40  ;;  %2634 = vst.msk [vmem:[#allocation2 + $0x28] sm:$0xff] %vm2632_vm4, %v6890_v1 }
 0x4b5   : > { %v5593_v46 = vpop.f32.mrb[7].mxu1  ;;  %1917 = vrot.lane.b32.xlu1 %v1909_v41, %s6902_s23  ;;  %1701 = vrot.lane.b32.xlu0 %v1684_v42, %s6905_s20  ;;  %v2074_v42 = vld [vmem:[%s8830_s25 + $0x38] sm:$0xff] }
 0x4b6   : > { %v5594_v47 = vadd.f32 %v5593_v46, %v5592_v44  ;;  %v2047_v51 = vld [vmem:[#allocation3 + $0x100] sm:$0xff] }
 0x4b8   : > { %1603 = vst.msk [vmem:[#allocation2 + $0x68] sm:$0xff] %vm1599_vm14, %v5594_v47 }
 0x4b9   : > { %1954 = vrot.lane.b32.xlu1 %v1946_v48, %s6901_s9  ;;  %1763 = vrot.lane.b32.xlu0 %v1746_v49, %s6903_s1 }
 0x4ba   : > { %v1861_v50 = vld [vmem:[#allocation2 + $0x48] sm:$0xff]  ;;  %v2048_v32 = vld [vmem:[#allocation3 + $0x110] sm:$0xff] }
 0x4bb   : > { %v1874_v52 = vmul.f32 %v7620_v31, %v1861_v50  ;;  %v6047_v53 = vpack.c.bf16 %v2048_v32, %v2047_v51  ;;  %1857 = vst.msk [vmem:[#allocation3 + $0x120] sm:$0xff] %vm1599_vm14, %v1861_v50  ;;  %v1911_v58 = vmul.f32 %v7623_v34, %v1861_v50  ;;  %v1948_v63 = vmul.f32 %v7637_v43, %v1861_v50 }
 0x4bc   : > { %v1985_v8 = vmul.f32 %v1981_v0, %v1861_v50  ;;  %v1626_v16 = vmul.f32 %v1861_v50, %v7559_v2  ;;  %v1688_v18 = vmul.f32 %v1861_v50, %v7561_v3  ;;  %v1750_v20 = vmul.f32 %v1861_v50, %v7568_v10  ;;  %2635 = vst.msk [vmem:[#allocation2 + $0x48] sm:$0xff] %vm2632_vm4, %v6890_v1 }
 0x4bd   : > { %1884 = vrot.lane.b32.xlu1 %v1874_v52, %s6891_s2  ;;  %6048 = vmatprep.subr.bf16.mxu0 %v6047_v53  ;;  %v1812_v22 = vmul.f32 %v1861_v50, %v7572_v12 }
 0x4be   : > { %1825 = vrot.lane.b32.xlu0 %v1808_v54, %s6895_s0 }
 0x4bf   : > { %v7653_v57 = vld [vmem:[#allocation2 + $0x68] sm:$0xff] }
 0x4c0   : > { %1858 = vst.msk [vmem:[#allocation3 + $0x130] sm:$0xff] %vm1599_vm14, %v7653_v57  ;;  %v1628_v23 = vmul.f32 %v7559_v2, %v7653_v57  ;;  %v1690_v25 = vmul.f32 %v7561_v3, %v7653_v57  ;;  %v1875_v28 = vmul.f32 %v7620_v31, %v7653_v57  ;;  %v1752_v29 = vmul.f32 %v7568_v10, %v7653_v57  ;;  %v7733_v2 = vpop.permute.xlu1 %1827  ;;  %v2008_v10 = vld [vmem:[#allocation6 + $0x8] sm:$0xff] }
 0x4c1   : > { %1831 = vrot.lane.b32.xlu1 %v1811_v55, %s6895_s0  ;;  %v1912_v30 = vmul.f32 %v7623_v34, %v7653_v57  ;;  %v1814_v33 = vmul.f32 %v7572_v12, %v7653_v57  ;;  %v1949_v31 = vmul.f32 %v7637_v43, %v7653_v57  ;;  %2204 = vmatprep.mubr.f32.mxu0 %v2008_v10  ;;  %v2009_v12 = vld [vmem:[#allocation6 + $0x10] sm:$0xff] }
 0x4c2   : > { %1643 = vrot.lane.b32.xlu0 %v1624_v56, %s6904_s12  ;;  %v1984_v34 = vmul.f32 %v1981_v0, %v7630_v40  ;;  %v1986_v37 = vmul.f32 %v1981_v0, %v7653_v57  ;;  %5852 = vmatprep.mubr.msk.f32.mxu1 %vm2115_vm15, %v2009_v12  ;;  %v2072_v40 = vld [vmem:[%s8830_s25 + $0x28] sm:$0xff]  ;;  %2636 = vst.msk [vmem:[#allocation2 + $0x68] sm:$0xff] %vm2632_vm4, %v6890_v1 }
 0x4c4   : > { %v7739_v3 = vpop.permute.xlu1 %1645 }
 0x4c5   : > { %1921 = vrot.lane.b32.xlu1 %v1911_v58, %s6902_s23 }
 0x4c6   : > { %1705 = vrot.lane.b32.xlu0 %v1686_v59, %s6905_s20 }
 0x4c8   : > { %v7746_v35 = vpop.permute.xlu1 %1707 }
 0x4c9   : > { %1835 = vrot.lane.b32.xlu1 %v1813_v61, %s6895_s0 }
 0x4ca   : > { %1882 = vrot.lane.b32.xlu0 %v1873_v62, %s6891_s2 }
 0x4cc   : > { %v7751_v36 = vpop.permute.xlu1 %1769 }
 0x4cd   : > { %1958 = vrot.lane.b32.xlu1 %v1948_v63, %s6901_s9 }
 0x4ce   : > { %1767 = vrot.lane.b32.xlu0 %v1748_v4, %s6903_s1  ;;  %v2050_v4 = vld [vmem:[#allocation3 + $0x130] sm:$0xff] }
 0x4d0   : > { %v7759_v38 = vpop.permute.xlu1 %1649 }
 0x4d1   : > { %1991 = vrot.lane.b32.xlu1 %v1983_v5, %s6900_s3 }
 0x4d2   : > { %1919 = vrot.lane.b32.xlu0 %v1910_v6, %s6902_s23 }
 0x4d4   : > { %v7767_v41 = vpop.permute.xlu1 %1711 }
 0x4d5   : > { %1995 = vrot.lane.b32.xlu1 %v1985_v8, %s6900_s3  ;;  %v2049_v8 = vld [vmem:[#allocation3 + $0x120] sm:$0xff] }
 0x4d6   : > { %1829 = vrot.lane.b32.xlu0 %v1810_v9, %s6895_s0 }
 0x4d8   : > { %v7772_v43 = vpop.permute.xlu1 %1773 }
 0x4d9   : > { %2077 = vperm.xlu1 %6428, %v2067_v13  }
 0x4da   : > { %1956 = vrot.lane.b32.xlu0 %v1947_v14, %s6901_s9 }
 0x4dd   : > { %2087 = vperm.xlu1 %6428, %v2069_v15  }
 0x4de   : > { %1647 = vrot.lane.b32.xlu0 %v1626_v16, %s6904_s12 }
 0x4e1   : > { %2097 = vperm.xlu1 %6428, %v2071_v17  }
 0x4e2   : > { %1709 = vrot.lane.b32.xlu0 %v1688_v18, %s6905_s20 }
 0x4e5   : > { %2107 = vperm.xlu1 %6428, %v2073_v19  }
 0x4e6   : > { %1771 = vrot.lane.b32.xlu0 %v1750_v20, %s6903_s1 }
 0x4ea   : > { %1833 = vrot.lane.b32.xlu0 %v1812_v22, %s6895_s0 }
 0x4ee   : > { %1651 = vrot.lane.b32.xlu0 %v1628_v23, %s6904_s12  ;;  %s6911_s12 = smov 5  }
 0x4f2   : > { %1713 = vrot.lane.b32.xlu0 %v1690_v25, %s6905_s20  ;;  %s8832_s20 = sld [smem:[#allocation35_spill]] }
 0x4f6   : > { %1886 = vrot.lane.b32.xlu0 %v1875_v28, %s6891_s2 }
 0x4fa   : > { %1775 = vrot.lane.b32.xlu0 %v1752_v29, %s6903_s1  ;;  %s6909_s1 = smov 4  }
 0x4fe   : > { %1923 = vrot.lane.b32.xlu0 %v1912_v30, %s6902_s23  ;;  %s6908_s23 = smov 124  }
 0x502   : > { %1837 = vrot.lane.b32.xlu0 %v1814_v33, %s6895_s0 }
 0x506   : > { %1960 = vrot.lane.b32.xlu0 %v1949_v31, %s6901_s9 }
 0x50a   : > { %1993 = vrot.lane.b32.xlu0 %v1984_v34, %s6900_s3 }
 0x50e   : > { %1997 = vrot.lane.b32.xlu0 %v1986_v37, %s6900_s3 }
 0x512   : > { %2082 = vperm.xlu0 %6427, %v2068_v60  }
 0x516   : > { %2092 = vperm.xlu0 %6427, %v2070_v39  }
 0x51a   : > { %2102 = vperm.xlu0 %6427, %v2072_v40  }
 0x51e   : > { %2112 = vperm.xlu0 %6427, %v2074_v42  }
 0x523   : > { %v1881_v44 = vpop.permute.xlu1 %1880  ;;  %v1640_v46 = vpop.permute.xlu0 %1639 }
 0x524   : > { %1892 = vst.msk [vmem:[#allocation3 + $0x140] sm:$0xff] %vm1599_vm14, %v1881_v44  ;;  %v1654_v47 = vsel %vm1653_vm0, %v7677_v7, %v1640_v46 }
 0x525   : > { %1662 = vst.msk [vmem:[#allocation3] sm:$0xff] %vm1599_vm14, %v1654_v47 }
 0x527   : > { %v1918_v48 = vpop.permute.xlu1 %1917  ;;  %v1702_v49 = vpop.permute.xlu0 %1701 }
 0x528   : > { %1929 = vst.msk [vmem:[#allocation3 + $0x180] sm:$0xff] %vm1599_vm14, %v1918_v48  ;;  %v1716_v50 = vsel %vm1715_vm1, %v7686_v11, %v1702_v49  ;;  %v6051_v11 = vpack.c.bf16 %v2050_v4, %v2049_v8 }
 0x529   : > { %1724 = vst.msk [vmem:[#allocation3 + $0x40] sm:$0xff] %vm1599_vm14, %v1716_v50 }
 0x52b   : > { %v1955_v51 = vpop.permute.xlu1 %1954  ;;  %v1764_v32 = vpop.permute.xlu0 %1763  ;;  %v2051_v34 = vld [vmem:[#allocation3 + $0x140] sm:$0xff] }
 0x52c   : > { %1966 = vst.msk [vmem:[#allocation3 + $0x1c0] sm:$0xff] %vm1599_vm14, %v1955_v51  ;;  %v1778_v52 = vsel %vm1777_vm2, %v7698_v27, %v1764_v32  ;;  %v2031_v5 = vld [vmem:[#allocation3] sm:$0xff] }
 0x52d   : > { %1786 = vst.msk [vmem:[#allocation3 + $0x80] sm:$0xff] %vm1599_vm14, %v1778_v52 }
 0x52f   : > { %v1885_v53 = vpop.permute.xlu1 %1884  ;;  %v2055_v50 = vld [vmem:[#allocation3 + $0x180] sm:$0xff] }
 0x530   : > { %1894 = vst.msk [vmem:[#allocation3 + $0x160] sm:$0xff] %vm1599_vm14, %v1885_v53  ;;  %v1826_v54 = vpop.permute.xlu0 %1825 }
 0x531   : > { %v1839_v55 = vsel %vm960_vm8, %v7706_v45, %v1826_v54 }
 0x532   : > { %1847 = vst.msk [vmem:[#allocation3 + $0xc0] sm:$0xff] %vm1599_vm14, %v1839_v55 }
 0x533   : > { %v1832_v57 = vpop.permute.xlu1 %1831  ;;  %v2059_v4 = vld [vmem:[#allocation3 + $0x1c0] sm:$0xff] }
 0x534   : > { %v1644_v56 = vpop.permute.xlu0 %1643  ;;  %v2039_v53 = vld [vmem:[#allocation3 + $0x80] sm:$0xff] }
 0x535   : > { %v1655_v58 = vsel %vm1653_vm0, %v7714_v21, %v1644_v56 }
 0x536   : > { %1663 = vst.msk [vmem:[#allocation3 + $0x10] sm:$0xff] %vm1599_vm14, %v1655_v58 }
 0x537   : > { %v1922_v59 = vpop.permute.xlu1 %1921  ;;  %v2053_v42 = vld [vmem:[#allocation3 + $0x160] sm:$0xff] }
 0x538   : > { %1931 = vst.msk [vmem:[#allocation3 + $0x1a0] sm:$0xff] %vm1599_vm14, %v1922_v59  ;;  %v1706_v61 = vpop.permute.xlu0 %1705 }
 0x539   : > { %v1717_v62 = vsel %vm1715_vm1, %v7720_v24, %v1706_v61 }
 0x53a   : > { %1725 = vst.msk [vmem:[#allocation3 + $0x50] sm:$0xff] %vm1599_vm14, %v1717_v62 }
 0x53b   : > { %v7797_v63 = vpop.permute.xlu1 %1835 }
 0x53c   : > { %v1883_v0 = vpop.permute.xlu0 %1882 }
 0x53d   : > { %1893 = vst.msk [vmem:[#allocation3 + $0x150] sm:$0xff] %vm1599_vm14, %v1883_v0  ;;  %v2032_v7 = vld [vmem:[#allocation3 + $0x10] sm:$0xff] }
 0x53e   : > { %v6049_v6 = vpack.c.bf16 %v2032_v7, %v2031_v5 }
 0x53f   : > { %v1959_v9 = vpop.permute.xlu1 %1958  ;;  %v2057_v56 = vld [vmem:[#allocation3 + $0x1a0] sm:$0xff] }
 0x540   : > { %1968 = vst.msk [vmem:[#allocation3 + $0x1e0] sm:$0xff] %vm1599_vm14, %v1959_v9  ;;  %6050 = vmatpush3.bf16.msra.mxu0 %v6049_v6  ;;  %v1768_v13 = vpop.permute.xlu0 %1767  ;;  %v2043_v6 = vld [vmem:[#allocation3 + $0xc0] sm:$0xff] }
 0x541   : > { %v1779_v14 = vsel %vm1777_vm2, %v7726_v26, %v1768_v13  ;;  %6052 = vmatprep.subr.bf16.mxu0 %v6051_v11  ;;  %v2036_v37 = vld [vmem:[#allocation3 + $0x50] sm:$0xff] }
 0x542   : > { %1787 = vst.msk [vmem:[#allocation3 + $0x90] sm:$0xff] %vm1599_vm14, %v1779_v14 }
 0x543   : > { %v1992_v15 = vpop.permute.xlu1 %1991 }
 0x544   : > { %2003 = vst.msk [vmem:[#allocation3 + $0x200] sm:$0xff] %vm1599_vm14, %v1992_v15  ;;  %v1920_v27 = vpop.permute.xlu0 %1919  ;;  %v2052_v33 = vld [vmem:[#allocation3 + $0x150] sm:$0xff] }
 0x545   : > { %1930 = vst.msk [vmem:[#allocation3 + $0x190] sm:$0xff] %vm1599_vm14, %v1920_v27 }
 0x547   : > { %v1996_v16 = vpop.permute.xlu1 %1995  ;;  %v2061_v13 = vld [vmem:[#allocation3 + $0x1e0] sm:$0xff] }
 0x548   : > { %2005 = vst.msk [vmem:[#allocation3 + $0x220] sm:$0xff] %vm1599_vm14, %v1996_v16  ;;  %v1830_v17 = vpop.permute.xlu0 %1829 }
 0x549   : > { %v1840_v18 = vsel %vm960_vm8, %v7733_v2, %v1830_v17  ;;  %v2007_v17 = vld [vmem:[#allocation6] sm:$0xff] }
 0x54a   : > { %1848 = vst.msk [vmem:[#allocation3 + $0xd0] sm:$0xff] %vm1599_vm14, %v1840_v18 }
 0x54b   : > { %v2063_v18 = vld [vmem:[#allocation3 + $0x200] sm:$0xff] }
 0x54c   : > { %v1957_v45 = vpop.permute.xlu0 %1956  ;;  %v2056_v46 = vld [vmem:[#allocation3 + $0x190] sm:$0xff] }
 0x54d   : > { %1967 = vst.msk [vmem:[#allocation3 + $0x1d0] sm:$0xff] %vm1599_vm14, %v1957_v45  ;;  %v6063_v51 = vpack.c.bf16 %v2056_v46, %v2055_v50 }
 0x550   : > { %v1648_v19 = vpop.permute.xlu0 %1647 }
 0x551   : > { %v1656_v20 = vsel %vm1653_vm0, %v7739_v3, %v1648_v19 }
 0x552   : > { %1664 = vst.msk [vmem:[#allocation3 + $0x20] sm:$0xff] %vm1599_vm14, %v1656_v20  ;;  %v2011_v20 = vld [vmem:[#allocation6 + $0x20] sm:$0xff] }
 0x554   : > { %v1710_v21 = vpop.permute.xlu0 %1709  ;;  %v2060_v59 = vld [vmem:[#allocation3 + $0x1d0] sm:$0xff] }
 0x555   : > { %v1718_v22 = vsel %vm1715_vm1, %v7746_v35, %v1710_v21  ;;  %v6071_v5 = vpack.c.bf16 %v2060_v59, %v2059_v4  ;;  %v2010_v21 = vld [vmem:[#allocation6 + $0x18] sm:$0xff]  ;;  %v2489_v59 = vld [vmem:[#allocation18 + $0x18] sm:$0xff] }
 0x556   : > { %1726 = vst.msk [vmem:[#allocation3 + $0x60] sm:$0xff] %vm1599_vm14, %v1718_v22  ;;  %v2065_v22 = vld [vmem:[#allocation3 + $0x220] sm:$0xff] }
 0x558   : > { %v1772_v23 = vpop.permute.xlu0 %1771  ;;  %v2078_v50 = vpop.permute.xlu1 %2077 }
 0x559   : > { %v1780_v24 = vsel %vm1777_vm2, %v7751_v36, %v1772_v23  ;;  %v2033_v31 = vld [vmem:[#allocation3 + $0x20] sm:$0xff]  ;;  %v6055_v36 = vpack.c.bf16 %v2052_v33, %v2051_v34  ;;  %v2020_v33 = vld [vmem:[#allocation6 + $0x68] sm:$0xff] }
 0x55a   : > { %1788 = vst.msk [vmem:[#allocation3 + $0xa0] sm:$0xff] %vm1599_vm14, %v1780_v24  ;;  %v2023_v34 = vld [vmem:[#allocation6 + $0x80] sm:$0xff] }
 0x55c   : > { %v1834_v25 = vpop.permute.xlu0 %1833 }
 0x55d   : > { %v1841_v26 = vsel %vm960_vm8, %v1832_v57, %v1834_v25  ;;  %v2037_v48 = vld [vmem:[#allocation3 + $0x60] sm:$0xff]  ;;  %v2014_v25 = vld [vmem:[#allocation6 + $0x38] sm:$0xff] }
 0x55e   : > { %1849 = vst.msk [vmem:[#allocation3 + $0xe0] sm:$0xff] %vm1599_vm14, %v1841_v26  ;;  %v2013_v26 = vld [vmem:[#allocation6 + $0x30] sm:$0xff] }
 0x560   : > { %v1652_v28 = vpop.permute.xlu0 %1651 }
 0x561   : > { %v1657_v29 = vsel %vm1653_vm0, %v7759_v38, %v1652_v28  ;;  %v2035_v38 = vld [vmem:[#allocation3 + $0x40] sm:$0xff]  ;;  %v2012_v28 = vld [vmem:[#allocation6 + $0x28] sm:$0xff] }
 0x562   : > { %1665 = vst.msk [vmem:[#allocation3 + $0x30] sm:$0xff] %vm1599_vm14, %v1657_v29  ;;  %v6057_v39 = vpack.c.bf16 %v2036_v37, %v2035_v38  ;;  %v2041_v62 = vld [vmem:[#allocation3 + $0xa0] sm:$0xff]  ;;  %v2017_v29 = vld [vmem:[#allocation6 + $0x50] sm:$0xff]  ;;  %v2022_v37 = vld [vmem:[#allocation6 + $0x78] sm:$0xff] }
 0x563   : > { %v2025_v38 = vld [vmem:[#allocation6 + $0x90] sm:$0xff] }
 0x564   : > { %v1714_v2 = vpop.permute.xlu0 %1713 }
 0x565   : > { %v1719_v30 = vsel %vm1715_vm1, %v7767_v41, %v1714_v2  ;;  %v2045_v27 = vld [vmem:[#allocation3 + $0xe0] sm:$0xff] }
 0x566   : > { %1727 = vst.msk [vmem:[#allocation3 + $0x70] sm:$0xff] %vm1599_vm14, %v1719_v30  ;;  %v2015_v2 = vld [vmem:[#allocation6 + $0x40] sm:$0xff]  ;;  %v2016_v30 = vld [vmem:[#allocation6 + $0x48] sm:$0xff] }
 0x568   : > { %v1887_v3 = vpop.permute.xlu0 %1886 }
 0x569   : > { %1895 = vst.msk [vmem:[#allocation3 + $0x170] sm:$0xff] %vm1599_vm14, %v1887_v3  ;;  %v2034_v10 = vld [vmem:[#allocation3 + $0x30] sm:$0xff]  ;;  %v2018_v3 = vld [vmem:[#allocation6 + $0x58] sm:$0xff] }
 0x56a   : > { %v6053_v35 = vpack.c.bf16 %v2034_v10, %v2033_v31  ;;  %v2021_v31 = vld [vmem:[#allocation6 + $0x70] sm:$0xff]  ;;  %v2019_v10 = vld [vmem:[#allocation6 + $0x60] sm:$0xff] }
 0x56c   : > { %6054 = vmatpush3.bf16.msra.mxu0 %v6053_v35  ;;  %v1776_v12 = vpop.permute.xlu0 %1775  ;;  %v2024_v35 = vld [vmem:[#allocation6 + $0x88] sm:$0xff] }
 0x56d   : > { %v1781_v60 = vsel %vm1777_vm2, %v7772_v43, %v1776_v12  ;;  %6056 = vmatprep.subr.bf16.mxu0 %v6055_v36  ;;  %v2038_v40 = vld [vmem:[#allocation3 + $0x70] sm:$0xff]  ;;  %v2027_v36 = vld [vmem:[#allocation6 + $0xa0] sm:$0xff]  ;;  %v2030_v12 = vld [vmem:[#allocation6 + $0xb8] sm:$0xff] }
 0x56e   : > { %1789 = vst.msk [vmem:[#allocation3 + $0xb0] sm:$0xff] %vm1599_vm14, %v1781_v60  ;;  %v6061_v49 = vpack.c.bf16 %v2038_v40, %v2037_v48  ;;  %v2040_v43 = vld [vmem:[#allocation3 + $0x90] sm:$0xff]  ;;  %v2026_v60 = vld [vmem:[#allocation6 + $0x98] sm:$0xff]  ;;  %v2028_v40 = vld [vmem:[#allocation6 + $0xa8] sm:$0xff] }
 0x56f   : > { %v6065_v54 = vpack.c.bf16 %v2040_v43, %v2039_v53 }
 0x570   : > { %6058 = vmatpush3.bf16.msra.mxu0 %v6057_v39  ;;  %v1924_v41 = vpop.permute.xlu0 %1923  ;;  %v2054_v44 = vld [vmem:[#allocation3 + $0x170] sm:$0xff] }
 0x571   : > { %1932 = vst.msk [vmem:[#allocation3 + $0x1b0] sm:$0xff] %vm1599_vm14, %v1924_v41  ;;  %v6059_v47 = vpack.c.bf16 %v2054_v44, %v2053_v42  ;;  %v2029_v39 = vld [vmem:[#allocation6 + $0xb0] sm:$0xff]  ;;  %v2486_v41 = vld [vmem:[#allocation18] sm:$0xff]  ;;  %v2487_v42 = vld [vmem:[#allocation18 + $0x8] sm:$0xff] }
 0x572   : > { %v6087_v44 = vpack.c.bf16 %v2487_v42, %v2486_v41 }
 0x573   : > { %6060 = vmatprep.subr.bf16.mxu0 %v6059_v47 }
 0x574   : > { %6062 = vmatpush3.bf16.msra.mxu0 %v6061_v49  ;;  %v1838_v32 = vpop.permute.xlu0 %1837 }
 0x575   : > { %v1842_v52 = vsel %vm960_vm8, %v7797_v63, %v1838_v32  ;;  %6064 = vmatprep.subr.bf16.mxu0 %v6063_v51  ;;  %v2042_v55 = vld [vmem:[#allocation3 + $0xb0] sm:$0xff] }
 0x576   : > { %1850 = vst.msk [vmem:[#allocation3 + $0xf0] sm:$0xff] %vm1599_vm14, %v1842_v52  ;;  %v6069_v0 = vpack.c.bf16 %v2042_v55, %v2041_v62  ;;  %v2044_v63 = vld [vmem:[#allocation3 + $0xd0] sm:$0xff] }
 0x577   : > { %v6073_v8 = vpack.c.bf16 %v2044_v63, %v2043_v6 }
 0x578   : > { %6066 = vmatpush3.bf16.msra.mxu0 %v6065_v54  ;;  %v1961_v57 = vpop.permute.xlu0 %1960  ;;  %v2058_v58 = vld [vmem:[#allocation3 + $0x1b0] sm:$0xff] }
 0x579   : > { %1969 = vst.msk [vmem:[#allocation3 + $0x1f0] sm:$0xff] %vm1599_vm14, %v1961_v57  ;;  %v6067_v61 = vpack.c.bf16 %v2058_v58, %v2057_v56  ;;  %v2488_v58 = vld [vmem:[#allocation18 + $0x10] sm:$0xff] }
 0x57a   : > { %v6091_v4 = vpack.c.bf16 %v2489_v59, %v2488_v58 }
 0x57b   : > { %6068 = vmatprep.subr.bf16.mxu0 %v6067_v61 }
 0x57c   : > { %6070 = vmatpush3.bf16.msra.mxu0 %v6069_v0  ;;  %v1994_v7 = vpop.permute.xlu0 %1993 }
 0x57d   : > { %2004 = vst.msk [vmem:[#allocation3 + $0x210] sm:$0xff] %vm1599_vm14, %v1994_v7  ;;  %6072 = vmatprep.subr.bf16.mxu0 %v6071_v5  ;;  %v2046_v9 = vld [vmem:[#allocation3 + $0xf0] sm:$0xff]  ;;  %v2088_v5 = vpop.permute.xlu1 %2087 }
 0x57e   : > { %v6077_v16 = vpack.c.bf16 %v2046_v9, %v2045_v27  ;;  %v2490_v27 = vld [vmem:[#allocation18 + $0x20] sm:$0xff] }
 0x580   : > { %6074 = vmatpush3.bf16.msra.mxu0 %v6073_v8  ;;  %v1998_v11 = vpop.permute.xlu0 %1997  ;;  %v2062_v14 = vld [vmem:[#allocation3 + $0x1f0] sm:$0xff] }
 0x581   : > { %2006 = vst.msk [vmem:[#allocation3 + $0x230] sm:$0xff] %vm1599_vm14, %v1998_v11  ;;  %v6075_v15 = vpack.c.bf16 %v2062_v14, %v2061_v13 }
 0x583   : > { %6076 = vmatprep.subr.bf16.mxu0 %v6075_v15 }
 0x584   : > { %6078 = vmatpush3.bf16.msra.mxu0 %v6077_v16  ;;  %v2064_v45 = vld [vmem:[#allocation3 + $0x210] sm:$0xff]  ;;  %v2491_v16 = vld [vmem:[#allocation18 + $0x28] sm:$0xff] }
 0x585   : > { %v6079_v19 = vpack.c.bf16 %v2064_v45, %v2063_v18  ;;  %v6095_v18 = vpack.c.bf16 %v2491_v16, %v2490_v27 }
 0x587   : > { %2205 = vmatmul.mubr.f32.vlgmr.msra.gmra.mrb[8].mxu0 %v2007_v17  ;;  %6080 = vmatprep.subr.bf16.mxu1 %v6079_v19 }
 0x588   : > { %6082 = vmatpush3.bf16.msra.mxu1 %v6079_v19  ;;  %2209 = vmatprep.mubr.f32.mxu0 %v2011_v20  ;;  %v2066_v23 = vld [vmem:[#allocation3 + $0x230] sm:$0xff] }
 0x589   : > { %v6083_v24 = vpack.c.bf16 %v2066_v23, %v2065_v22 }
 0x58b   : > { %2210 = vmatmul.mubr.f32.gmra.mrb[10].mxu0 %v2010_v21  ;;  %6084 = vmatprep.subr.bf16.mxu1 %v6083_v24 }
 0x58c   : > { %6086 = vmatpush3.bf16.msra.mxu1 %v6083_v24  ;;  %2214 = vmatprep.mubr.f32.mxu0 %v2014_v25  ;;  %v2492_v24 = vld [vmem:[#allocation18 + $0x30] sm:$0xff]  ;;  %v2493_v25 = vld [vmem:[#allocation18 + $0x38] sm:$0xff] }
 0x58d   : > { %6088 = vmatprep.subr.bf16.mxu1 %v6087_v44 }
 0x58f   : > { %2215 = vmatmul.mubr.f32.gmra.mrb[12].mxu0 %v2013_v26  ;;  %5853 = vmatmul.mubr.msk.f32.vlgmr.msra.gmra.mrb[8].mxu1 %vm2115_vm15, %v2012_v28 }
 0x590   : > { %2219 = vmatprep.mubr.f32.mxu0 %v2017_v29  ;;  %5855 = vmatprep.mubr.msk.f32.mxu1 %vm2115_vm15, %v2015_v2  ;;  %v6099_v29 = vpack.c.bf16 %v2493_v25, %v2492_v24  ;;  %v2098_v2 = vpop.permute.xlu1 %2097 }
 0x591   : > { %6090 = vmatpush3.bf16.msra.mxu1 %v6087_v44  ;;  %v2083_v32 = vpop.permute.xlu0 %2082 }
 0x592   : > { %6092 = vmatprep.subr.bf16.mxu1 %v6091_v4 }
 0x593   : > { %2220 = vmatmul.mubr.f32.gmra.mrb[14].mxu0 %v2016_v30  ;;  %5856 = vmatmul.mubr.msk.f32.gmra.mrb[10].mxu1 %vm2115_vm15, %v2018_v3 }
 0x594   : > { %2224 = vmatprep.mubr.f32.mxu0 %v2020_v33  ;;  %5858 = vmatprep.mubr.msk.f32.mxu1 %vm2115_vm15, %v2021_v31 }
 0x595   : > { %6094 = vmatpush3.bf16.msra.mxu1 %v6091_v4  ;;  %v2093_v17 = vpop.permute.xlu0 %2092 }
 0x596   : > { %6096 = vmatprep.subr.bf16.mxu1 %v6095_v18 }
 0x597   : > { %2225 = vmatmul.mubr.f32.gmra.mrb[16].mxu0 %v2019_v10  ;;  %5859 = vmatmul.mubr.msk.f32.gmra.mrb[12].mxu1 %vm2115_vm15, %v2024_v35 }
 0x598   : > { %2229 = vmatprep.mubr.f32.mxu0 %v2023_v34  ;;  %5861 = vmatprep.mubr.msk.f32.mxu1 %vm2115_vm15, %v2027_v36 }
 0x599   : > { %6098 = vmatpush3.bf16.msra.mxu1 %v6095_v18 }
 0x59a   : > { %6100 = vmatprep.subr.bf16.mxu1 %v6099_v29 }
 0x59b   : > { %2230 = vmatmul.mubr.f32.gmra.mrb[18].mxu0 %v2022_v37  ;;  %5862 = vmatmul.mubr.msk.f32.gmra.mrb[14].mxu1 %vm2115_vm15, %v2030_v12 }
 0x59c   : > { %2234 = vmatprep.mubr.f32.mxu0 %v2026_v60  ;;  %v2103_v60 = vpop.permute.xlu0 %2102 }
 0x59d   : > { %6102 = vmatpush3.bf16.msra.mxu1 %v6099_v29 }
 0x59f   : > { %2235 = vmatmul.mubr.f32.gmra.mrb[20].mxu0 %v2025_v38 }
 0x5a0   : > { %2239 = vmatprep.mubr.f32.mxu0 %v2029_v39 }
 0x5a3   : > { %2240 = vmatmul.mubr.f32.gmra.mrb[22].mxu0 %v2028_v40 }
 0x65a   : > { %v5627_v46 = vpop.f32.mrb[8].mxu0 }
 0x65b   : > { %v5628_v47 = vpop.f32.mrb[9].mxu0 }
 0x65c   : > { %v5629_v48 = vadd.f32 %v5628_v47, %v5627_v46  ;;  %v2108_v47 = vpop.permute.xlu1 %2107 }
 0x65e   : > { %v5630_v49 = vpop.f32.mrb[10].mxu0  ;;  %v2207_v55 = vadd.f32 %v5629_v48, %v2078_v50 }
 0x65f   : > { %v5631_v51 = vpop.f32.mrb[11].mxu0 }
 0x660   : > { %v5632_v43 = vadd.f32 %v5631_v51, %v5630_v49 }
 0x662   : > { %v5633_v52 = vpop.f32.mrb[12].mxu0  ;;  %v2212_v53 = vadd.f32 %v5632_v43, %v2083_v32  ;;  %v5854_v54 = vpop.f32.mrb[8].mxu1 }
 0x663   : > { %v5634_v57 = vpop.f32.mrb[13].mxu0  ;;  %v2311_v56 = vpop.f32.mrb[9].mxu1 }
 0x664   : > { %v7846_v61 = vadd.f32 %v5854_v54, %v2212_v53  ;;  %v5635_v62 = vadd.f32 %v5634_v57, %v5633_v52  ;;  %v7848_v0 = vadd.f32 %v2311_v56, %v2207_v55  ;;  %v2113_v53 = vpop.permute.xlu0 %2112 }
 0x666   : > { %v2351_v63 = vmax.f32 %v7846_v61, 0.0  ;;  %v2350_v7 = vmax.f32 %v7848_v0, 0.0  ;;  %v5636_v6 = vpop.f32.mrb[14].mxu0  ;;  %v5857_v8 = vpop.f32.mrb[10].mxu1  ;;  %v2217_v9 = vadd.f32 %v5635_v62, %v2088_v5  ;;  %v5516_v5 = vld [vmem:[#allocation15 + $0x2] ss:$0 sm:$0xff] }
 0x667   : > { %v5637_v11 = vpop.f32.mrb[15].mxu0  ;;  %v2321_v13 = vpop.f32.mrb[11].mxu1 }
 0x668   : > { %2367 = vst.msk [vmem:[#allocation2 + $0x20] sm:$0xff] %vm1599_vm14, %v2351_v63  ;;  %2366 = vst.msk [vmem:[#allocation2] sm:$0xff] %vm1599_vm14, %v2350_v7  ;;  %v5638_v14 = vadd.f32 %v5637_v11, %v5636_v6  ;;  %v7858_v15 = vadd.f32 %v2321_v13, %v2217_v9  ;;  %v5514_v6 = vld [vmem:[#allocation15] ss:$0 sm:$0xff]  ;;  %v5515_v9 = vld [vmem:[#allocation15 + $0x1] ss:$0 sm:$0xff] }
 0x669   : > { %v5520_v11 = vld [vmem:[#allocation15 + $0x7] ss:$0 sm:$0xff]  ;;  %v5519_v13 = vld [vmem:[#allocation15 + $0x6] ss:$0 sm:$0xff] }
 0x66a   : > { %v2222_v45 = vadd.f32 %v5638_v14, %v2093_v17  ;;  %v2352_v19 = vmax.f32 %v7858_v15, 0.0  ;;  %v5639_v20 = vpop.f32.mrb[16].mxu0  ;;  %v5860_v21 = vpop.f32.mrb[12].mxu1  ;;  %v5518_v14 = vld [vmem:[#allocation15 + $0x5] ss:$0 sm:$0xff] }
 0x66b   : > { %v5640_v22 = vpop.f32.mrb[17].mxu0  ;;  %v2331_v23 = vpop.f32.mrb[13].mxu1 }
 0x66c   : > { %v7861_v26 = vadd.f32 %v5857_v8, %v2222_v45  ;;  %2368 = vst.msk [vmem:[#allocation2 + $0x40] sm:$0xff] %vm1599_vm14, %v2352_v19  ;;  %v5641_v28 = vadd.f32 %v5640_v22, %v5639_v20  ;;  %v5517_v8 = vld [vmem:[#allocation15 + $0x3] ss:$0 sm:$0xff] }
 0x66e   : > { %v2353_v30 = vmax.f32 %v7861_v26, 0.0  ;;  %v5642_v3 = vpop.f32.mrb[18].mxu0  ;;  %v2227_v33 = vadd.f32 %v5641_v28, %v2098_v2  ;;  %v5863_v31 = vpop.f32.mrb[14].mxu1 }
 0x66f   : > { %v5643_v10 = vpop.f32.mrb[19].mxu0  ;;  %v2374_v35 = vld [vmem:[#allocation2] sm:$0xff]  ;;  %v2341_v36 = vpop.f32.mrb[15].mxu1 }
 0x670   : > { %v2375_v34 = vld [vmem:[#allocation2 + $0x20] sm:$0xff]  ;;  %2369 = vst.msk [vmem:[#allocation2 + $0x60] sm:$0xff] %vm1599_vm14, %v2353_v30  ;;  %v5644_v37 = vadd.f32 %v5643_v10, %v5642_v3  ;;  %v7870_v12 = vadd.f32 %v2331_v23, %v2227_v33  ;;  %2454 = vrot.lane.b32.xlu0 %v2374_v35, %s6900_s3  ;;  %2390 = vrot.lane.b32.xlu1 %v2374_v35, %s6891_s2 }
 0x671   : > { %2624 = vst.msk [vmem:[#allocation2] sm:$0xff] %vm2623_vm3, %v6890_v1  ;;  %2625 = vst.msk [vmem:[#allocation2 + $0x20] sm:$0xff] %vm2623_vm3, %v6890_v1 }
 0x672   : > { %v2232_v38 = vadd.f32 %v5644_v37, %v2103_v60  ;;  %v2354_v39 = vmax.f32 %v7870_v12, 0.0  ;;  %v5645_v40 = vpop.f32.mrb[20].mxu0 }
 0x673   : > { %v5646_v41 = vpop.f32.mrb[21].mxu0  ;;  %v2376_v42 = vld [vmem:[#allocation2 + $0x40] sm:$0xff] }
 0x674   : > { %v7879_v44 = vadd.f32 %v5860_v21, %v2232_v38  ;;  %2370 = vst.msk [vmem:[#allocation2 + $0x80] sm:$0xff] %vm1599_vm14, %v2354_v39  ;;  %v5647_v46 = vadd.f32 %v5646_v41, %v5645_v40  ;;  %2422 = vrot.lane.b32.xlu1 %v2374_v35, %s6901_s9  ;;  %2392 = vrot.lane.b32.xlu0 %v2375_v34, %s6891_s2 }
 0x675   : > { %2626 = vst.msk [vmem:[#allocation2 + $0x40] sm:$0xff] %vm2623_vm3, %v6890_v1 }
 0x676   : > { %v2355_v48 = vmax.f32 %v7879_v44, 0.0  ;;  %v5648_v49 = vpop.f32.mrb[22].mxu0  ;;  %v2237_v50 = vadd.f32 %v5647_v46, %v2108_v47 }
 0x677   : > { %v5649_v51 = vpop.f32.mrb[23].mxu0  ;;  %v2377_v43 = vld [vmem:[#allocation2 + $0x60] sm:$0xff] }
 0x678   : > { %2371 = vst.msk [vmem:[#allocation2 + $0xa0] sm:$0xff] %vm1599_vm14, %v2355_v48  ;;  %v5650_v32 = vadd.f32 %v5649_v51, %v5648_v49  ;;  %v7892_v52 = vadd.f32 %v2341_v36, %v2237_v50  ;;  %2394 = vrot.lane.b32.xlu1 %v2376_v42, %s6891_s2  ;;  %2424 = vrot.lane.b32.xlu0 %v2375_v34, %s6901_s9 }
 0x679   : > { %2627 = vst.msk [vmem:[#allocation2 + $0x60] sm:$0xff] %vm2623_vm3, %v6890_v1 }
 0x67a   : > { %v2242_v54 = vadd.f32 %v5650_v32, %v2113_v53  ;;  %v2356_v55 = vmax.f32 %v7892_v52, 0.0 }
 0x67b   : > { %v2378_v57 = vld [vmem:[#allocation2 + $0x80] sm:$0xff] }
 0x67c   : > { %v7899_v56 = vadd.f32 %v5863_v31, %v2242_v54  ;;  %2372 = vst.msk [vmem:[#allocation2 + $0xc0] sm:$0xff] %vm1599_vm14, %v2356_v55  ;;  %2426 = vrot.lane.b32.xlu1 %v2376_v42, %s6901_s9  ;;  %2456 = vrot.lane.b32.xlu0 %v2375_v34, %s6900_s3 }
 0x67d   : > { %2628 = vst.msk [vmem:[#allocation2 + $0x80] sm:$0xff] %vm2623_vm3, %v6890_v1 }
 0x67e   : > { %v2357_v58 = vmax.f32 %v7899_v56, 0.0 }
 0x67f   : > { %v2379_v59 = vld [vmem:[#allocation2 + $0xa0] sm:$0xff] }
 0x680   : > { %2373 = vst.msk [vmem:[#allocation2 + $0xe0] sm:$0xff] %vm1599_vm14, %v2357_v58  ;;  %2458 = vrot.lane.b32.xlu0 %v2376_v42, %s6900_s3  ;;  %2396 = vrot.lane.b32.xlu1 %v2377_v43, %s6891_s2 }
 0x681   : > { %2629 = vst.msk [vmem:[#allocation2 + $0xa0] sm:$0xff] %vm2623_vm3, %v6890_v1 }
 0x683   : > { %v2380_v62 = vld [vmem:[#allocation2 + $0xc0] sm:$0xff] }
 0x684   : > { %2428 = vrot.lane.b32.xlu0 %v2377_v43, %s6901_s9  ;;  %2398 = vrot.lane.b32.xlu1 %v2378_v57, %s6891_s2  ;;  %2630 = vst.msk [vmem:[#allocation2 + $0xc0] sm:$0xff] %vm2623_vm3, %v6890_v1 }
 0x687   : > { %v2381_v4 = vld [vmem:[#allocation2 + $0xe0] sm:$0xff] }
 0x688   : > { %2460 = vrot.lane.b32.xlu0 %v2377_v43, %s6900_s3  ;;  %2430 = vrot.lane.b32.xlu1 %v2378_v57, %s6901_s9  ;;  %2631 = vst.msk [vmem:[#allocation2 + $0xe0] sm:$0xff] %vm2623_vm3, %v6890_v1 }
 0x68c   : > { %2462 = vrot.lane.b32.xlu0 %v2378_v57, %s6900_s3  ;;  %2400 = vrot.lane.b32.xlu1 %v2379_v59, %s6891_s2  ;;  %v2877_v57 = vld [vmem:[#allocation2] sm:$0xff] }
 0x690   : > { %2432 = vrot.lane.b32.xlu0 %v2379_v59, %s6901_s9  ;;  %2402 = vrot.lane.b32.xlu1 %v2380_v62, %s6891_s2 }
 0x694   : > { %2464 = vrot.lane.b32.xlu0 %v2379_v59, %s6900_s3  ;;  %2434 = vrot.lane.b32.xlu1 %v2380_v62, %s6901_s9 }
 0x698   : > { %2436 = vrot.lane.b32.xlu0 %v2381_v4, %s6901_s9  ;;  %2404 = vrot.lane.b32.xlu1 %v2381_v4, %s6891_s2 }
 0x69c   : > { %2468 = vrot.lane.b32.xlu0 %v2381_v4, %s6900_s3  ;;  %2466 = vrot.lane.b32.xlu1 %v2380_v62, %s6900_s3  ;;  %s6910_s3 = smov 3   ;;  %v2879_v62 = vld [vmem:[#allocation2 + $0x20] sm:$0xff] }
 0x6a0   : > { %2899 = vrot.lane.b32.xlu1 %v5516_v5, %s6906_s28  ;;  %2671 = vrot.lane.b32.xlu0 %v5514_v6, %s6907_s22 }
 0x6a4   : > { %3013 = vrot.lane.b32.xlu1 %v5517_v8, %s6891_s2  ;;  %2785 = vrot.lane.b32.xlu0 %v5515_v9, %s6908_s23 }
 0x6a8   : > { %3264 = vrot.lane.b32.xlu0 %v5520_v11, %s6909_s1  ;;  %3199 = vrot.lane.b32.xlu1 %v5519_v13, %s6910_s3  ;;  %v2881_v13 = vld [vmem:[#allocation2 + $0x40] sm:$0xff] }
 0x6ac   : > { %3134 = vrot.lane.b32.xlu1 %v5518_v14, %s6895_s0 }
 0x6e2   : > { %v2391_v27 = vpop.permute.xlu1 %2390  ;;  %v2455_v16 = vpop.permute.xlu0 %2454 }
 0x6e3   : > { %v2414_v17 = vmax.f32 %v2350_v7, %v2391_v27 }
 0x6e6   : > { %v2423_v18 = vpop.permute.xlu1 %2422  ;;  %v2393_v45 = vpop.permute.xlu0 %2392 }
 0x6e7   : > { %v2446_v20 = vmax.f32 %v2414_v17, %v2423_v18  ;;  %v2415_v24 = vmax.f32 %v2351_v63, %v2393_v45 }
 0x6e9   : > { %v2478_v21 = vmax.f32 %v2446_v20, %v2455_v16  ;;  %v2883_v16 = vld [vmem:[#allocation2 + $0x60] sm:$0xff] }
 0x6ea   : > { %v2395_v22 = vpop.permute.xlu1 %2394  ;;  %v2425_v23 = vpop.permute.xlu0 %2424 }
 0x6eb   : > { %5880 = vmatprep.mubr.msk.f32.mxu1 %vm1599_vm14, %v2478_v21  ;;  %v2447_v25 = vmax.f32 %v2415_v24, %v2425_v23  ;;  %v2416_v2 = vmax.f32 %v2352_v19, %v2395_v22  ;;  %v2885_v23 = vld [vmem:[#allocation2 + $0x80] sm:$0xff] }
 0x6ee   : > { %v2427_v28 = vpop.permute.xlu1 %2426  ;;  %v2457_v29 = vpop.permute.xlu0 %2456 }
 0x6ef   : > { %v2479_v3 = vmax.f32 %v2447_v25, %v2457_v29  ;;  %v2448_v0 = vmax.f32 %v2416_v2, %v2427_v28 }
 0x6f1   : > { %5881 = vmatmul.mubr.msk.f32.vlgmr.msra.gmra.mrb[16].mxu1 %vm1599_vm14, %v2479_v3  ;;  %v5521_v3 = vld [vmem:[#allocation15 + $0x8] ss:$0 sm:$0xff] }
 0x6f2   : > { %v2397_v7 = vpop.permute.xlu1 %2396  ;;  %v2459_v33 = vpop.permute.xlu0 %2458 }
 0x6f3   : > { %v2480_v31 = vmax.f32 %v2448_v0, %v2459_v33  ;;  %v2417_v63 = vmax.f32 %v2353_v30, %v2397_v7  ;;  %v3001_v0 = vld [vmem:[#allocation2 + $0xa0] sm:$0xff] }
 0x6f5   : > { %5883 = vmatprep.mubr.msk.f32.mxu1 %vm1599_vm14, %v2480_v31 }
 0x6f6   : > { %v2399_v10 = vpop.permute.xlu1 %2398  ;;  %v2429_v61 = vpop.permute.xlu0 %2428 }
 0x6f7   : > { %v2449_v35 = vmax.f32 %v2417_v63, %v2429_v61  ;;  %v2418_v15 = vmax.f32 %v2354_v39, %v2399_v10  ;;  %v8020_v61 = vld [vmem:[#allocation2 + $0xc0] sm:$0xff] }
 0x6fa   : > { %v2431_v34 = vpop.permute.xlu1 %2430  ;;  %v2461_v36 = vpop.permute.xlu0 %2460 }
 0x6fb   : > { %v2481_v19 = vmax.f32 %v2449_v35, %v2461_v36  ;;  %v2450_v37 = vmax.f32 %v2418_v15, %v2431_v34  ;;  %v8040_v36 = vld [vmem:[#allocation2 + $0xe0] sm:$0xff] }
 0x6fd   : > { %5884 = vmatmul.mubr.msk.f32.gmra.mrb[18].mxu1 %vm1599_vm14, %v2481_v19 }
 0x6fe   : > { %v2401_v60 = vpop.permute.xlu1 %2400  ;;  %v2463_v38 = vpop.permute.xlu0 %2462 }
 0x6ff   : > { %v2482_v40 = vmax.f32 %v2450_v37, %v2463_v38  ;;  %v2419_v26 = vmax.f32 %v2355_v48, %v2401_v60 }
 0x701   : > { %5886 = vmatprep.mubr.msk.f32.mxu1 %vm1599_vm14, %v2482_v40 }
 0x702   : > { %v2403_v41 = vpop.permute.xlu1 %2402  ;;  %v2433_v42 = vpop.permute.xlu0 %2432 }
 0x703   : > { %v2451_v30 = vmax.f32 %v2419_v26, %v2433_v42  ;;  %v2420_v50 = vmax.f32 %v2356_v55, %v2403_v41 }
 0x706   : > { %v2435_v46 = vpop.permute.xlu1 %2434  ;;  %v2465_v47 = vpop.permute.xlu0 %2464 }
 0x707   : > { %v2483_v49 = vmax.f32 %v2451_v30, %v2465_v47  ;;  %v2452_v43 = vmax.f32 %v2420_v50, %v2435_v46 }
 0x709   : > { %5887 = vmatmul.mubr.msk.f32.gmra.mrb[20].mxu1 %vm1599_vm14, %v2483_v49 }
 0x70a   : > { %v2405_v12 = vpop.permute.xlu1 %2404  ;;  %v2437_v39 = vpop.permute.xlu0 %2436 }
 0x70b   : > { %v2421_v51 = vmax.f32 %v2357_v58, %v2405_v12 }
 0x70d   : > { %v2453_v32 = vmax.f32 %v2421_v51, %v2437_v39 }
 0x70e   : > { %v2467_v53 = vpop.permute.xlu1 %2466  ;;  %v2469_v54 = vpop.permute.xlu0 %2468 }
 0x70f   : > { %v2484_v44 = vmax.f32 %v2452_v43, %v2467_v53  ;;  %v2485_v48 = vmax.f32 %v2453_v32, %v2469_v54 }
 0x711   : > { %5889 = vmatprep.mubr.msk.f32.mxu1 %vm1599_vm14, %v2484_v44 }
 0x712   : > { %5890 = vmatmul.mubr.msk.f32.gmra.mrb[22].mxu1 %vm1599_vm14, %v2485_v48  ;;  %v7965_v59 = vpop.permute.xlu1 %2899  ;;  %v7970_v56 = vpop.permute.xlu0 %2671 }
 0x713   : > { %v2902_v52 = vmul.f32 %v7965_v59, %v2877_v57  ;;  %v2904_v55 = vmul.f32 %v7965_v59, %v2879_v62  ;;  %v2674_v5 = vmul.f32 %v2877_v57, %v7970_v56  ;;  %v2676_v9 = vmul.f32 %v2879_v62, %v7970_v56 }
 0x714   : > { %v2906_v14 = vmul.f32 %v7965_v59, %v2881_v13  ;;  %v2908_v17 = vmul.f32 %v7965_v59, %v2883_v16  ;;  %v2678_v45 = vmul.f32 %v2881_v13, %v7970_v56  ;;  %v2680_v21 = vmul.f32 %v2883_v16, %v7970_v56 }
 0x715   : > { %2934 = vrot.lane.b32.xlu0 %v2902_v52, %s6910_s3  ;;  %v2910_v24 = vmul.f32 %v7965_v59, %v2885_v23  ;;  %v2682_v28 = vmul.f32 %v2885_v23, %v7970_v56  ;;  %v2912_v33 = vmul.f32 %v3001_v0, %v7965_v59  ;;  %v2684_v10 = vmul.f32 %v3001_v0, %v7970_v56 }
 0x716   : > { %v7972_v58 = vpop.permute.xlu1 %3013  ;;  %v7979_v8 = vpop.permute.xlu0 %2785  ;;  %v2914_v63 = vmul.f32 %v7965_v59, %v8020_v61  ;;  %v2686_v35 = vmul.f32 %v8020_v61, %v7970_v56  ;;  %v2916_v15 = vmul.f32 %v7965_v59, %v8040_v36  ;;  %v2688_v19 = vmul.f32 %v8040_v36, %v7970_v56 }
 0x717   : > { %v3016_v4 = vmul.f32 %v7972_v58, %v2877_v57  ;;  %v3018_v6 = vmul.f32 %v7972_v58, %v2879_v62  ;;  %v2788_v11 = vmul.f32 %v2877_v57, %v7979_v8  ;;  %v2790_v27 = vmul.f32 %v2879_v62, %v7979_v8 }
 0x718   : > { %v3020_v18 = vmul.f32 %v7972_v58, %v2881_v13  ;;  %v3022_v20 = vmul.f32 %v7972_v58, %v2883_v16  ;;  %v2792_v22 = vmul.f32 %v2881_v13, %v7979_v8  ;;  %v2794_v25 = vmul.f32 %v2883_v16, %v7979_v8 }
 0x719   : > { %2938 = vrot.lane.b32.xlu0 %v2904_v55, %s6910_s3  ;;  %3048 = vrot.lane.b32.xlu1 %v3016_v4, %s6895_s0  ;;  %v3024_v29 = vmul.f32 %v7972_v58, %v2885_v23  ;;  %v2796_v2 = vmul.f32 %v2885_v23, %v7979_v8  ;;  %v3026_v7 = vmul.f32 %v7972_v58, %v3001_v0 }
 0x71a   : > { %v2798_v31 = vmul.f32 %v3001_v0, %v7979_v8  ;;  %v3028_v34 = vmul.f32 %v7972_v58, %v8020_v61  ;;  %v3030_v37 = vmul.f32 %v7972_v58, %v8040_v36  ;;  %v8054_v40 = vpop.permute.xlu1 %3199 }
 0x71d   : > { %2706 = vrot.lane.b32.xlu0 %v2674_v5, %s6911_s12  ;;  %3052 = vrot.lane.b32.xlu1 %v3018_v6, %s6895_s0 }
 0x71e   : > { %v8070_v47 = vpop.permute.xlu1 %3134 }
 0x721   : > { %2710 = vrot.lane.b32.xlu0 %v2676_v9, %s6911_s12  ;;  %2820 = vrot.lane.b32.xlu1 %v2788_v11, %s6909_s1 }
 0x725   : > { %2942 = vrot.lane.b32.xlu0 %v2906_v14, %s6910_s3  ;;  %2824 = vrot.lane.b32.xlu1 %v2790_v27, %s6909_s1 }
 0x729   : > { %2946 = vrot.lane.b32.xlu0 %v2908_v17, %s6910_s3  ;;  %3056 = vrot.lane.b32.xlu1 %v3020_v18, %s6895_s0 }
 0x72d   : > { %2714 = vrot.lane.b32.xlu0 %v2678_v45, %s6911_s12  ;;  %3060 = vrot.lane.b32.xlu1 %v3022_v20, %s6895_s0 }
 0x731   : > { %2718 = vrot.lane.b32.xlu0 %v2680_v21, %s6911_s12  ;;  %2828 = vrot.lane.b32.xlu1 %v2792_v22, %s6909_s1 }
 0x735   : > { %2950 = vrot.lane.b32.xlu0 %v2910_v24, %s6910_s3  ;;  %2832 = vrot.lane.b32.xlu1 %v2794_v25, %s6909_s1  ;;  %v8160_v25 = vpop.permute.xlu0 %3264 }
 0x739   : > { %2722 = vrot.lane.b32.xlu0 %v2682_v28, %s6911_s12  ;;  %3064 = vrot.lane.b32.xlu1 %v3024_v29, %s6895_s0 }
 0x73d   : > { %3329 = vrot.lane.b32.xlu0 %v5521_v3, %s6911_s12  ;;  %2836 = vrot.lane.b32.xlu1 %v2796_v2, %s6909_s1 }
 0x741   : > { %3068 = vrot.lane.b32.xlu1 %v3026_v7, %s6895_s0  ;;  %2954 = vrot.lane.b32.xlu0 %v2912_v33, %s6910_s3 }
 0x745   : > { %2840 = vrot.lane.b32.xlu1 %v2798_v31, %s6909_s1  ;;  %2726 = vrot.lane.b32.xlu0 %v2684_v10, %s6911_s12 }
 0x749   : > { %2958 = vrot.lane.b32.xlu1 %v2914_v63, %s6910_s3 }
 0x74d   : > { %2730 = vrot.lane.b32.xlu1 %v2686_v35, %s6911_s12 }
 0x751   : > { %3072 = vrot.lane.b32.xlu1 %v3028_v34, %s6895_s0  ;;  %v2800_v34 = vmul.f32 %v8020_v61, %v7979_v8 }
 0x755   : > { %2962 = vrot.lane.b32.xlu1 %v2916_v15, %s6910_s3 }
 0x759   : > { %2734 = vrot.lane.b32.xlu1 %v2688_v19, %s6911_s12 }
 0x75d   : > { %3076 = vrot.lane.b32.xlu1 %v3030_v37, %s6895_s0  ;;  %v2802_v37 = vmul.f32 %v8040_v36, %v7979_v8 }
 0x787   : > { %v8174_v7 = vpop.permute.xlu0 %2934 }
 0x78b   : > { %v8084_v43 = vpop.permute.xlu1 %3048  ;;  %v8186_v63 = vpop.permute.xlu0 %2938 }
 0x78f   : > { %v8102_v57 = vpop.permute.xlu1 %3052 }
 0x793   : > { %v8116_v6 = vpop.permute.xlu1 %2820 }
 0x797   : > { %v8136_v17 = vpop.permute.xlu1 %2824 }
 0x79b   : > { %v8154_v24 = vpop.permute.xlu1 %3056 }
 0x79f   : > { %v8168_v2 = vpop.permute.xlu1 %3060 }
 0x7a3   : > { %v8182_v10 = vpop.permute.xlu1 %2828 }
 0x7a7   : > { %v8194_v15 = vpop.permute.xlu1 %2832 }
 0x7c4   : > { %v5882_v60 = vpop.f32.mrb[16].mxu1 }
 0x7c5   : > { %2642 = vst.msk [vmem:[#allocation2 + $0x28] sm:$0xff] %vm873_vm9, %v5882_v60  ;;  %v2584_v38 = vpop.f32.mrb[17].mxu1  ;;  %v8200_v60 = vpop.permute.xlu0 %2706 }
 0x7c6   : > { %2641 = vst.msk [vmem:[#allocation2 + $0x8] sm:$0xff] %vm873_vm9, %v2584_v38 }
 0x7cc   : > { %v8056_v41 = vld [vmem:[#allocation2 + $0x28] sm:$0xff] }
 0x7cd   : > { %3113 = vst.msk [vmem:[#allocation3 + $0x210] sm:$0xff] %vm873_vm9, %v8056_v41  ;;  %v8060_v42 = vld [vmem:[#allocation2 + $0x8] sm:$0xff]  ;;  %v3019_v26 = vmul.f32 %v8056_v41, %v7972_v58  ;;  %v2905_v30 = vmul.f32 %v8056_v41, %v7965_v59  ;;  %v2791_v12 = vmul.f32 %v8056_v41, %v7979_v8  ;;  %v2677_v39 = vmul.f32 %v8056_v41, %v7970_v56 }
 0x7ce   : > { %3112 = vst.msk [vmem:[#allocation3 + $0x200] sm:$0xff] %vm873_vm9, %v8060_v42  ;;  %v3017_v50 = vmul.f32 %v8060_v42, %v7972_v58  ;;  %v2903_v51 = vmul.f32 %v8060_v42, %v7965_v59  ;;  %v2789_v54 = vmul.f32 %v8060_v42, %v7979_v8  ;;  %v2675_v44 = vmul.f32 %v8060_v42, %v7970_v56 }
 0x7cf   : > { %3054 = vrot.lane.b32.xlu0 %v3019_v26, %s6895_s0  ;;  %2940 = vrot.lane.b32.xlu1 %v2905_v30, %s6910_s3  ;;  %v3203_v3 = vmul.f32 %v8054_v40, %v8056_v41  ;;  %v3202_v38 = vmul.f32 %v8054_v40, %v8060_v42  ;;  %v8208_v26 = vpop.permute.xlu1 %3064  ;;  %v8212_v30 = vpop.permute.xlu0 %2710 }
 0x7d0   : > { %v5885_v46 = vpop.f32.mrb[18].mxu1 }
 0x7d1   : > { %2644 = vst.msk [vmem:[#allocation2 + $0x68] sm:$0xff] %vm873_vm9, %v5885_v46  ;;  %v2594_v49 = vpop.f32.mrb[19].mxu1 }
 0x7d2   : > { %2643 = vst.msk [vmem:[#allocation2 + $0x48] sm:$0xff] %vm873_vm9, %v2594_v49 }
 0x7d3   : > { %2826 = vrot.lane.b32.xlu0 %v2791_v12, %s6909_s1  ;;  %2712 = vrot.lane.b32.xlu1 %v2677_v39, %s6911_s12  ;;  %v8220_v49 = vpop.permute.xlu1 %2836 }
 0x7d7   : > { %3050 = vrot.lane.b32.xlu0 %v3017_v50, %s6895_s0  ;;  %2936 = vrot.lane.b32.xlu1 %v2903_v51, %s6910_s3  ;;  %v8226_v50 = vpop.permute.xlu0 %2942 }
 0x7d8   : > { %v8088_v32 = vld [vmem:[#allocation2 + $0x68] sm:$0xff] }
 0x7d9   : > { %3115 = vst.msk [vmem:[#allocation3 + $0x230] sm:$0xff] %vm873_vm9, %v8088_v32  ;;  %v8092_v53 = vld [vmem:[#allocation2 + $0x48] sm:$0xff]  ;;  %v3023_v52 = vmul.f32 %v8088_v32, %v7972_v58  ;;  %v2909_v55 = vmul.f32 %v8088_v32, %v7965_v59  ;;  %v2795_v4 = vmul.f32 %v8088_v32, %v7979_v8  ;;  %v2681_v5 = vmul.f32 %v8088_v32, %v7970_v56 }
 0x7da   : > { %3114 = vst.msk [vmem:[#allocation3 + $0x220] sm:$0xff] %vm873_vm9, %v8092_v53  ;;  %v3021_v14 = vmul.f32 %v8092_v53, %v7972_v58  ;;  %v2907_v27 = vmul.f32 %v8092_v53, %v7965_v59  ;;  %v2793_v18 = vmul.f32 %v8092_v53, %v7979_v8  ;;  %v2679_v45 = vmul.f32 %v8092_v53, %v7970_v56 }
 0x7db   : > { %2822 = vrot.lane.b32.xlu0 %v2789_v54, %s6909_s1  ;;  %2708 = vrot.lane.b32.xlu1 %v2675_v44, %s6911_s12  ;;  %v3204_v46 = vmul.f32 %v8054_v40, %v8092_v53  ;;  %v3267_v54 = vmul.f32 %v8160_v25, %v8060_v42  ;;  %v8234_v44 = vpop.permute.xlu1 %3068 }
 0x7dc   : > { %v5888_v48 = vpop.f32.mrb[20].mxu1 }
 0x7dd   : > { %2646 = vst.msk [vmem:[#allocation2 + $0xa8] sm:$0xff] %vm873_vm9, %v5888_v48  ;;  %v2604_v62 = vpop.f32.mrb[21].mxu1  ;;  %v8238_v48 = vpop.permute.xlu0 %2946 }
 0x7de   : > { %2645 = vst.msk [vmem:[#allocation2 + $0x88] sm:$0xff] %vm873_vm9, %v2604_v62 }
 0x7df   : > { %3062 = vrot.lane.b32.xlu0 %v3023_v52, %s6895_s0  ;;  %2948 = vrot.lane.b32.xlu1 %v2909_v55, %s6910_s3  ;;  %v3137_v52 = vmul.f32 %v8070_v47, %v8060_v42  ;;  %v3205_v55 = vmul.f32 %v8054_v40, %v8088_v32 }
 0x7e3   : > { %2834 = vrot.lane.b32.xlu0 %v2795_v4, %s6909_s1  ;;  %2720 = vrot.lane.b32.xlu1 %v2681_v5, %s6911_s12  ;;  %v3269_v4 = vmul.f32 %v8160_v25, %v8092_v53  ;;  %v8252_v5 = vpop.permute.xlu0 %2714 }
 0x7e4   : > { %v8120_v9 = vld [vmem:[#allocation2 + $0xa8] sm:$0xff] }
 0x7e5   : > { %3117 = vst.msk [vmem:[#allocation3 + $0x250] sm:$0xff] %vm873_vm9, %v8120_v9  ;;  %v8124_v11 = vld [vmem:[#allocation2 + $0x88] sm:$0xff]  ;;  %v5891_v13 = vpop.f32.mrb[22].mxu1  ;;  %v3027_v21 = vmul.f32 %v8120_v9, %v7972_v58  ;;  %v2913_v22 = vmul.f32 %v8120_v9, %v7965_v59  ;;  %v2799_v28 = vmul.f32 %v8120_v9, %v7979_v8  ;;  %v2685_v29 = vmul.f32 %v8120_v9, %v7970_v56 }
 0x7e6   : > { %3116 = vst.msk [vmem:[#allocation3 + $0x240] sm:$0xff] %vm873_vm9, %v8124_v11  ;;  %2648 = vst.msk [vmem:[#allocation2 + $0xe8] sm:$0xff] %vm873_vm9, %v5891_v13  ;;  %v2614_v16 = vpop.f32.mrb[23].mxu1  ;;  %v2911_v0 = vmul.f32 %v8124_v11, %v7965_v59  ;;  %v3025_v33 = vmul.f32 %v8124_v11, %v7972_v58  ;;  %v2683_v31 = vmul.f32 %v8124_v11, %v7970_v56 }
 0x7e7   : > { %2647 = vst.msk [vmem:[#allocation2 + $0xc8] sm:$0xff] %vm873_vm9, %v2614_v16  ;;  %3058 = vrot.lane.b32.xlu0 %v3021_v14, %s6895_s0  ;;  %2944 = vrot.lane.b32.xlu1 %v2907_v27, %s6910_s3  ;;  %v2797_v35 = vmul.f32 %v8124_v11, %v7979_v8  ;;  %v3206_v39 = vmul.f32 %v8054_v40, %v8124_v11  ;;  %v8264_v27 = vpop.permute.xlu0 %2718 }
 0x7eb   : > { %2830 = vrot.lane.b32.xlu0 %v2793_v18, %s6909_s1  ;;  %2716 = vrot.lane.b32.xlu1 %v2679_v45, %s6911_s12  ;;  %v3139_v18 = vmul.f32 %v8070_v47, %v8092_v53 }
 0x7ed   : > { %v8144_v20 = vld [vmem:[#allocation2 + $0xe8] sm:$0xff] }
 0x7ee   : > { %3119 = vst.msk [vmem:[#allocation3 + $0x270] sm:$0xff] %vm873_vm9, %v8144_v20  ;;  %v8152_v23 = vld [vmem:[#allocation2 + $0xc8] sm:$0xff]  ;;  %v2917_v19 = vmul.f32 %v8144_v20, %v7965_v59  ;;  %v2689_v61 = vmul.f32 %v8144_v20, %v7970_v56  ;;  %v3031_v36 = vmul.f32 %v8144_v20, %v7972_v58  ;;  %v2803_v12 = vmul.f32 %v8144_v20, %v7979_v8 }
 0x7ef   : > { %3118 = vst.msk [vmem:[#allocation3 + $0x260] sm:$0xff] %vm873_vm9, %v8152_v23  ;;  %3070 = vrot.lane.b32.xlu0 %v3027_v21, %s6895_s0  ;;  %2956 = vrot.lane.b32.xlu1 %v2913_v22, %s6910_s3  ;;  %v2915_v51 = vmul.f32 %v8152_v23, %v7965_v59  ;;  %v2687_v62 = vmul.f32 %v8152_v23, %v7970_v56  ;;  %v8246_v59 = vpop.permute.xlu1 %2840 }
 0x7f0   : > { %v3207_v56 = vmul.f32 %v8054_v40, %v8120_v9  ;;  %v3208_v13 = vmul.f32 %v8054_v40, %v8152_v23  ;;  %v3029_v16 = vmul.f32 %v8152_v23, %v7972_v58  ;;  %v2801_v21 = vmul.f32 %v8152_v23, %v7979_v8  ;;  %v3381_v58 = vld [vmem:[%s8770_s5 + $0x8] sm:$0xff] }
 0x7f1   : > { %v3271_v22 = vmul.f32 %v8160_v25, %v8124_v11  ;;  %3628 = vmatprep.mubr.f32.mxu1 %v3381_v58  ;;  %v3141_v8 = vmul.f32 %v8070_v47, %v8124_v11  ;;  %v3496_v58 = vld [vmem:[%s8771_s6 + $0x20] sm:$0xff] }
 0x7f3   : > { %2842 = vrot.lane.b32.xlu0 %v2799_v28, %s6909_s1  ;;  %2728 = vrot.lane.b32.xlu1 %v2685_v29, %s6911_s12  ;;  %v8260_v14 = vpop.permute.xlu1 %2958  ;;  %v8278_v28 = vpop.permute.xlu0 %2950  ;;  %v3209_v29 = vmul.f32 %v8054_v40, %v8144_v20 }
 0x7f7   : > { %3220 = vrot.lane.b32.xlu0 %v3203_v3, %s6906_s28  ;;  %2952 = vrot.lane.b32.xlu1 %v2911_v0, %s6910_s3  ;;  %v8272_v45 = vpop.permute.xlu1 %2730  ;;  %v8293_v0 = vpop.permute.xlu0 %2722 }
 0x7fb   : > { %3066 = vrot.lane.b32.xlu0 %v3025_v33, %s6895_s0  ;;  %2724 = vrot.lane.b32.xlu1 %v2683_v31, %s6911_s12  ;;  %v8289_v3 = vpop.permute.xlu1 %3072  ;;  %v3268_v33 = vmul.f32 %v8160_v25, %v8056_v41  ;;  %v3273_v31 = vmul.f32 %v8160_v25, %v8152_v23 }
 0x7ff   : > { %2838 = vrot.lane.b32.xlu0 %v2797_v35, %s6909_s1  ;;  %2844 = vrot.lane.b32.xlu1 %v2800_v34, %s6909_s1  ;;  %v8301_v40 = vpop.permute.xlu1 %2962  ;;  %v3138_v35 = vmul.f32 %v8070_v47, %v8056_v41  ;;  %v3143_v34 = vmul.f32 %v8070_v47, %v8152_v23 }
 0x803   : > { %2964 = vrot.lane.b32.xlu0 %v2917_v19, %s6910_s3  ;;  %2848 = vrot.lane.b32.xlu1 %v2802_v37, %s6909_s1  ;;  %v8307_v19 = vpop.permute.xlu0 %3329  ;;  %v3270_v37 = vmul.f32 %v8160_v25, %v8088_v32 }
 0x807   : > { %2736 = vrot.lane.b32.xlu0 %v2689_v61, %s6911_s12  ;;  %3218 = vrot.lane.b32.xlu1 %v3202_v38, %s6906_s28  ;;  %v3332_v61 = vmul.f32 %v8307_v19, %v8060_v42  ;;  %v8315_v38 = vpop.permute.xlu1 %2734 }
 0x80b   : > { %3078 = vrot.lane.b32.xlu0 %v3031_v36, %s6895_s0  ;;  %3222 = vrot.lane.b32.xlu1 %v3204_v46, %s6906_s28  ;;  %v8319_v36 = vpop.permute.xlu0 %2954  ;;  %v3140_v46 = vmul.f32 %v8070_v47, %v8088_v32 }
 0x80f   : > { %2850 = vrot.lane.b32.xlu0 %v2803_v12, %s6909_s1  ;;  %3226 = vrot.lane.b32.xlu1 %v3206_v39, %s6906_s28  ;;  %v3334_v12 = vmul.f32 %v8307_v19, %v8092_v53  ;;  %v8327_v39 = vpop.permute.xlu1 %3076  ;;  %v8329_v42 = vpop.permute.xlu0 %2726 }
 0x813   : > { %2960 = vrot.lane.b32.xlu0 %v2915_v51, %s6910_s3  ;;  %3283 = vrot.lane.b32.xlu1 %v3267_v54, %s6908_s23  ;;  %v3272_v51 = vmul.f32 %v8160_v25, %v8120_v9  ;;  %v3336_v54 = vmul.f32 %v8307_v19, %v8124_v11  ;;  %v3492_v11 = vld [vmem:[%s8771_s6] sm:$0xff]  ;;  %s8833_s3 = sld [smem:[#allocation36_spill]] }
 0x817   : > { %2732 = vrot.lane.b32.xlu0 %v2687_v62, %s6911_s12  ;;  %3153 = vrot.lane.b32.xlu1 %v3137_v52, %s6891_s2  ;;  %v3142_v52 = vmul.f32 %v8070_v47, %v8120_v9  ;;  %s5550_s12 = sshll.u32 %s8837_s24, 4 }
 0x81b   : > { %3224 = vrot.lane.b32.xlu0 %v3205_v55, %s6906_s28  ;;  %3287 = vrot.lane.b32.xlu1 %v3269_v4, %s6908_s23  ;;  %v3338_v55 = vmul.f32 %v8307_v19, %v8152_v23 }
 0x81f   : > { %3228 = vrot.lane.b32.xlu0 %v3207_v56, %s6906_s28  ;;  %3230 = vrot.lane.b32.xlu1 %v3208_v13, %s6906_s28 }
 0x823   : > { %3074 = vrot.lane.b32.xlu0 %v3029_v16, %s6895_s0  ;;  %3157 = vrot.lane.b32.xlu1 %v3139_v18, %s6891_s2  ;;  %v3494_v18 = vld [vmem:[%s8771_s6 + $0x10] sm:$0xff] }
 0x827   : > { %2846 = vrot.lane.b32.xlu0 %v2801_v21, %s6909_s1  ;;  %3291 = vrot.lane.b32.xlu1 %v3271_v22, %s6908_s23 }
 0x82b   : > { %3232 = vrot.lane.b32.xlu0 %v3209_v29, %s6906_s28  ;;  %3161 = vrot.lane.b32.xlu1 %v3141_v8, %s6891_s2  ;;  %s8831_s28 = sld [smem:[#allocation34_spill]] }
 0x82f   : > { %3285 = vrot.lane.b32.xlu0 %v3268_v33, %s6908_s23  ;;  %3295 = vrot.lane.b32.xlu1 %v3273_v31, %s6908_s23  ;;  %v3498_v33 = vld [vmem:[%s8771_s6 + $0x30] sm:$0xff] }
 0x833   : > { %3155 = vrot.lane.b32.xlu0 %v3138_v35, %s6891_s2  ;;  %3165 = vrot.lane.b32.xlu1 %v3143_v34, %s6891_s2 }
 0x837   : > { %3289 = vrot.lane.b32.xlu0 %v3270_v37, %s6908_s23  ;;  %3348 = vrot.lane.b32.xlu1 %v3332_v61, %s6907_s22 }
 0x83b   : > { %3159 = vrot.lane.b32.xlu0 %v3140_v46, %s6891_s2  ;;  %3352 = vrot.lane.b32.xlu1 %v3334_v12, %s6907_s22 }
 0x83f   : > { %3293 = vrot.lane.b32.xlu0 %v3272_v51, %s6908_s23  ;;  %3356 = vrot.lane.b32.xlu1 %v3336_v54, %s6907_s22 }
 0x841   : > { %v2941_v53 = vpop.permute.xlu1 %2940  ;;  %v3055_v62 = vpop.permute.xlu0 %3054 }
 0x842   : > { %v2968_v4 = vsel %vm2966_vm5, %v8186_v63, %v2941_v53  ;;  %v3081_v56 = vsel %vm960_vm8, %v8102_v57, %v3055_v62  ;;  %v3274_v63 = vmul.f32 %v8160_v25, %v8144_v20  ;;  %v3144_v25 = vmul.f32 %v8070_v47, %v8144_v20 }
 0x843   : > { %2984 = vst.msk [vmem:[#allocation3 + $0x110] sm:$0xff] %vm873_vm9, %v2968_v4  ;;  %3097 = vst.msk [vmem:[#allocation3 + $0x190] sm:$0xff] %vm873_vm9, %v3081_v56  ;;  %3163 = vrot.lane.b32.xlu0 %v3142_v52, %s6891_s2  ;;  %3360 = vrot.lane.b32.xlu1 %v3338_v55, %s6907_s22  ;;  %v3333_v47 = vmul.f32 %v8307_v19, %v8056_v41  ;;  %v3335_v41 = vmul.f32 %v8307_v19, %v8088_v32  ;;  %v3888_v32 = vld [vmem:[%s8773_s8] sm:$0xff]  ;;  %v8409_v52 = vld [vmem:[#allocation9] sm:$0xff] }
 0x844   : > { %v3384_v56 = vld [vmem:[%s8770_s5 + $0x20] sm:$0xff] }
 0x845   : > { %v2713_v23 = vpop.permute.xlu1 %2712  ;;  %v2827_v13 = vpop.permute.xlu0 %2826  ;;  %5908 = vmatprep.mubr.msk.f32.mxu0 %vm1599_vm14, %v3384_v56 }
 0x846   : > { %v2740_v57 = vsel %vm2738_vm6, %v8212_v30, %v2713_v23  ;;  %v2854_v16 = vsel %vm2852_vm7, %v8136_v17, %v2827_v13  ;;  %v3495_v13 = vld [vmem:[%s8771_s6 + $0x18] sm:$0xff] }
 0x847   : > { %2756 = vst.msk [vmem:[#allocation3 + $0x10] sm:$0xff] %vm873_vm9, %v2740_v57  ;;  %2870 = vst.msk [vmem:[#allocation3 + $0x90] sm:$0xff] %vm873_vm9, %v2854_v16  ;;  %3297 = vrot.lane.b32.xlu0 %v3274_v63, %s6908_s23  ;;  %3502 = vperm.xlu1 %6428, %v3492_v11   ;;  %v8441_v63 = vld [vmem:[#allocation11] sm:$0xff]  ;;  %s6914_s23 = smov 104  }
 0x849   : > { %v2937_v21 = vpop.permute.xlu1 %2936  ;;  %v3051_v22 = vpop.permute.xlu0 %3050 }
 0x84a   : > { %v2967_v30 = vsel %vm2966_vm5, %v8174_v7, %v2937_v21  ;;  %v3080_v17 = vsel %vm960_vm8, %v8084_v43, %v3051_v22  ;;  %v3437_v37 = vld [vmem:[#allocation3 + $0x110] sm:$0xff] }
 0x84b   : > { %2983 = vst.msk [vmem:[#allocation3 + $0x100] sm:$0xff] %vm873_vm9, %v2967_v30  ;;  %3096 = vst.msk [vmem:[#allocation3 + $0x180] sm:$0xff] %vm873_vm9, %v3080_v17  ;;  %3167 = vrot.lane.b32.xlu0 %v3144_v25, %s6891_s2  ;;  %3512 = vperm.xlu1 %6428, %v3494_v18   ;;  %v3497_v25 = vld [vmem:[%s8771_s6 + $0x28] sm:$0xff] }
 0x84d   : > { %v2709_v29 = vpop.permute.xlu1 %2708  ;;  %v2823_v8 = vpop.permute.xlu0 %2822 }
 0x84e   : > { %v2739_v7 = vsel %vm2738_vm6, %v8200_v60, %v2709_v29  ;;  %v2853_v43 = vsel %vm2852_vm7, %v8116_v6, %v2823_v8  ;;  %v3421_v53 = vld [vmem:[#allocation3 + $0x10] sm:$0xff] }
 0x84f   : > { %2755 = vst.msk [vmem:[#allocation3] sm:$0xff] %vm873_vm9, %v2739_v7  ;;  %2869 = vst.msk [vmem:[#allocation3 + $0x80] sm:$0xff] %vm873_vm9, %v2853_v43  ;;  %3350 = vrot.lane.b32.xlu0 %v3333_v47, %s6907_s22  ;;  %3522 = vperm.xlu1 %6428, %v3496_v58   ;;  %v3499_v7 = vld [vmem:[%s8771_s6 + $0x38] sm:$0xff] }
 0x851   : > { %v2949_v31 = vpop.permute.xlu1 %2948  ;;  %v3063_v35 = vpop.permute.xlu0 %3062 }
 0x852   : > { %v2970_v60 = vsel %vm2966_vm5, %v8238_v48, %v2949_v31  ;;  %v3083_v6 = vsel %vm960_vm8, %v8168_v2, %v3063_v35  ;;  %v3436_v34 = vld [vmem:[#allocation3 + $0x100] sm:$0xff]  ;;  %v3337_v2 = vmul.f32 %v8307_v19, %v8120_v9 }
 0x853   : > { %2986 = vst.msk [vmem:[#allocation3 + $0x130] sm:$0xff] %vm873_vm9, %v2970_v60  ;;  %3099 = vst.msk [vmem:[#allocation3 + $0x1b0] sm:$0xff] %vm873_vm9, %v3083_v6  ;;  %3354 = vrot.lane.b32.xlu0 %v3335_v41, %s6907_s22  ;;  %3532 = vperm.xlu1 %6428, %v3498_v33   ;;  %v6103_v61 = vpack.c.bf16 %v3437_v37, %v3436_v34 }
 0x855   : > { %v2721_v46 = vpop.permute.xlu1 %2720  ;;  %6104 = vmatprep.subr.bf16.mxu1 %v6103_v61  ;;  %v2835_v48 = vpop.permute.xlu0 %2834 }
 0x856   : > { %v2742_v12 = vsel %vm2738_vm6, %v8264_v27, %v2721_v46  ;;  %v2856_v51 = vsel %vm2852_vm7, %v8194_v15, %v2835_v48  ;;  %v3420_v54 = vld [vmem:[#allocation3] sm:$0xff]  ;;  %v3339_v27 = vmul.f32 %v8307_v19, %v8144_v20  ;;  %v3493_v20 = vld [vmem:[%s8771_s6 + $0x8] sm:$0xff] }
 0x857   : > { %2758 = vst.msk [vmem:[#allocation3 + $0x30] sm:$0xff] %vm873_vm9, %v2742_v12  ;;  %2872 = vst.msk [vmem:[#allocation3 + $0xb0] sm:$0xff] %vm873_vm9, %v2856_v51  ;;  %3358 = vrot.lane.b32.xlu0 %v3337_v2, %s6907_s22  ;;  %3891 = vperm.xlu1 %6428, %v3888_v32   ;;  %v6105_v62 = vpack.c.bf16 %v3421_v53, %v3420_v54 }
 0x859   : > { %v2945_v55 = vpop.permute.xlu1 %2944  ;;  %6106 = vmatpush3.bf16.msra.mxu1 %v6105_v62  ;;  %v3059_v9 = vpop.permute.xlu0 %3058 }
 0x85a   : > { %v2969_v15 = vsel %vm2966_vm5, %v8226_v50, %v2945_v55  ;;  %v3082_v4 = vsel %vm960_vm8, %v8154_v24, %v3059_v9  ;;  %v4566_v24 = vld [vmem:[%s8831_s28] sm:$0xff]  ;;  %v3439_v21 = vld [vmem:[#allocation3 + $0x130] sm:$0xff] }
 0x85b   : > { %2985 = vst.msk [vmem:[#allocation3 + $0x120] sm:$0xff] %vm873_vm9, %v2969_v15  ;;  %3098 = vst.msk [vmem:[#allocation3 + $0x1a0] sm:$0xff] %vm873_vm9, %v3082_v4  ;;  %3362 = vrot.lane.b32.xlu0 %v3339_v27, %s6907_s22  ;;  %4266 = vrot.lane.b32.xlu1 %v8409_v52, %s6892_s26 }
 0x85d   : > { %v2717_v50 = vpop.permute.xlu1 %2716  ;;  %v2831_v19 = vpop.permute.xlu0 %2830 }
 0x85e   : > { %v2741_v11 = vsel %vm2738_vm6, %v8252_v5, %v2717_v50  ;;  %v2855_v23 = vsel %vm2852_vm7, %v8182_v10, %v2831_v19  ;;  %v3423_v8 = vld [vmem:[#allocation3 + $0x30] sm:$0xff] }
 0x85f   : > { %2757 = vst.msk [vmem:[#allocation3 + $0x20] sm:$0xff] %vm873_vm9, %v2741_v11  ;;  %2871 = vst.msk [vmem:[#allocation3 + $0xa0] sm:$0xff] %vm873_vm9, %v2855_v23  ;;  %3507 = vperm.xlu0 %6427, %v3493_v20   ;;  %4569 = vperm.xlu1 %6428, %v4566_v24  }
 0x861   : > { %v2957_v57 = vpop.permute.xlu1 %2956  ;;  %v3071_v16 = vpop.permute.xlu0 %3070 }
 0x862   : > { %v2972_v5 = vsel %vm2966_vm5, %v8319_v36, %v2957_v57  ;;  %v3085_v10 = vsel %vm960_vm8, %v8234_v44, %v3071_v16  ;;  %v3438_v18 = vld [vmem:[#allocation3 + $0x120] sm:$0xff] }
 0x863   : > { %2988 = vst.msk [vmem:[#allocation3 + $0x150] sm:$0xff] %vm873_vm9, %v2972_v5  ;;  %3101 = vst.msk [vmem:[#allocation3 + $0x1d0] sm:$0xff] %vm873_vm9, %v3085_v10  ;;  %3517 = vperm.xlu0 %6427, %v3495_v13   ;;  %4901 = vrot.lane.b32.xlu1 %v8441_v63, %s6892_s26  ;;  %v6107_v22 = vpack.c.bf16 %v3439_v21, %v3438_v18  ;;  %v5233_v36 = vld [vmem:[%s8832_s20] sm:$0xff]  ;;  %v3445_v5 = vld [vmem:[#allocation3 + $0x190] sm:$0xff]  ;;  %s8834_s26 = sld [smem:[#allocation37_spill]] }
 0x864   : > { %v3444_v13 = vld [vmem:[#allocation3 + $0x180] sm:$0xff] }
 0x865   : > { %v2729_v44 = vpop.permute.xlu1 %2728  ;;  %6108 = vmatprep.subr.bf16.mxu1 %v6107_v22  ;;  %v2843_v30 = vpop.permute.xlu0 %2842  ;;  %v6119_v10 = vpack.c.bf16 %v3445_v5, %v3444_v13  ;;  %v3428_v18 = vld [vmem:[#allocation3 + $0x80] sm:$0xff]  ;;  %v3457_v13 = vld [vmem:[#allocation3 + $0x250] sm:$0xff] }
 0x866   : > { %v2744_v17 = vsel %vm2738_vm6, %v8329_v42, %v2729_v44  ;;  %v2858_v58 = vsel %vm2852_vm7, %v8246_v59, %v2843_v30  ;;  %v3422_v29 = vld [vmem:[#allocation3 + $0x20] sm:$0xff]  ;;  %v3429_v44 = vld [vmem:[#allocation3 + $0x90] sm:$0xff] }
 0x867   : > { %2760 = vst.msk [vmem:[#allocation3 + $0x50] sm:$0xff] %vm873_vm9, %v2744_v17  ;;  %2874 = vst.msk [vmem:[#allocation3 + $0xd0] sm:$0xff] %vm873_vm9, %v2858_v58  ;;  %3527 = vperm.xlu0 %6427, %v3497_v25   ;;  %5236 = vperm.xlu1 %6428, %v5233_v36   ;;  %v6109_v47 = vpack.c.bf16 %v3423_v8, %v3422_v29  ;;  %v3446_v25 = vld [vmem:[#allocation3 + $0x1a0] sm:$0xff]  ;;  %v6121_v30 = vpack.c.bf16 %v3429_v44, %v3428_v18  ;;  %v3447_v17 = vld [vmem:[#allocation3 + $0x1b0] sm:$0xff] }
 0x868   : > { %v6123_v58 = vpack.c.bf16 %v3447_v17, %v3446_v25  ;;  %v3430_v29 = vld [vmem:[#allocation3 + $0xa0] sm:$0xff]  ;;  %v3395_v17 = vld [vmem:[%s8770_s5 + $0x78] sm:$0xff] }
 0x869   : > { %v2953_v43 = vpop.permute.xlu1 %2952  ;;  %6110 = vmatpush3.bf16.msra.mxu1 %v6109_v47  ;;  %v3221_v33 = vpop.permute.xlu0 %3220  ;;  %v3458_v25 = vld [vmem:[#allocation3 + $0x260] sm:$0xff]  ;;  %s783_s27 = scalar_lea.vmem %s8834_s26, %s5550_s12 }
 0x86a   : > { %v2971_v42 = vsel %vm2966_vm5, %v8278_v28, %v2953_v43  ;;  %3243 = vst.msk [vmem:[#allocation3 + $0x310] sm:$0xff] %vm873_vm9, %v3221_v33  ;;  %v3441_v37 = vld [vmem:[#allocation3 + $0x150] sm:$0xff] }
 0x86b   : > { %2987 = vst.msk [vmem:[#allocation3 + $0x140] sm:$0xff] %vm873_vm9, %v2971_v42  ;;  %3537 = vperm.xlu0 %6427, %v3499_v7   ;;  %v3431_v33 = vld [vmem:[#allocation3 + $0xb0] sm:$0xff] }
 0x86c   : > { %v3449_v42 = vld [vmem:[#allocation3 + $0x1d0] sm:$0xff] }
 0x86d   : > { %v2725_v59 = vpop.permute.xlu1 %2724  ;;  %v3067_v31 = vpop.permute.xlu0 %3066 }
 0x86e   : > { %v2743_v35 = vsel %vm2738_vm6, %v8293_v0, %v2725_v59  ;;  %v3084_v41 = vsel %vm960_vm8, %v8208_v26, %v3067_v31  ;;  %v3425_v48 = vld [vmem:[#allocation3 + $0x50] sm:$0xff] }
 0x86f   : > { %2759 = vst.msk [vmem:[#allocation3 + $0x40] sm:$0xff] %vm873_vm9, %v2743_v35  ;;  %3100 = vst.msk [vmem:[#allocation3 + $0x1c0] sm:$0xff] %vm873_vm9, %v3084_v41  ;;  %4044 = vrot.lane.b32.xlu0 %v8409_v52, %s6901_s9 }
 0x871   : > { %v8478_v28 = vpop.permute.xlu1 %2844  ;;  %v2839_v60 = vpop.permute.xlu0 %2838 }
 0x872   : > { %v2857_v6 = vsel %vm2852_vm7, %v8220_v49, %v2839_v60  ;;  %v3440_v34 = vld [vmem:[#allocation3 + $0x140] sm:$0xff]  ;;  %v3433_v60 = vld [vmem:[#allocation3 + $0xd0] sm:$0xff] }
 0x873   : > { %2873 = vst.msk [vmem:[#allocation3 + $0xc0] sm:$0xff] %vm873_vm9, %v2857_v6  ;;  %v6111_v0 = vpack.c.bf16 %v3441_v37, %v3440_v34  ;;  %4416 = vrot.lane.b32.xlu0 %v8409_v52, %s6914_s23 }
 0x875   : > { %v2849_v61 = vpop.permute.xlu1 %2848  ;;  %6112 = vmatprep.subr.bf16.mxu1 %v6111_v0  ;;  %v2965_v26 = vpop.permute.xlu0 %2964 }
 0x876   : > { %v2974_v32 = vsel %vm2966_vm5, %v8301_v40, %v2965_v26  ;;  %v3424_v46 = vld [vmem:[#allocation3 + $0x40] sm:$0xff] }
 0x877   : > { %2990 = vst.msk [vmem:[#allocation3 + $0x170] sm:$0xff] %vm873_vm9, %v2974_v32  ;;  %v6113_v2 = vpack.c.bf16 %v3425_v48, %v3424_v46  ;;  %v3448_v7 = vld [vmem:[#allocation3 + $0x1c0] sm:$0xff]  ;;  %4663 = vrot.lane.b32.xlu0 %v8441_v63, %s6901_s9 }
 0x878   : > { %v6127_v59 = vpack.c.bf16 %v3449_v42, %v3448_v7  ;;  %v3400_v42 = vld [vmem:[%s8770_s5 + $0xa0] sm:$0xff] }
 0x879   : > { %v3219_v12 = vpop.permute.xlu1 %3218  ;;  %6114 = vmatpush3.bf16.msra.mxu1 %v6113_v2  ;;  %v2737_v51 = vpop.permute.xlu0 %2736  ;;  %v3469_v2 = vld [vmem:[#allocation3 + $0x310] sm:$0xff] }
 0x87a   : > { %3242 = vst.msk [vmem:[#allocation3 + $0x300] sm:$0xff] %vm873_vm9, %v3219_v12  ;;  %v2746_v49 = vsel %vm2738_vm6, %v8315_v38, %v2737_v51  ;;  %v3432_v31 = vld [vmem:[#allocation3 + $0xc0] sm:$0xff] }
 0x87b   : > { %2762 = vst.msk [vmem:[#allocation3 + $0x70] sm:$0xff] %vm873_vm9, %v2746_v49  ;;  %v3452_v51 = vld [vmem:[#allocation3 + $0x200] sm:$0xff]  ;;  %v3453_v49 = vld [vmem:[#allocation3 + $0x210] sm:$0xff]  ;;  %5067 = vrot.lane.b32.xlu0 %v8441_v63, %s6914_s23 }
 0x87d   : > { %v3223_v54 = vpop.permute.xlu1 %3222  ;;  %v3079_v53 = vpop.permute.xlu0 %3078 }
 0x87e   : > { %3244 = vst.msk [vmem:[#allocation3 + $0x320] sm:$0xff] %vm873_vm9, %v3223_v54  ;;  %v3087_v40 = vsel %vm960_vm8, %v8327_v39, %v3079_v53  ;;  %v3443_v19 = vld [vmem:[#allocation3 + $0x170] sm:$0xff] }
 0x87f   : > { %3103 = vst.msk [vmem:[#allocation3 + $0x1f0] sm:$0xff] %vm873_vm9, %v3087_v40  ;;  %v3380_v40 = vld [vmem:[%s8770_s5] sm:$0xff] }
 0x881   : > { %v3227_v62 = vpop.permute.xlu1 %3226  ;;  %v2851_v55 = vpop.permute.xlu0 %2850  ;;  %v3468_v26 = vld [vmem:[#allocation3 + $0x300] sm:$0xff] }
 0x882   : > { %3246 = vst.msk [vmem:[#allocation3 + $0x340] sm:$0xff] %vm873_vm9, %v3227_v62  ;;  %v2860_v9 = vsel %vm2852_vm7, %v2849_v61, %v2851_v55  ;;  %v3427_v57 = vld [vmem:[#allocation3 + $0x70] sm:$0xff]  ;;  %v6135_v12 = vpack.c.bf16 %v3469_v2, %v3468_v26  ;;  %v3411_v26 = vld [vmem:[%s8770_s5 + $0xf8] sm:$0xff] }
 0x883   : > { %2876 = vst.msk [vmem:[#allocation3 + $0xf0] sm:$0xff] %vm873_vm9, %v2860_v9  ;;  %v3386_v55 = vld [vmem:[%s8770_s5 + $0x30] sm:$0xff]  ;;  %v6137_v9 = vpack.c.bf16 %v3453_v49, %v3452_v51 }
 0x885   : > { %v3284_v38 = vpop.permute.xlu1 %3283  ;;  %v2961_v27 = vpop.permute.xlu0 %2960 }
 0x886   : > { %3307 = vst.msk [vmem:[#allocation3 + $0x380] sm:$0xff] %vm873_vm9, %v3284_v38  ;;  %v2973_v15 = vsel %vm2966_vm5, %v8260_v14, %v2961_v27  ;;  %v3451_v34 = vld [vmem:[#allocation3 + $0x1f0] sm:$0xff]  ;;  %v3470_v38 = vld [vmem:[#allocation3 + $0x320] sm:$0xff] }
 0x887   : > { %2989 = vst.msk [vmem:[#allocation3 + $0x160] sm:$0xff] %vm873_vm9, %v2973_v15  ;;  %v3454_v15 = vld [vmem:[#allocation3 + $0x220] sm:$0xff] }
 0x889   : > { %v3154_v39 = vpop.permute.xlu1 %3153  ;;  %v2733_v4 = vpop.permute.xlu0 %2732 }
 0x88a   : > { %3177 = vst.msk [vmem:[#allocation3 + $0x280] sm:$0xff] %vm873_vm9, %v3154_v39  ;;  %v2745_v56 = vsel %vm2738_vm6, %v8272_v45, %v2733_v4  ;;  %v3435_v46 = vld [vmem:[#allocation3 + $0xf0] sm:$0xff] }
 0x88b   : > { %2761 = vst.msk [vmem:[#allocation3 + $0x60] sm:$0xff] %vm873_vm9, %v2745_v56  ;;  %v3455_v39 = vld [vmem:[#allocation3 + $0x230] sm:$0xff] }
 0x88d   : > { %v3288_v20 = vpop.permute.xlu1 %3287  ;;  %v3225_v24 = vpop.permute.xlu0 %3224 }
 0x88e   : > { %3309 = vst.msk [vmem:[#allocation3 + $0x3a0] sm:$0xff] %vm873_vm9, %v3288_v20  ;;  %3245 = vst.msk [vmem:[#allocation3 + $0x330] sm:$0xff] %vm873_vm9, %v3225_v24  ;;  %v3442_v50 = vld [vmem:[#allocation3 + $0x160] sm:$0xff]  ;;  %v3385_v20 = vld [vmem:[%s8770_s5 + $0x28] sm:$0xff] }
 0x88f   : > { %v6115_v14 = vpack.c.bf16 %v3443_v19, %v3442_v50  ;;  %v3391_v50 = vld [vmem:[%s8770_s5 + $0x58] sm:$0xff]  ;;  %v6141_v19 = vpack.c.bf16 %v3455_v39, %v3454_v15 }
 0x891   : > { %v3231_v11 = vpop.permute.xlu1 %3230  ;;  %6116 = vmatprep.subr.bf16.mxu1 %v6115_v14  ;;  %v3229_v23 = vpop.permute.xlu0 %3228  ;;  %v3472_v14 = vld [vmem:[#allocation3 + $0x340] sm:$0xff] }
 0x892   : > { %3248 = vst.msk [vmem:[#allocation3 + $0x360] sm:$0xff] %vm873_vm9, %v3231_v11  ;;  %3247 = vst.msk [vmem:[#allocation3 + $0x350] sm:$0xff] %vm873_vm9, %v3229_v23  ;;  %v3426_v45 = vld [vmem:[#allocation3 + $0x60] sm:$0xff] }
 0x893   : > { %v6117_v16 = vpack.c.bf16 %v3427_v57, %v3426_v45  ;;  %v3456_v23 = vld [vmem:[#allocation3 + $0x240] sm:$0xff] }
 0x894   : > { %v6145_v18 = vpack.c.bf16 %v3457_v13, %v3456_v23  ;;  %v3387_v23 = vld [vmem:[%s8770_s5 + $0x38] sm:$0xff] }
 0x895   : > { %v3158_v21 = vpop.permute.xlu1 %3157  ;;  %6118 = vmatpush3.bf16.msra.mxu1 %v6117_v16  ;;  %v3075_v22 = vpop.permute.xlu0 %3074  ;;  %v3471_v62 = vld [vmem:[#allocation3 + $0x330] sm:$0xff] }
 0x896   : > { %3179 = vst.msk [vmem:[#allocation3 + $0x2a0] sm:$0xff] %vm873_vm9, %v3158_v21  ;;  %v3086_v36 = vsel %vm960_vm8, %v8289_v3, %v3075_v22  ;;  %6120 = vmatprep.subr.bf16.mxu1 %v6119_v10  ;;  %v6125_v3 = vpack.c.bf16 %v3431_v33, %v3430_v29  ;;  %v6139_v27 = vpack.c.bf16 %v3471_v62, %v3470_v38  ;;  %v3390_v16 = vld [vmem:[%s8770_s5 + $0x50] sm:$0xff]  ;;  %v3396_v10 = vld [vmem:[%s8770_s5 + $0x80] sm:$0xff]  ;;  %v3401_v29 = vld [vmem:[%s8770_s5 + $0xa8] sm:$0xff]  ;;  %vm6913_vm8 = vmmov 0  }
 0x897   : > { %3102 = vst.msk [vmem:[#allocation3 + $0x1e0] sm:$0xff] %vm873_vm9, %v3086_v36  ;;  %v3459_v36 = vld [vmem:[#allocation3 + $0x270] sm:$0xff]  ;;  %v3415_v62 = vld [vmem:[%s8770_s5 + $0x118] sm:$0xff] }
 0x899   : > { %v3292_v8 = vpop.permute.xlu1 %3291  ;;  %6122 = vmatpush3.bf16.msra.mxu1 %v6121_v30  ;;  %v2847_v47 = vpop.permute.xlu0 %2846  ;;  %v3473_v24 = vld [vmem:[#allocation3 + $0x350] sm:$0xff]  ;;  %v3474_v21 = vld [vmem:[#allocation3 + $0x360] sm:$0xff] }
 0x89a   : > { %3311 = vst.msk [vmem:[#allocation3 + $0x3c0] sm:$0xff] %vm873_vm9, %v3292_v8  ;;  %v2859_v43 = vsel %vm2852_vm7, %v8478_v28, %v2847_v47  ;;  %6124 = vmatprep.subr.bf16.mxu1 %v6123_v58  ;;  %v6129_v28 = vpack.c.bf16 %v3433_v60, %v3432_v31  ;;  %v6143_v11 = vpack.c.bf16 %v3473_v24, %v3472_v14  ;;  %v3476_v47 = vld [vmem:[#allocation3 + $0x380] sm:$0xff] }
 0x89b   : > { %2875 = vst.msk [vmem:[#allocation3 + $0xe0] sm:$0xff] %vm873_vm9, %v2859_v43  ;;  %v6149_v8 = vpack.c.bf16 %v3459_v36, %v3458_v25  ;;  %v3460_v31 = vld [vmem:[#allocation3 + $0x280] sm:$0xff]  ;;  %v3397_v36 = vld [vmem:[%s8770_s5 + $0x88] sm:$0xff] }
 0x89c   : > { %v3478_v60 = vld [vmem:[#allocation3 + $0x3a0] sm:$0xff] }
 0x89d   : > { %v3162_v35 = vpop.permute.xlu1 %3161  ;;  %6126 = vmatpush3.bf16.msra.mxu1 %v6125_v3  ;;  %v3233_v41 = vpop.permute.xlu0 %3232  ;;  %v3388_v14 = vld [vmem:[%s8770_s5 + $0x40] sm:$0xff] }
 0x89e   : > { %3181 = vst.msk [vmem:[#allocation3 + $0x2c0] sm:$0xff] %vm873_vm9, %v3162_v35  ;;  %3249 = vst.msk [vmem:[#allocation3 + $0x370] sm:$0xff] %vm873_vm9, %v3233_v41  ;;  %6128 = vmatprep.subr.bf16.mxu1 %v6127_v59  ;;  %v3450_v6 = vld [vmem:[#allocation3 + $0x1e0] sm:$0xff]  ;;  %v3406_v35 = vld [vmem:[%s8770_s5 + $0xd0] sm:$0xff] }
 0x89f   : > { %v6131_v37 = vpack.c.bf16 %v3451_v34, %v3450_v6 }
 0x8a1   : > { %v3296_v0 = vpop.permute.xlu1 %3295  ;;  %6130 = vmatpush3.bf16.msra.mxu1 %v6129_v28  ;;  %v3286_v61 = vpop.permute.xlu0 %3285 }
 0x8a2   : > { %3313 = vst.msk [vmem:[#allocation3 + $0x3e0] sm:$0xff] %vm873_vm9, %v3296_v0  ;;  %3308 = vst.msk [vmem:[#allocation3 + $0x390] sm:$0xff] %vm873_vm9, %v3286_v61  ;;  %6132 = vmatprep.subr.bf16.mxu1 %v6131_v37  ;;  %v3434_v32 = vld [vmem:[#allocation3 + $0xe0] sm:$0xff]  ;;  %v3405_v37 = vld [vmem:[%s8770_s5 + $0xc8] sm:$0xff] }
 0x8a3   : > { %v6133_v48 = vpack.c.bf16 %v3435_v46, %v3434_v32  ;;  %v3462_v61 = vld [vmem:[#allocation3 + $0x2a0] sm:$0xff] }
 0x8a4   : > { %v3480_v46 = vld [vmem:[#allocation3 + $0x3c0] sm:$0xff] }
 0x8a5   : > { %v3166_v54 = vpop.permute.xlu1 %3165  ;;  %6134 = vmatpush3.bf16.msra.mxu1 %v6133_v48  ;;  %v3156_v53 = vpop.permute.xlu0 %3155  ;;  %v3475_v5 = vld [vmem:[#allocation3 + $0x370] sm:$0xff]  ;;  %v3464_v51 = vld [vmem:[#allocation3 + $0x2c0] sm:$0xff] }
 0x8a6   : > { %3183 = vst.msk [vmem:[#allocation3 + $0x2e0] sm:$0xff] %vm873_vm9, %v3166_v54  ;;  %3178 = vst.msk [vmem:[#allocation3 + $0x290] sm:$0xff] %vm873_vm9, %v3156_v53  ;;  %6136 = vmatprep.subr.bf16.mxu1 %v6135_v12  ;;  %v6147_v22 = vpack.c.bf16 %v3475_v5, %v3474_v21  ;;  %v3410_v12 = vld [vmem:[%s8770_s5 + $0xf0] sm:$0xff]  ;;  %v3416_v53 = vld [vmem:[%s8770_s5 + $0x120] sm:$0xff] }
 0x8a8   : > { %3629 = vmatmul.mubr.f32.vlgmr.msra.gmra.mrb[24].mxu1 %v3380_v40 }
 0x8a9   : > { %v3349_v4 = vpop.permute.xlu1 %3348  ;;  %6138 = vmatpush3.bf16.msra.mxu1 %v6137_v9  ;;  %v3290_v56 = vpop.permute.xlu0 %3289  ;;  %3633 = vmatprep.mubr.f32.mxu1 %v3386_v55  ;;  %v3477_v58 = vld [vmem:[#allocation3 + $0x390] sm:$0xff]  ;;  %v3482_v55 = vld [vmem:[#allocation3 + $0x3e0] sm:$0xff] }
 0x8aa   : > { %3372 = vst.msk [vmem:[#allocation3 + $0x400] sm:$0xff] %vm873_vm9, %v3349_v4  ;;  %3310 = vst.msk [vmem:[#allocation3 + $0x3b0] sm:$0xff] %vm873_vm9, %v3290_v56  ;;  %6140 = vmatprep.subr.bf16.mxu1 %v6139_v27  ;;  %v6151_v7 = vpack.c.bf16 %v3477_v58, %v3476_v47  ;;  %v3383_v27 = vld [vmem:[%s8770_s5 + $0x18] sm:$0xff]  ;;  %v3408_v47 = vld [vmem:[%s8770_s5 + $0xe0] sm:$0xff] }
 0x8ac   : > { %3634 = vmatmul.mubr.f32.gmra.mrb[26].mxu1 %v3385_v20  ;;  %v3382_v20 = vld [vmem:[%s8770_s5 + $0x10] sm:$0xff] }
 0x8ad   : > { %v3353_v45 = vpop.permute.xlu1 %3352  ;;  %6142 = vmatpush3.bf16.msra.mxu1 %v6141_v19  ;;  %v3160_v57 = vpop.permute.xlu0 %3159  ;;  %3638 = vmatprep.mubr.f32.mxu1 %v3391_v50  ;;  %v3461_v43 = vld [vmem:[#allocation3 + $0x290] sm:$0xff]  ;;  %v3466_v39 = vld [vmem:[#allocation3 + $0x2e0] sm:$0xff] }
 0x8ae   : > { %3374 = vst.msk [vmem:[#allocation3 + $0x420] sm:$0xff] %vm873_vm9, %v3353_v45  ;;  %3180 = vst.msk [vmem:[#allocation3 + $0x2b0] sm:$0xff] %vm873_vm9, %v3160_v57  ;;  %6144 = vmatprep.subr.bf16.mxu1 %v6143_v11  ;;  %v6153_v41 = vpack.c.bf16 %v3461_v43, %v3460_v31  ;;  %v3407_v43 = vld [vmem:[%s8770_s5 + $0xd8] sm:$0xff]  ;;  %v3409_v31 = vld [vmem:[%s8770_s5 + $0xe8] sm:$0xff] }
 0x8b0   : > { %3639 = vmatmul.mubr.f32.gmra.mrb[28].mxu1 %v3390_v16  ;;  %v3393_v16 = vld [vmem:[%s8770_s5 + $0x68] sm:$0xff] }
 0x8b1   : > { %v3357_v44 = vpop.permute.xlu1 %3356  ;;  %6146 = vmatpush3.bf16.msra.mxu1 %v6145_v18  ;;  %v3294_v30 = vpop.permute.xlu0 %3293  ;;  %3643 = vmatprep.mubr.f32.mxu1 %v3396_v10  ;;  %v3479_v59 = vld [vmem:[#allocation3 + $0x3b0] sm:$0xff]  ;;  %v3484_v50 = vld [vmem:[#allocation3 + $0x400] sm:$0xff] }
 0x8b2   : > { %3376 = vst.msk [vmem:[#allocation3 + $0x440] sm:$0xff] %vm873_vm9, %v3357_v44  ;;  %3312 = vst.msk [vmem:[#allocation3 + $0x3d0] sm:$0xff] %vm873_vm9, %v3294_v30  ;;  %6148 = vmatprep.subr.bf16.mxu1 %v6147_v22  ;;  %v6155_v6 = vpack.c.bf16 %v3479_v59, %v3478_v60  ;;  %v3392_v10 = vld [vmem:[%s8770_s5 + $0x60] sm:$0xff]  ;;  %v3398_v22 = vld [vmem:[%s8770_s5 + $0x90] sm:$0xff] }
 0x8b3   : > { %v3412_v59 = vld [vmem:[%s8770_s5 + $0x100] sm:$0xff]  ;;  %v3417_v60 = vld [vmem:[%s8770_s5 + $0x128] sm:$0xff] }
 0x8b4   : > { %3644 = vmatmul.mubr.f32.gmra.mrb[30].mxu1 %v3395_v17  ;;  %v3403_v17 = vld [vmem:[%s8770_s5 + $0xb8] sm:$0xff] }
 0x8b5   : > { %v3361_v33 = vpop.permute.xlu1 %3360  ;;  %6150 = vmatpush3.bf16.msra.mxu1 %v6149_v8  ;;  %v3164_v3 = vpop.permute.xlu0 %3163  ;;  %3648 = vmatprep.mubr.f32.mxu1 %v3401_v29  ;;  %v3463_v34 = vld [vmem:[#allocation3 + $0x2b0] sm:$0xff]  ;;  %v3486_v45 = vld [vmem:[#allocation3 + $0x420] sm:$0xff]  ;;  %v3389_v8 = vld [vmem:[%s8770_s5 + $0x48] sm:$0xff] }
 0x8b6   : > { %3378 = vst.msk [vmem:[#allocation3 + $0x460] sm:$0xff] %vm873_vm9, %v3361_v33  ;;  %3182 = vst.msk [vmem:[#allocation3 + $0x2d0] sm:$0xff] %vm873_vm9, %v3164_v3  ;;  %6152 = vmatprep.subr.bf16.mxu1 %v6151_v7  ;;  %v6157_v32 = vpack.c.bf16 %v3463_v34, %v3462_v61  ;;  %v3402_v29 = vld [vmem:[%s8770_s5 + $0xb0] sm:$0xff]  ;;  %v3399_v33 = vld [vmem:[%s8770_s5 + $0x98] sm:$0xff]  ;;  %v6912_v34 = vmov 0.0|0.0  }
 0x8b7   : > { %v3394_v7 = vld [vmem:[%s8770_s5 + $0x70] sm:$0xff]  ;;  %v3413_v3 = vld [vmem:[%s8770_s5 + $0x108] sm:$0xff] }
 0x8b8   : > { %3649 = vmatmul.mubr.f32.gmra.mrb[32].mxu1 %v3400_v42  ;;  %v3404_v42 = vld [vmem:[%s8770_s5 + $0xc0] sm:$0xff] }
 0x8b9   : > { %6154 = vmatpush3.bf16.msra.mxu1 %v6153_v41  ;;  %v3298_v28 = vpop.permute.xlu0 %3297  ;;  %3653 = vmatprep.mubr.f32.mxu1 %v3406_v35  ;;  %v3481_v0 = vld [vmem:[#allocation3 + $0x3d0] sm:$0xff]  ;;  %v3488_v18 = vld [vmem:[#allocation3 + $0x440] sm:$0xff] }
 0x8ba   : > { %3314 = vst.msk [vmem:[#allocation3 + $0x3f0] sm:$0xff] %vm873_vm9, %v3298_v28  ;;  %6156 = vmatprep.subr.bf16.mxu1 %v6155_v6  ;;  %v6159_v48 = vpack.c.bf16 %v3481_v0, %v3480_v46  ;;  %v3418_v35 = vld [vmem:[%s8770_s5 + $0x130] sm:$0xff]  ;;  %v3419_v6 = vld [vmem:[%s8770_s5 + $0x138] sm:$0xff] }
 0x8bb   : > { %v3414_v41 = vld [vmem:[%s8770_s5 + $0x110] sm:$0xff] }
 0x8bc   : > { %3654 = vmatmul.mubr.f32.gmra.mrb[34].mxu1 %v3405_v37 }
 0x8bd   : > { %6158 = vmatpush3.bf16.msra.mxu1 %v6157_v32  ;;  %v3168_v2 = vpop.permute.xlu0 %3167  ;;  %3658 = vmatprep.mubr.f32.mxu1 %v3411_v26  ;;  %v3465_v49 = vld [vmem:[#allocation3 + $0x2d0] sm:$0xff]  ;;  %v3490_v44 = vld [vmem:[#allocation3 + $0x460] sm:$0xff] }
 0x8be   : > { %3184 = vst.msk [vmem:[#allocation3 + $0x2f0] sm:$0xff] %vm873_vm9, %v3168_v2  ;;  %6160 = vmatprep.subr.bf16.mxu1 %v6159_v48  ;;  %v6161_v54 = vpack.c.bf16 %v3465_v49, %v3464_v51 }
 0x8c0   : > { %3659 = vmatmul.mubr.f32.gmra.mrb[36].mxu1 %v3410_v12 }
 0x8c1   : > { %6162 = vmatpush3.bf16.msra.mxu1 %v6161_v54  ;;  %v3351_v40 = vpop.permute.xlu0 %3350  ;;  %3663 = vmatprep.mubr.f32.mxu1 %v3416_v53  ;;  %v3483_v9 = vld [vmem:[#allocation3 + $0x3f0] sm:$0xff] }
 0x8c2   : > { %3373 = vst.msk [vmem:[#allocation3 + $0x410] sm:$0xff] %vm873_vm9, %v3351_v40  ;;  %v6163_v38 = vpack.c.bf16 %v3483_v9, %v3482_v55 }
 0x8c4   : > { %3664 = vmatmul.mubr.f32.gmra.mrb[38].mxu1 %v3415_v62  ;;  %6164 = vmatprep.subr.bf16.mxu1 %v6163_v38 }
 0x8c5   : > { %v3355_v15 = vpop.permute.xlu0 %3354  ;;  %v3467_v4 = vld [vmem:[#allocation3 + $0x2f0] sm:$0xff]  ;;  %3733 = vmatprep.mubr.f32.mxu1 %v3383_v27 }
 0x8c6   : > { %3375 = vst.msk [vmem:[#allocation3 + $0x430] sm:$0xff] %vm873_vm9, %v3355_v15  ;;  %v6165_v56 = vpack.c.bf16 %v3467_v4, %v3466_v39 }
 0x8c8   : > { %6166 = vmatpush3.bf16.msra.mxu1 %v6165_v56 }
 0x8c9   : > { %v3359_v24 = vpop.permute.xlu0 %3358  ;;  %v3485_v19 = vld [vmem:[#allocation3 + $0x410] sm:$0xff]  ;;  %6198 = vmatprep.subr.bf16.mxu1 %v6912_v34 }
 0x8ca   : > { %3377 = vst.msk [vmem:[#allocation3 + $0x450] sm:$0xff] %vm873_vm9, %v3359_v24  ;;  %v6167_v11 = vpack.c.bf16 %v3485_v19, %v3484_v50  ;;  %v3503_v24 = vpop.permute.xlu1 %3502 }
 0x8cb   : > { %3734 = vmatmul.mubr.f32.vlgmr.msra.gmra.mrb[40].mxu1 %v3382_v20 }
 0x8cc   : > { %6168 = vmatprep.subr.bf16.mxu0 %v6167_v11  ;;  %3738 = vmatprep.mubr.f32.mxu1 %v3388_v14 }
 0x8cd   : > { %6170 = vmatpush3.bf16.msra.mxu0 %v6167_v11  ;;  %v3363_v13 = vpop.permute.xlu0 %3362  ;;  %v3487_v57 = vld [vmem:[#allocation3 + $0x430] sm:$0xff] }
 0x8ce   : > { %3379 = vst.msk [vmem:[#allocation3 + $0x470] sm:$0xff] %vm873_vm9, %v3363_v13  ;;  %v6171_v5 = vpack.c.bf16 %v3487_v57, %v3486_v45 }
 0x8cf   : > { %3739 = vmatmul.mubr.f32.gmra.mrb[42].mxu1 %v3387_v23 }
 0x8d0   : > { %6172 = vmatprep.subr.bf16.mxu0 %v6171_v5  ;;  %3743 = vmatprep.mubr.f32.mxu1 %v3393_v16 }
 0x8d1   : > { %6174 = vmatpush3.bf16.msra.mxu0 %v6171_v5  ;;  %v3489_v21 = vld [vmem:[#allocation3 + $0x450] sm:$0xff] }
 0x8d2   : > { %v6175_v25 = vpack.c.bf16 %v3489_v21, %v3488_v18  ;;  %v3513_v18 = vpop.permute.xlu1 %3512 }
 0x8d3   : > { %3744 = vmatmul.mubr.f32.gmra.mrb[44].mxu1 %v3392_v10 }
 0x8d4   : > { %6176 = vmatprep.subr.bf16.mxu0 %v6175_v25  ;;  %3748 = vmatprep.mubr.f32.mxu1 %v3398_v22 }
 0x8d5   : > { %6178 = vmatpush3.bf16.msra.mxu0 %v6175_v25  ;;  %v3491_v30 = vld [vmem:[#allocation3 + $0x470] sm:$0xff] }
 0x8d6   : > { %v6179_v58 = vpack.c.bf16 %v3491_v30, %v3490_v44 }
 0x8d7   : > { %3749 = vmatmul.mubr.f32.gmra.mrb[46].mxu1 %v3397_v36 }
 0x8d8   : > { %6180 = vmatprep.subr.bf16.mxu0 %v6179_v58  ;;  %3753 = vmatprep.mubr.f32.mxu1 %v3403_v17 }
 0x8d9   : > { %6182 = vmatpush3.bf16.msra.mxu0 %v6179_v58 }
 0x8da   : > { %6183 = vmatprep.subr.bf16.mxu0 %v6912_v34 }
 0x8db   : > { %3754 = vmatmul.mubr.f32.gmra.mrb[48].mxu1 %v3402_v29 }
 0x8dc   : > { %5909 = vmatmul.mubr.msk.f32.vlgmr.msra.gmra.mrb[24].mxu0 %vm1599_vm14, %v3389_v8  ;;  %3758 = vmatprep.mubr.f32.mxu1 %v3408_v47  ;;  %v3523_v8 = vpop.permute.xlu1 %3522 }
 0x8dd   : > { %5911 = vmatprep.mubr.msk.f32.mxu0 %vm1599_vm14, %v3394_v7 }
 0x8de   : > { %v3508_v13 = vpop.permute.xlu0 %3507 }
 0x8df   : > { %3759 = vmatmul.mubr.f32.gmra.mrb[50].mxu1 %v3407_v43 }
 0x8e0   : > { %5912 = vmatmul.mubr.msk.f32.gmra.mrb[26].mxu0 %vm1599_vm14, %v3399_v33  ;;  %3763 = vmatprep.mubr.f32.mxu1 %v3413_v3 }
 0x8e1   : > { %5914 = vmatprep.mubr.msk.f32.mxu0 %vm1599_vm14, %v3404_v42 }
 0x8e2   : > { %v3518_v30 = vpop.permute.xlu0 %3517 }
 0x8e3   : > { %3764 = vmatmul.mubr.f32.gmra.mrb[52].mxu1 %v3412_v59 }
 0x8e4   : > { %5915 = vmatmul.mubr.msk.f32.gmra.mrb[28].mxu0 %vm1599_vm14, %v3409_v31  ;;  %3768 = vmatprep.mubr.f32.mxu1 %v3418_v35 }
 0x8e5   : > { %5917 = vmatprep.mubr.msk.f32.mxu0 %vm1599_vm14, %v3414_v41 }
 0x8e6   : > { %v3528_v41 = vpop.permute.xlu0 %3527 }
 0x8e7   : > { %3769 = vmatmul.mubr.f32.gmra.mrb[54].mxu1 %v3417_v60 }
 0x8e8   : > { %5918 = vmatmul.mubr.msk.f32.gmra.mrb[30].mxu0 %vm1599_vm14, %v3419_v6  ;;  %5960 = vmatprep.mubr.msk.f32.mxu1 %vm6913_vm8, %v6890_v1 }
 0x8e9   : > { %5936 = vmatprep.mubr.msk.f32.mxu0 %vm6913_vm8, %v6890_v1 }
 0x97b   : > { %v5711_v28 = vpop.f32.mrb[24].mxu1 }
 0x97c   : > { %v5712_v37 = vpop.f32.mrb[25].mxu1 }
 0x97d   : > { %v5713_v0 = vadd.f32 %v5712_v37, %v5711_v28 }
 0x97f   : > { %v5714_v61 = vpop.f32.mrb[26].mxu1  ;;  %v3631_v19 = vadd.f32 %v5713_v0, %v3503_v24  ;;  %v3538_v24 = vpop.permute.xlu0 %3537 }
 0x980   : > { %v5715_v26 = vpop.f32.mrb[27].mxu1 }
 0x981   : > { %v5716_v32 = vadd.f32 %v5715_v26, %v5714_v61 }
 0x983   : > { %v5717_v46 = vpop.f32.mrb[28].mxu1  ;;  %v3636_v57 = vadd.f32 %v5716_v32, %v3508_v13  ;;  %v4045_v63 = vpop.permute.xlu0 %4044 }
 0x984   : > { %v5718_v48 = vpop.f32.mrb[29].mxu1 }
 0x985   : > { %v5719_v2 = vadd.f32 %v5718_v48, %v5717_v46 }
 0x987   : > { %v5720_v12 = vpop.f32.mrb[30].mxu1  ;;  %v3641_v22 = vadd.f32 %v5719_v2, %v3513_v18 }
 0x988   : > { %v5721_v51 = vpop.f32.mrb[31].mxu1 }
 0x989   : > { %v5722_v49 = vadd.f32 %v5721_v51, %v5720_v12  ;;  %v3533_v51 = vpop.permute.xlu1 %3532 }
 0x98b   : > { %v5723_v54 = vpop.f32.mrb[32].mxu1  ;;  %v3646_v58 = vadd.f32 %v5722_v49, %v3518_v30 }
 0x98c   : > { %v5724_v53 = vpop.f32.mrb[33].mxu1 }
 0x98d   : > { %v5725_v40 = vadd.f32 %v5724_v53, %v5723_v54 }
 0x98f   : > { %v5726_v62 = vpop.f32.mrb[34].mxu1  ;;  %v3651_v3 = vadd.f32 %v5725_v40, %v3523_v8  ;;  %v4119_v8 = vld [vmem:[%s8833_s3 + $0x18] sm:$0xff] }
 0x990   : > { %v5727_v55 = vpop.f32.mrb[35].mxu1 }
 0x991   : > { %v5728_v9 = vadd.f32 %v5727_v55, %v5726_v62 }
 0x993   : > { %v5729_v38 = vpop.f32.mrb[36].mxu1  ;;  %v3656_v26 = vadd.f32 %v5728_v9, %v3528_v41  ;;  %v4340_v41 = vld [vmem:[%s8833_s3 + $0x20] sm:$0xff] }
 0x994   : > { %v5730_v27 = vpop.f32.mrb[37].mxu1 }
 0x995   : > { %v5731_v15 = vadd.f32 %v5730_v27, %v5729_v38 }
 0x997   : > { %v5732_v39 = vpop.f32.mrb[38].mxu1  ;;  %v3661_v38 = vadd.f32 %v5731_v15, %v3533_v51 }
 0x998   : > { %v5733_v4 = vpop.f32.mrb[39].mxu1 }
 0x999   : > { %v8664_v56 = vadd.f32 %v5733_v4, %v5732_v39 }
 0x99e   : > { %v5767_v20 = vpop.f32.mrb[40].mxu1 }
 0x99f   : > { %v5768_v50 = vpop.f32.mrb[41].mxu1 }
 0x9a0   : > { %v5769_v14 = vadd.f32 %v5768_v50, %v5767_v20 }
 0x9a2   : > { %v5770_v11 = vpop.f32.mrb[42].mxu1  ;;  %v3736_v23 = vadd.f32 %v5769_v14, %v3631_v19 }
 0x9a3   : > { %v5771_v45 = vpop.f32.mrb[43].mxu1 }
 0x9a4   : > { %v5772_v16 = vadd.f32 %v5771_v45, %v5770_v11  ;;  %v3666_v45 = vadd.f32 %v8664_v56, %v3538_v24  ;;  %v3892_v56 = vpop.permute.xlu1 %3891  ;;  %v4739_v24 = vld [vmem:[#allocation20 + $0x90] sm:$0xff] }
 0x9a6   : > { %v5773_v5 = vpop.f32.mrb[44].mxu1  ;;  %v3741_v10 = vadd.f32 %v5772_v16, %v3636_v57 }
 0x9a7   : > { %v5774_v21 = vpop.f32.mrb[45].mxu1 }
 0x9a8   : > { %v5775_v25 = vadd.f32 %v5774_v21, %v5773_v5 }
 0x9aa   : > { %v5776_v36 = vpop.f32.mrb[46].mxu1  ;;  %v3746_v44 = vadd.f32 %v5775_v25, %v3641_v22 }
 0x9ab   : > { %v5777_v17 = vpop.f32.mrb[47].mxu1 }
 0x9ac   : > { %v5778_v29 = vadd.f32 %v5777_v17, %v5776_v36  ;;  %v3887_v36 = vld [vmem:[#allocation8] sm:$0xff] }
 0x9ae   : > { %v5779_v47 = vpop.f32.mrb[48].mxu1  ;;  %v3751_v7 = vadd.f32 %v5778_v29, %v3646_v58  ;;  %v4118_v29 = vld [vmem:[%s8833_s3 + $0x10] sm:$0xff] }
 0x9af   : > { %v5780_v43 = vpop.f32.mrb[49].mxu1  ;;  %v5910_v33 = vpop.f32.mrb[24].mxu0 }
 0x9b0   : > { %v5781_v42 = vadd.f32 %v5780_v43, %v5779_v47  ;;  %v3846_v59 = vadd.f32 %v5910_v33, %v3741_v10  ;;  %v3840_v31 = vpop.f32.mrb[25].mxu0  ;;  %v6196_v47 = vpack.c.bf16 %v4119_v8, %v4118_v29  ;;  %v4648_v8 = vld [vmem:[#allocation20 + $0x8] sm:$0xff] }
 0x9b1   : > { %v3841_v35 = vadd.f32 %v3840_v31, %v3736_v23  ;;  %v4267_v31 = vpop.permute.xlu1 %4266 }
 0x9b2   : > { %v3880_v60 = vmax.f32 %v3846_v59, 0.0  ;;  %v5782_v6 = vpop.f32.mrb[50].mxu1  ;;  %v3756_v28 = vadd.f32 %v5781_v42, %v3651_v3 }
 0x9b3   : > { %v3879_v37 = vmax.f32 %v3841_v35, 0.0  ;;  %v5783_v0 = vpop.f32.mrb[51].mxu1  ;;  %v5913_v61 = vpop.f32.mrb[26].mxu0 }
 0x9b4   : > { %v5784_v32 = vadd.f32 %v5783_v0, %v5782_v6  ;;  %v3856_v46 = vadd.f32 %v5913_v61, %v3751_v7  ;;  %v3850_v48 = vpop.f32.mrb[27].mxu0  ;;  %v4043_v7 = vld [vmem:[%s8833_s3 + $0x8] sm:$0xff]  ;;  %v4417_v35 = vpop.permute.xlu0 %4416  ;;  %v4490_v0 = vld [vmem:[%s8833_s3 + $0x30] sm:$0xff]  ;;  %v4491_v61 = vld [vmem:[%s8833_s3 + $0x38] sm:$0xff] }
 0x9b5   : > { %v6184_v2 = vpack.c.bf16 %v3880_v60, %v3879_v37  ;;  %v3851_v12 = vadd.f32 %v3850_v48, %v3746_v44  ;;  %v4341_v60 = vld [vmem:[%s8833_s3 + $0x28] sm:$0xff]  ;;  %v6205_v48 = vpack.c.bf16 %v4491_v61, %v4490_v0  ;;  %v4655_v61 = vld [vmem:[#allocation20 + $0x40] sm:$0xff] }
 0x9b6   : > { %v3882_v49 = vmax.f32 %v3856_v46, 0.0  ;;  %v5785_v54 = vpop.f32.mrb[52].mxu1  ;;  %v3761_v53 = vadd.f32 %v5784_v32, %v3656_v26  ;;  %v6202_v6 = vpack.c.bf16 %v4341_v60, %v4340_v41  ;;  %v4656_v41 = vld [vmem:[#allocation20 + $0x48] sm:$0xff]  ;;  %v4658_v60 = vld [vmem:[#allocation20 + $0x58] sm:$0xff] }
 0x9b7   : > { %v3881_v40 = vmax.f32 %v3851_v12, 0.0  ;;  %v5786_v62 = vpop.f32.mrb[53].mxu1  ;;  %v5916_v55 = vpop.f32.mrb[28].mxu0  ;;  %6185 = vmatpush3.bf16.msra.mxu0 %v6184_v2  ;;  %v6231_v0 = vpack.c.bf16 %v4658_v60, %v4656_v41 }
 0x9b8   : > { %v5787_v27 = vadd.f32 %v5786_v62, %v5785_v54  ;;  %v3866_v39 = vadd.f32 %v5916_v55, %v3761_v53  ;;  %v3860_v4 = vpop.f32.mrb[29].mxu0  ;;  %6186 = vmatprep.subr.bf16.mxu0 %v6912_v34 }
 0x9b9   : > { %v6187_v9 = vpack.c.bf16 %v3882_v49, %v3881_v40  ;;  %v3861_v20 = vadd.f32 %v3860_v4, %v3756_v28 }
 0x9ba   : > { %v3884_v50 = vmax.f32 %v3866_v39, 0.0  ;;  %v5788_v19 = vpop.f32.mrb[54].mxu1  ;;  %v3766_v14 = vadd.f32 %v5787_v27, %v3661_v38  ;;  %v4570_v38 = vpop.permute.xlu1 %4569  ;;  %v4738_v27 = vld [vmem:[#allocation20 + $0x88] sm:$0xff]  ;;  %v4740_v39 = vld [vmem:[#allocation20 + $0x98] sm:$0xff] }
 0x9bb   : > { %v3883_v11 = vmax.f32 %v3861_v20, 0.0  ;;  %v5789_v23 = vpop.f32.mrb[55].mxu1  ;;  %v5919_v13 = vpop.f32.mrb[30].mxu0  ;;  %6188 = vmatpush3.bf16.msra.mxu0 %v6187_v9  ;;  %v4737_v20 = vld [vmem:[#allocation20 + $0x80] sm:$0xff] }
 0x9bc   : > { %v5790_v57 = vadd.f32 %v5789_v23, %v5788_v19  ;;  %v3870_v16 = vpop.f32.mrb[31].mxu0  ;;  %6189 = vmatprep.subr.bf16.mxu0 %v6912_v34  ;;  %v4664_v9 = vpop.permute.xlu0 %4663  ;;  %v4742_v19 = vld [vmem:[#allocation20 + $0xa8] sm:$0xff]  ;;  %v4741_v23 = vld [vmem:[#allocation20 + $0xa0] sm:$0xff] }
 0x9bd   : > { %v6190_v15 = vpack.c.bf16 %v3884_v50, %v3883_v11  ;;  %v3871_v5 = vadd.f32 %v3870_v16, %v3766_v14  ;;  %v6207_v50 = vpack.c.bf16 %v4740_v39, %v4738_v27  ;;  %v4744_v14 = vld [vmem:[#allocation20 + $0xb8] sm:$0xff]  ;;  %v6209_v11 = vpack.c.bf16 %v4739_v24, %v4737_v20  ;;  %v4746_v16 = vld [vmem:[#allocation20 + $0xc8] sm:$0xff]  ;;  %v4975_v39 = vld [vmem:[#allocation20 + $0x100] sm:$0xff] }
 0x9be   : > { %v3771_v10 = vadd.f32 %v5790_v57, %v3666_v45  ;;  %v6532_v45 = vld [vmem:[#allocation11] sm:$0xff]  ;;  %v6211_v57 = vpack.c.bf16 %v4744_v14, %v4742_v19  ;;  %v4979_v19 = vld [vmem:[#allocation20 + $0x120] sm:$0xff]  ;;  %v4981_v14 = vld [vmem:[#allocation20 + $0x130] sm:$0xff] }
 0x9bf   : > { %6191 = vmatpush3.bf16.msra.mxu0 %v6190_v15  ;;  %v3885_v22 = vmax.f32 %v3871_v5, 0.0  ;;  %v4748_v15 = vld [vmem:[#allocation20 + $0xd8] sm:$0xff]  ;;  %v4902_v5 = vpop.permute.xlu1 %4901 }
 0x9c0   : > { %v3876_v18 = vadd.f32 %v5919_v13, %v3771_v10  ;;  %6192 = vmatprep.subr.bf16.mxu0 %v6912_v34  ;;  %v4743_v13 = vld [vmem:[#allocation20 + $0xb0] sm:$0xff]  ;;  %v4982_v20 = vld [vmem:[#allocation20 + $0x138] sm:$0xff] }
 0x9c1   : > { %v6213_v10 = vpack.c.bf16 %v4743_v13, %v4741_v23  ;;  %v4986_v23 = vld [vmem:[#allocation20 + $0x158] sm:$0xff]  ;;  %v6245_v13 = vpack.c.bf16 %v4981_v14, %v4979_v19 }
 0x9c2   : > { %v3886_v21 = vmax.f32 %v3876_v18, 0.0  ;;  %v5068_v18 = vpop.permute.xlu0 %5067 }
 0x9c4   : > { %v6193_v25 = vpack.c.bf16 %v3886_v21, %v3885_v22  ;;  %v6215_v21 = vpack.c.bf16 %v4748_v15, %v4746_v16  ;;  %v4745_v22 = vld [vmem:[#allocation20 + $0xc0] sm:$0xff]  ;;  %v4985_v16 = vld [vmem:[#allocation20 + $0x150] sm:$0xff]  ;;  %v4988_v15 = vld [vmem:[#allocation20 + $0x168] sm:$0xff] }
 0x9c6   : > { %6194 = vmatpush3.bf16.msra.mxu0 %v6193_v25  ;;  %v4747_v25 = vld [vmem:[#allocation20 + $0xd0] sm:$0xff] }
 0x9c7   : > { %5939 = vmatprep.subr.mxu0 %v6890_v1 }
 0x9c9   : > { %5937 = vmatmul.mubr.msk.f32.vlgmr.msra.gmra.mrb[32].mxu0 %vm1599_vm14, %v3887_v36  ;;  %v4750_v36 = vld [vmem:[#allocation20 + $0xe8] sm:$0xff] }
 0x9ca   : > { %5941 = vmatprep.mubr.msk.f32.mxu0 %vm6913_vm8, %v6890_v1 }
 0xa9c   : > { %v3963_v44 = vpop.f32.mrb[32].mxu0 }
 0xa9d   : > { %v3964_v30 = vadd.f32 %v3963_v44, %v3892_v56  ;;  %v5938_v17 = vpop.f32.mrb[33].mxu0  ;;  %v4752_v56 = vld [vmem:[#allocation20 + $0xf8] sm:$0xff]  ;;  %v6217_v44 = vpack.c.bf16 %v4747_v25, %v4745_v22  ;;  %v4989_v22 = vld [vmem:[#allocation20 + $0x170] sm:$0xff]  ;;  %v5142_v25 = vld [vmem:[#allocation20 + $0x188] sm:$0xff] }
 0xa9e   : > { %v4749_v17 = vld [vmem:[#allocation20 + $0xe0] sm:$0xff] }
 0xa9f   : > { %v3967_v58 = vmax.f32 %v3964_v30, 0.0  ;;  %v6219_v30 = vpack.c.bf16 %v4752_v56, %v4750_v36  ;;  %v5144_v36 = vld [vmem:[#allocation20 + $0x198] sm:$0xff] }
 0xaa1   : > { %5940 = vmatpush3.msra.mxu0 %v3967_v58 }
 0xaa2   : > { %5942 = vmatmul.mubr.msk.f32.vlgmr.msra.gmra.mrb[34].mxu0 %vm1715_vm1, %v8409_v52  ;;  %5944 = vmatprep.subr.mxu0 %v6890_v1  ;;  %v4042_v52 = vld [vmem:[%s8833_s3] sm:$0xff] }
 0xaa3   : > { %5945 = vmatpush3.msra.mxu0 %v3967_v58  ;;  %5946 = vmatprep.mubr.msk.f32.mxu0 %vm6913_vm8, %v6890_v1  ;;  %v6199_v43 = vpack.c.bf16 %v4043_v7, %v4042_v52  ;;  %v4647_v52 = vld [vmem:[#allocation20] sm:$0xff]  ;;  %v4649_v7 = vld [vmem:[#allocation20 + $0x10] sm:$0xff] }
 0xaa4   : > { %6195 = vmatprep.subr.bf16.mxu0 %v6912_v34 }
 0xaa5   : > { %6200 = vmatpush3.bf16.msra.mxu1 %v6199_v43  ;;  %v4652_v43 = vld [vmem:[#allocation20 + $0x28] sm:$0xff] }
 0xaa6   : > { %5947 = vmatmul.mubr.msk.f32.vlgmr.msra.gmra.mrb[36].mxu0 %vm1715_vm1, %v4045_v63  ;;  %6201 = vmatprep.subr.bf16.mxu1 %v6912_v34  ;;  %v4650_v63 = vld [vmem:[#allocation20 + $0x18] sm:$0xff] }
 0xaa7   : > { %6197 = vmatpush3.bf16.msra.mxu0 %v6196_v47  ;;  %5953 = vmatprep.mubr.msk.f32.mxu0 %vm6913_vm8, %v6890_v1  ;;  %v6223_v47 = vpack.c.bf16 %v4650_v63, %v4648_v8 }
 0xaa8   : > { %5963 = vmatprep.subr.mxu0 %v6890_v1 }
 0xb75   : > { %v4038_v33 = vpop.f32.mrb[34].mxu0 }
 0xb76   : > { %v5943_v3 = vpop.f32.mrb[35].mxu0  ;;  %5961 = vmatmul.mubr.msk.f32.vlgmr.msra.gmra.mrb[56].mxu1 %vm873_vm9, %v4038_v33  ;;  %v4654_v33 = vld [vmem:[#allocation20 + $0x38] sm:$0xff] }
 0xb77   : > { %5972 = vmatprep.mubr.msk.f32.mxu1 %vm6913_vm8, %v6890_v1  ;;  %6203 = vmatpush3.bf16.msra.mxu1 %v6202_v6  ;;  %v6225_v3 = vpack.c.bf16 %v4649_v7, %v4647_v52  ;;  %v5147_v52 = vld [vmem:[#allocation20 + $0x1b0] sm:$0xff]  ;;  %v5150_v7 = vld [vmem:[#allocation20 + $0x1c8] sm:$0xff] }
 0xb78   : > { %6204 = vmatprep.subr.bf16.mxu1 %v6912_v34 }
 0xb79   : > { %v4114_v42 = vpop.f32.mrb[36].mxu0 }
 0xb7a   : > { %5954 = vmatmul.mubr.msk.f32.vlgmr.msra.gmra.mrb[38].mxu0 %vm873_vm9, %v4114_v42  ;;  %v5948_v59 = vpop.f32.mrb[37].mxu0  ;;  %v6227_v42 = vpack.c.bf16 %v4654_v33, %v4652_v43  ;;  %v5152_v43 = vld [vmem:[#allocation20 + $0x1d8] sm:$0xff] }
 0xb7b   : > { %5964 = vmatpush3.msra.mxu0 %v3967_v58  ;;  %5965 = vmatprep.mubr.msk.f32.mxu0 %vm6913_vm8, %v6890_v1  ;;  %v4651_v59 = vld [vmem:[#allocation20 + $0x20] sm:$0xff] }
 0xb7c   : > { %5975 = vmatprep.subr.mxu0 %v6890_v1 }
 0xb7e   : > { %5966 = vmatmul.mubr.msk.f32.vlgmr.msra.gmra.mrb[40].mxu0 %vm1715_vm1, %v4267_v31  ;;  %v4653_v31 = vld [vmem:[#allocation20 + $0x30] sm:$0xff] }
 0xb7f   : > { %5976 = vmatpush3.msra.mxu0 %v3967_v58  ;;  %5977 = vmatprep.mubr.msk.f32.mxu0 %vm6913_vm8, %v6890_v1  ;;  %v4751_v58 = vld [vmem:[#allocation20 + $0xf0] sm:$0xff] }
 0xb80   : > { %5987 = vmatprep.subr.mxu0 %v6890_v1  ;;  %v6221_v29 = vpack.c.bf16 %v4751_v58, %v4749_v17  ;;  %v5143_v17 = vld [vmem:[#allocation20 + $0x190] sm:$0xff]  ;;  %v5146_v58 = vld [vmem:[#allocation20 + $0x1a8] sm:$0xff] }
 0xb82   : > { %5978 = vmatmul.mubr.msk.f32.vlgmr.msra.gmra.mrb[42].mxu0 %vm1715_vm1, %v4417_v35 }
 0xb83   : > { %5989 = vmatprep.mubr.msk.f32.mxu0 %vm6913_vm8, %v6890_v1 }
 0xc49   : > { %v4262_v28 = vpop.f32.mrb[56].mxu1 }
 0xc4a   : > { %v5962_v37 = vpop.f32.mrb[57].mxu1 }
 0xc4d   : > { %v4189_v26 = vpop.f32.mrb[38].mxu0 }
 0xc4e   : > { %v5955_v32 = vpop.f32.mrb[39].mxu0  ;;  %v4263_v46 = vadd.f32 %v4262_v28, %v4189_v26  ;;  %v6229_v28 = vpack.c.bf16 %v4653_v31, %v4651_v59  ;;  %v4657_v26 = vld [vmem:[#allocation20 + $0x50] sm:$0xff]  ;;  %v5154_v31 = vld [vmem:[#allocation20 + $0x1e8] sm:$0xff] }
 0xc4f   : > { %v5151_v59 = vld [vmem:[#allocation20 + $0x1d0] sm:$0xff] }
 0xc51   : > { %v4336_v2 = vpop.f32.mrb[40].mxu0 }
 0xc52   : > { %5973 = vmatmul.mubr.msk.f32.vlgmr.msra.gmra.mrb[58].mxu1 %vm873_vm9, %v4336_v2  ;;  %v5967_v12 = vpop.f32.mrb[41].mxu0 }
 0xc53   : > { %6206 = vmatpush3.bf16.msra.mxu1 %v6205_v48  ;;  %5984 = vmatprep.mubr.msk.f32.mxu1 %vm6913_vm8, %v6890_v1  ;;  %v4662_v48 = vld [vmem:[#allocation20 + $0x78] sm:$0xff] }
 0xc54   : > { %5992 = vmatprep.subr.mxu1 %v6890_v1 }
 0xc55   : > { %v4486_v34 = vpop.f32.mrb[42].mxu0 }
 0xc56   : > { %5985 = vmatmul.mubr.msk.f32.vlgmr.msra.gmra.mrb[60].mxu1 %vm873_vm9, %v4486_v34  ;;  %v5979_v51 = vpop.f32.mrb[43].mxu0  ;;  %v6233_v34 = vpack.c.bf16 %v4657_v26, %v4655_v61 }
 0xc57   : > { %5994 = vmatprep.mubr.msk.f32.mxu1 %vm6913_vm8, %v6890_v1 }
 0xd25   : > { %v4411_v49 = vpop.f32.mrb[58].mxu1 }
 0xd26   : > { %v4415_v54 = vadd.f32 %v4411_v49, %v4263_v46  ;;  %v5974_v53 = vpop.f32.mrb[59].mxu1  ;;  %v4660_v46 = vld [vmem:[#allocation20 + $0x68] sm:$0xff]  ;;  %v4659_v49 = vld [vmem:[#allocation20 + $0x60] sm:$0xff] }
 0xd27   : > { %v6235_v51 = vpack.c.bf16 %v4662_v48, %v4660_v46  ;;  %v4976_v53 = vld [vmem:[#allocation20 + $0x108] sm:$0xff] }
 0xd29   : > { %v4561_v40 = vpop.f32.mrb[60].mxu1 }
 0xd2a   : > { %v4565_v62 = vadd.f32 %v4561_v40, %v4415_v54  ;;  %v5986_v55 = vpop.f32.mrb[61].mxu1  ;;  %v4661_v54 = vld [vmem:[#allocation20 + $0x70] sm:$0xff]  ;;  %v4978_v40 = vld [vmem:[#allocation20 + $0x118] sm:$0xff] }
 0xd2b   : > { %v6239_v27 = vpack.c.bf16 %v4978_v40, %v4976_v53 }
 0xd2c   : > { %v4572_v4 = vadd.f32 %v4570_v38, %v4565_v62  ;;  %v6237_v38 = vpack.c.bf16 %v4661_v54, %v4659_v49 }
 0xd2e   : > { %5988 = vmatpush3.msra.mxu0 %v4572_v4  ;;  %5993 = vmatpush3.msra.mxu1 %v4572_v4 }
 0xd2f   : > { %5995 = vmatmul.mubr.msk.f32.vlgmr.msra.gmra.mrb[62].mxu1 %vm1715_vm1, %v4664_v9  ;;  %5997 = vmatprep.subr.mxu1 %v6890_v1  ;;  %v4980_v9 = vld [vmem:[#allocation20 + $0x128] sm:$0xff] }
 0xd30   : > { %5998 = vmatpush3.msra.mxu1 %v4572_v4  ;;  %5999 = vmatprep.mubr.msk.f32.mxu1 %vm6913_vm8, %v6890_v1 }
 0xd31   : > { %6002 = vmatprep.subr.mxu1 %v6890_v1  ;;  %5990 = vmatmul.mubr.msk.f32.vlgmr.msra.gmra.mrb[44].mxu0 %vm1715_vm1, %v6532_v45 }
 0xd32   : > { %6208 = vmatprep.subr.bf16.mxu0 %v6207_v50  ;;  %4820 = vmatprep.mubr.f32.mxu0 %v6890_v1  ;;  %v6243_v50 = vpack.c.bf16 %v4982_v20, %v4980_v9 }
 0xd33   : > { %6000 = vmatmul.mubr.msk.f32.vlgmr.msra.gmra.mrb[64].mxu1 %vm1715_vm1, %v4902_v5  ;;  %6210 = vmatpush1.bf16.msra.mxu0 %v6209_v11  ;;  %v4984_v11 = vld [vmem:[#allocation20 + $0x148] sm:$0xff]  ;;  %v4990_v5 = vld [vmem:[#allocation20 + $0x178] sm:$0xff] }
 0xd34   : > { %6003 = vmatpush3.msra.mxu1 %v4572_v4  ;;  %6004 = vmatprep.mubr.msk.f32.mxu1 %vm6913_vm8, %v6890_v1  ;;  %v4977_v4 = vld [vmem:[#allocation20 + $0x110] sm:$0xff]  ;;  %v6247_v45 = vpack.c.bf16 %v4986_v23, %v4984_v11 }
 0xd35   : > { %6212 = vmatprep.subr.bf16.mxu0 %v6211_v57  ;;  %v6241_v24 = vpack.c.bf16 %v4977_v4, %v4975_v39  ;;  %v4983_v57 = vld [vmem:[#allocation20 + $0x140] sm:$0xff] }
 0xd37   : > { %6005 = vmatmul.mubr.msk.f32.vlgmr.msra.gmra.mrb[66].mxu1 %vm1715_vm1, %v5068_v18  ;;  %6214 = vmatpush1.bf16.msra.mxu0 %v6213_v10  ;;  %v6249_v10 = vpack.c.bf16 %v4985_v16, %v4983_v57  ;;  %v6251_v18 = vpack.c.bf16 %v4990_v5, %v4988_v15 }
 0xd38   : > { %6216 = vmatprep.subr.bf16.mxu0 %v6215_v21  ;;  %v4987_v21 = vld [vmem:[#allocation20 + $0x160] sm:$0xff] }
 0xd39   : > { %v6253_v56 = vpack.c.bf16 %v4989_v22, %v4987_v21 }
 0xd3b   : > { %6218 = vmatpush1.bf16.msra.mxu0 %v6217_v44  ;;  %v6255_v44 = vpack.c.bf16 %v5144_v36, %v5142_v25 }
 0xd3c   : > { %6220 = vmatprep.subr.bf16.mxu0 %v6219_v30  ;;  %v5141_v30 = vld [vmem:[#allocation20 + $0x180] sm:$0xff] }
 0xd3d   : > { %v6257_v8 = vpack.c.bf16 %v5143_v17, %v5141_v30 }
 0xd3f   : > { %6222 = vmatpush1.bf16.msra.mxu0 %v6221_v29  ;;  %v5148_v29 = vld [vmem:[#allocation20 + $0x1b8] sm:$0xff] }
 0xd40   : > { %6224 = vmatprep.subr.bf16.mxu0 %v6223_v47  ;;  %v6259_v63 = vpack.c.bf16 %v5148_v29, %v5146_v58  ;;  %v5145_v47 = vld [vmem:[#allocation20 + $0x1a0] sm:$0xff] }
 0xd41   : > { %v6261_v33 = vpack.c.bf16 %v5147_v52, %v5145_v47 }
 0xe02   : > { %v4733_v35 = vpop.f32.mrb[62].mxu1 }
 0xe03   : > { %5541 = vmatmul.mubr.msk.f32.vlgmr.msra.gmra.mrb[46].mxu0 %vm1599_vm14, %v4733_v35  ;;  %v5996_v6 = vpop.f32.mrb[63].mxu1  ;;  %v5156_v35 = vld [vmem:[#allocation20 + $0x1f8] sm:$0xff] }
 0xe04   : > { %6226 = vmatpush1.bf16.msra.mxu0 %v6225_v3  ;;  %v4643_v37 = vpop.f32.mrb[44].mxu0  ;;  %4894 = vmatprep.mubr.f32.mxu0 %v6890_v1  ;;  %v6263_v3 = vpack.c.bf16 %v5152_v43, %v5150_v7  ;;  %v6267_v60 = vpack.c.bf16 %v5156_v35, %v5154_v31  ;;  %v5153_v6 = vld [vmem:[#allocation20 + $0x1e0] sm:$0xff] }
 0xe05   : > { %6228 = vmatprep.subr.bf16.mxu0 %v6227_v42  ;;  %v5991_v32 = vpop.f32.mrb[45].mxu0  ;;  %v5149_v42 = vld [vmem:[#allocation20 + $0x1c0] sm:$0xff] }
 0xe06   : > { %v4971_v2 = vpop.f32.mrb[64].mxu1  ;;  %v6265_v41 = vpack.c.bf16 %v5151_v59, %v5149_v42 }
 0xe07   : > { %v6001_v12 = vpop.f32.mrb[65].mxu1 }
 0xe08   : > { %6230 = vmatpush1.bf16.msra.mxu0 %v6229_v28  ;;  %v5155_v28 = vld [vmem:[#allocation20 + $0x1f0] sm:$0xff] }
 0xe09   : > { %6232 = vmatprep.subr.bf16.mxu0 %v6231_v0 }
 0xe0a   : > { %v8748_v62 = vpop.f32.mrb[66].mxu1 }
 0xe0b   : > { %v6006_v55 = vpop.f32.mrb[67].mxu1 }
 0xe0c   : > { %6234 = vmatpush1.bf16.msra.mxu0 %v6233_v34 }
 0xe0d   : > { %6236 = vmatprep.subr.bf16.mxu0 %v6235_v51 }
 0xe10   : > { %6238 = vmatpush1.bf16.msra.mxu0 %v6237_v38 }
 0xe11   : > { %6240 = vmatprep.subr.bf16.mxu0 %v6239_v27 }
 0xe13   : > { %5542 = vmatmul.mubr.msk.f32.vlgmr.msra.gmra.mrb[46].mxu0 %vm1599_vm14, %v4643_v37  ;;  %v6269_v37 = vpack.c.bf16 %v5155_v28, %v5153_v6 }
 0xe14   : > { %6242 = vmatpush1.bf16.msra.mxu0 %v6241_v24  ;;  %5058 = vmatprep.mubr.f32.mxu0 %v6890_v1 }
 0xe15   : > { %6244 = vmatprep.subr.bf16.mxu0 %v6243_v50 }
 0xe18   : > { %6246 = vmatpush1.bf16.msra.mxu0 %v6245_v13 }
 0xe19   : > { %6248 = vmatprep.subr.bf16.mxu0 %v6247_v45 }
 0xe1c   : > { %6250 = vmatpush1.bf16.msra.mxu0 %v6249_v10 }
 0xe1d   : > { %6252 = vmatprep.subr.bf16.mxu0 %v6251_v18 }
 0xe20   : > { %6254 = vmatpush1.bf16.msra.mxu0 %v6253_v56 }
 0xe21   : > { %6256 = vmatprep.subr.bf16.mxu0 %v6255_v44 }
 0xe23   : > { %5544 = vmatmul.mubr.msk.f32.vlgmr.msra.gmra.mrb[46].mxu0 %vm1599_vm14, %v4971_v2 }
 0xe24   : > { %6258 = vmatpush1.bf16.msra.mxu0 %v6257_v8  ;;  %5224 = vmatprep.mubr.f32.mxu0 %v6890_v1  ;;  %v5237_v1 = vpop.permute.xlu1 %5236 }
 0xe25   : > { %6260 = vmatprep.subr.bf16.mxu0 %v6259_v63 }
 0xe28   : > { %6262 = vmatpush1.bf16.msra.mxu0 %v6261_v33 }
 0xe29   : > { %6264 = vmatprep.subr.bf16.mxu0 %v6263_v3 }
 0xe2c   : > { %6266 = vmatpush1.bf16.msra.mxu0 %v6265_v41 }
 0xe2d   : > { %6268 = vmatprep.subr.bf16.mxu0 %v6267_v60 }
 0xe30   : > { %6270 = vmatpush1.bf16.msra.mxu0 %v6269_v37 }
 0xe33   : > { %5546 = vmatmul.mubr.msk.f32.vlgmr.msra.gmra.mrb[46].mxu0 %vm1599_vm14, %v8748_v62 }
 0xf06   : > { %v5226_v0 = vpop.f32.mrb[46].mxu0 }
 0xf07   : > { %v5239_v61 = vadd.f32 %v5237_v1, %v5226_v0  ;;  %v5228_v26 = vpop.f32.mrb[47].mxu0 }
 0xf08   : > { %v5240_v32 = vadd.f32 %v5237_v1, %v5228_v26 }
 0xf09   : > { %v5243_v46 = vrot.slane %v5239_v61, 4 }
 0xf0a   : > { %v5244_v48 = vrot.slane %v5240_v32, 4 }
 0xf0b   : > { %v5247_v2 = vmax.f32 %v5239_v61, %v5243_v46 }
 0xf0c   : > { %v5248_v12 = vmax.f32 %v5240_v32, %v5244_v48 }
 0xf0d   : > { %v5249_v34 = vsub.f32 %v5239_v61, %v5247_v2  ;;  %v5257_v51 = vrot.slane %v5247_v2, 4 }
 0xf0e   : > { %v5250_v49 = vsub.f32 %v5240_v32, %v5248_v12  ;;  %v5258_v54 = vrot.slane %v5248_v12, 4 }
 0xf0f   : > { %v5261_v53 = vsub.f32 %v5239_v61, %v5257_v51  ;;  %v5251_v55 = vmul.f32 1.442695, %v5249_v34 }
 0xf10   : > { %v5262_v40 = vsub.f32 %v5240_v32, %v5258_v54  ;;  %v5253_v27 = vmul.f32 1.442695, %v5250_v49 }
 0xf11   : > { %v5263_v38 = vmul.f32 1.442695, %v5261_v53 }
 0xf12   : > { %v5265_v39 = vmul.f32 1.442695, %v5262_v40 }
 0xf13   : > { %6520 = vpow2.f32 %v5263_v38 }
 0xf14   : > { %6522 = vpow2.f32 %v5265_v39 }
 0xf15   : > { %6524 = vpow2.f32 %v5251_v55 }
 0xf16   : > { %6526 = vpow2.f32 %v5253_v27 }
 0xf1d   : > { %v6521_v62 = vpop.eup %6520 }
 0xf1e   : > { %v6523_v4 = vpop.eup %6522  ;;  %v5269_v9 = vrot.slane %v6521_v62, 4 }
 0xf1f   : > { %v6525_v20 = vpop.eup %6524  ;;  %v5270_v24 = vrot.slane %v6523_v4, 4 }
 0xf20   : > { %v6527_v50 = vpop.eup %6526  ;;  %v5273_v19 = vadd.f32 %v6525_v20, %v5269_v9 }
 0xf21   : > { %v5274_v14 = vadd.f32 %v6527_v50, %v5270_v24 }
 0xf22   : > { %6528 = vrcp.f32 %v5273_v19 }
 0xf23   : > { %6530 = vrcp.f32 %v5274_v14 }
 0xf2c   : > { %v6529_v11 = vpop.eup %6528 }
 0xf2d   : > { %v6531_v23 = vpop.eup %6530  ;;  %v5281_v13 = vrot.slane %v6529_v11, 4  ;;  %v5277_v57 = vmul.f32 %v6529_v11, %v6525_v20 }
 0xf2e   : > { %v5282_v45 = vrot.slane %v6531_v23, 4  ;;  %v5278_v15 = vmul.f32 %v6531_v23, %v6527_v50 }
 0xf2f   : > { %v5285_v16 = vmul.f32 %v6521_v62, %v5281_v13 }
 0xf30   : > { %v5286_v5 = vmul.f32 %v6523_v4, %v5282_v45 }
 0xf31   : > { %v5287_v10 = vsel %vm1188_vm10, %v5277_v57, %v5285_v16 }
 0xf32   : > { %5289 = vst [vmem:[%s783_s27] sm:$0xff] %v5287_v10  ;;  %v5288_v18 = vsel %vm1188_vm10, %v5278_v15, %v5286_v5 }
 0xf33   : > { %5290 = vst [vmem:[%s783_s27 + $0x8] sm:$0xff] %v5288_v18 }
 0xf34 PF: > { %s8835_s0 = sld [smem:[#allocation27_spill]] }
 0xf3a   : > { %s36_s1 = sadd.s32 1, %s8835_s0  }
 0xf3b   : > { %p33_p2 = scmp.ge.s32.totalorder %s36_s1, 4  }
 0xf3d   :  { %35 = sbr.rel (!%p33_p2) target bundleno = 17 (0x11), region = 182 }
 0xf44   :  { %5312 = vsyncpa [#allocation5], 1 }
 0xf45   :  { %5314 = vsyncpa [#allocation5 + $0x1], 1 }
 0xf46   :  { %5315 = vsyncpa [#allocation7], 1 }
 0xf47   :  { %5316 = vsyncpa [#allocation10], 1 }
 0xf48   :  { %5317 = vsyncpa [#allocation13], 1 }
 0xf49   :  { %5318 = vsyncpa [#allocation16], 1 }
 0xf4a   :  { %5319 = vsyncpa [#allocation19], 1 }

</bundles_post_ra>
